<compile_context>
chip_gen: v6e
topology: v6e:2x2x1
jax: 0.10.0
libtpu: 0.0.40
codegen_flags: <defaults>
</compile_context>

<pallas_src>
import functools

import jax
import jax.numpy as jnp
import numpy as np
from jax import lax
from jax.experimental import pallas as pl
from jax.experimental.pallas import tpu as pltpu

NEG_SLOPE = 0.2
BN_EPS = 1e-5


def _leaky(x):
    return jnp.where(x >= 0, x, NEG_SLOPE * x)


# ----------------------------- fused Pallas kernel -----------------------------

def fused_e_model_kernel(lhs_ref, w0_ref, w1_ref, g1_ref, be1_ref, wl_ref, bl_ref, o_ref):
    """Whole E_Model forward (img_dim=16) in one kernel invocation.

    lhs_ref : [16*N, 256] bf16  layer-0 input slabs; row r = n*16 + dr*8 + I (I in 0..4),
                                cols = 4x18x3 padded-input slab for conv0 row h=2I+dr-1
                                (kh, col, cin order) + bias-indicator col + padding.
                                Rows mapping to conv1 zero-padding are all-zero.
    w0_ref  : [256, 640]  bf16  conv0 weight+bias packed so the GEMM emits layer-0 output in
                                the padded space-to-depth layout, lanes (w_pos 0..9, cin).
    w1_ref  : [4, 640, 512] bf16  conv1 weight, one block per sublane shift {0,1,8,9}
                                (shift = dr*8 + bi, kh = 2*bi + dr); output lanes (j, cout).
    g1_ref, be1_ref : [1, 128] f32  BatchNorm gamma / beta.
    wl_ref  : [4, 512, 128] bf16  linear weight split per output row i, lanes padded to 128.
    bl_ref  : [1, 128]    f32   linear bias (lane padded).
    o_ref   : [N, 128]    f32   output (first z_dim lanes valid).
    """
    rows = lhs_ref.shape[0]            # 16 * N
    n = rows // 16

    # ---- layer 0: conv(3->64,4x4,s2,p1) + bias + LeakyReLU, emitted straight into the
    #      zero-padded space-to-depth layout conv1 needs (no scatter, no scratch) ----
    z = jnp.dot(lhs_ref[...], w0_ref[...], preferred_element_type=jnp.float32)  # [16N, 640]
    z = _leaky(z).astype(jnp.bfloat16)

    # ---- layer 1: conv(64->128,4x4,s2,p1,no bias) as 4 accumulated shift-GEMMs ----
    y1 = jnp.dot(z, w1_ref[0], preferred_element_type=jnp.float32)              # shift 0
    for idx, k in ((1, 1), (2, 8), (3, 9)):
        zs = jnp.concatenate([z[k:, :], z[:k, :]], axis=0)                      # sublane shift
        y1 = y1 + jnp.dot(zs, w1_ref[idx], preferred_element_type=jnp.float32)
    # y1: [16N, 512] f32; row r = n*16 + i (i < 4 valid), lanes (j, cout)

    # ---- BatchNorm (training-mode batch stats over the 16N valid positions) + LeakyReLU ----
    ridx = lax.broadcasted_iota(jnp.int32, (rows, 512), 0)
    valid = ((ridx & 15) < 4).astype(jnp.float32)
    y1m = y1 * valid
    s1 = jnp.sum(y1m, axis=0, keepdims=True)                                    # [1, 512]
    s2 = jnp.sum(y1m * y1, axis=0, keepdims=True)                               # [1, 512]
    s1 = s1[:, 0:128] + s1[:, 128:256] + s1[:, 256:384] + s1[:, 384:512]        # fold j blocks
    s2 = s2[:, 0:128] + s2[:, 128:256] + s2[:, 256:384] + s2[:, 384:512]
    cnt = jnp.float32(16 * n)
    mean = s1 / cnt
    var = s2 / cnt - mean * mean                 # biased batch variance (training-mode BN)
    scale = lax.rsqrt(var + BN_EPS) * g1_ref[...]
    shift = be1_ref[...] - mean * scale
    scale4 = jnp.concatenate([scale, scale, scale, scale], axis=1)              # [1, 512]
    shift4 = jnp.concatenate([shift, shift, shift, shift], axis=1)
    h1 = _leaky(y1 * scale4 + shift4).astype(jnp.bfloat16)                      # [16N, 512]

    # ---- linear(2048 -> z_dim): row compaction via tiny selection GEMMs + 4 accumulated
    #      GEMMs against the pre-split weight (no reshapes / unaligned slices) ----
    col = lax.broadcasted_iota(jnp.int32, (n, rows), 1)
    base = lax.broadcasted_iota(jnp.int32, (n, rows), 0) * 16
    out = jnp.zeros((n, 128), jnp.float32)
    for i in range(4):
        sel = (col == base + i).astype(jnp.bfloat16)                            # [N, 16N]
        hrow = jnp.dot(sel, h1, preferred_element_type=jnp.float32)             # [N, 512]
        out = out + jnp.dot(hrow.astype(jnp.bfloat16), wl_ref[i],
                            preferred_element_type=jnp.float32)
    o_ref[...] = out + bl_ref[...]


# ----------------------------- wrapper -----------------------------

def _whole(shape):
    return pl.BlockSpec(tuple(shape), lambda i: (0,) * len(shape))


def _build_lhs(x_nchw):
    """Layer-0 LHS: per (n, dr, I) row the 4x18x3 padded-input slab feeding conv0 output row
    h = 2I + dr - 1, plus a bias-indicator column; all-zero rows where 2I+dr is conv1
    zero-padding.  Row order r = n*16 + dr*8 + I."""
    n = x_nchw.shape[0]
    x = jnp.transpose(x_nchw, (0, 2, 3, 1))                        # NHWC [N,16,16,3]
    xp = jnp.pad(x, ((0, 0), (1, 1), (1, 1), (0, 0)))              # [N,18,18,3]
    slabs = jnp.stack([xp[:, 2 * h:2 * h + 4, :, :].reshape(n, 216) for h in range(8)],
                      axis=1)                                      # [N,8,216] (kh, col, cin)
    slabs = jnp.concatenate([slabs, jnp.ones((n, 8, 1), x.dtype)], axis=-1)   # + bias col
    dr0 = jnp.concatenate([jnp.zeros((n, 1, 217), x.dtype),        # I=0 is padding (dr=0)
                           slabs[:, 1::2, :],                      # I=1..4 <- h=1,3,5,7
                           jnp.zeros((n, 3, 217), x.dtype)], axis=1)
    dr1 = jnp.concatenate([slabs[:, 0::2, :],                      # I=0..3 <- h=0,2,4,6
                           jnp.zeros((n, 4, 217), x.dtype)], axis=1)
    lhs = jnp.concatenate([dr0, dr1], axis=1)                      # [N,16,217]
    lhs = jnp.pad(lhs, ((0, 0), (0, 0), (0, 256 - 217)))           # pad K to 256
    return lhs.reshape(n * 16, 256)


@functools.partial(jax.jit, static_argnames="z_dim")
def e_model_forward(kp, x_nchw, z_dim=32):
    n = x_nchw.shape[0]
    lhs = _build_lhs(x_nchw.astype(jnp.float32)).astype(jnp.bfloat16)
    operands = (lhs, kp['w0'], kp['w1'], kp['g1'], kp['be1'], kp['wl'], kp['bl'])

    flops = 2 * (16 * n * 256 * 640            # layer 0 GEMM
                 + 4 * 16 * n * 640 * 512      # conv1 shift GEMMs
                 + 4 * n * 16 * n * 512        # selection GEMMs
                 + 4 * n * 512 * 128)          # linear GEMMs
    bytes_accessed = int(sum(o.size * o.dtype.itemsize for o in operands) + n * 128 * 4)

    out = pl.pallas_call(
        fused_e_model_kernel,
        out_shape=jax.ShapeDtypeStruct((n, 128), jnp.float32),
        grid=(1,),
        in_specs=[_whole(o.shape) for o in operands],
        out_specs=_whole((n, 128)),
        compiler_params=pltpu.CompilerParams(
            dimension_semantics=("arbitrary",),
            vmem_limit_bytes=32 * 1024 * 1024),
        cost_estimate=pl.CostEstimate(flops=int(flops), transcendentals=128,
                                      bytes_accessed=bytes_accessed),
    )(*operands)
    return out[:, :z_dim]


# ----------------------------- params (torch layout) + packing -----------------------------

def init_raw_params(key, img_dim=16, z_dim=32):
    assert img_dim == 16, "kernel is specialized to the img_dim=16 instantiation"
    k = jax.random.split(key, 5)
    return dict(
        conv0_w=0.05 * jax.random.normal(k[0], (64, 3, 4, 4), jnp.float32),
        conv0_b=0.05 * jax.random.normal(k[1], (64,), jnp.float32),
        conv1_w=0.05 * jax.random.normal(k[2], (128, 64, 4, 4), jnp.float32),
        bn1_gamma=jnp.ones((128,), jnp.float32),      # PyTorch BN defaults
        bn1_beta=jnp.zeros((128,), jnp.float32),
        lin_w=0.02 * jax.random.normal(k[3], (z_dim, 2048), jnp.float32),  # [out, in(c,h,w)]
        lin_b=0.02 * jax.random.normal(k[4], (z_dim,), jnp.float32),
    )


def pack_params_for_kernel(raw):
    z_dim = raw['lin_w'].shape[0]

    # conv0 -> W0 [256, 640]: rows (kh, col18, cin) + bias row 216; lanes (w_pos, cout).
    w0hwio = np.transpose(np.asarray(raw['conv0_w']), (2, 3, 1, 0))   # [kh, kw, cin, cout]
    b0 = np.asarray(raw['conv0_b'])
    W0 = np.zeros((256, 640), np.float32)
    for w_pos in range(1, 9):                        # w_pos 0 / 9 stay zero (conv1 padding)
        for kh in range(4):
            for kw in range(4):
                col = 2 * w_pos - 2 + kw
                r0 = kh * 54 + col * 3
                W0[r0:r0 + 3, w_pos * 64:(w_pos + 1) * 64] = w0hwio[kh, kw]
        W0[216, w_pos * 64:(w_pos + 1) * 64] = b0

    # conv1 -> 4 shift blocks [640, 512]; block s for shift dr*8+bi, kh = 2*bi + dr.
    w1hwio = np.transpose(np.asarray(raw['conv1_w']), (2, 3, 1, 0))   # [kh, kw, cin, cout]
    W1 = np.zeros((4, 640, 512), np.float32)
    for s, (dr, bi) in enumerate([(0, 0), (0, 1), (1, 0), (1, 1)]):   # shifts 0, 1, 8, 9
        kh = 2 * bi + dr
        for j in range(4):
            for kw in range(4):
                w_pos = 2 * j + kw
                W1[s, w_pos * 64:(w_pos + 1) * 64, j * 128:(j + 1) * 128] = w1hwio[kh, kw]

    # linear -> 4 row blocks [512, 128]; torch input index = cout*16 + i*4 + j.
    wl = np.asarray(raw['lin_w']).reshape(z_dim, 128, 4, 4)           # [z, cout, i, j]
    WL = np.transpose(wl, (2, 3, 1, 0)).reshape(4, 512, z_dim)        # [i, (j,cout), z]
    WLp = np.zeros((4, 512, 128), np.float32)
    WLp[:, :, :z_dim] = WL
    blp = np.zeros((1, 128), np.float32)
    blp[0, :z_dim] = np.asarray(raw['lin_b'])

    return dict(
        w0=jnp.asarray(W0, jnp.bfloat16),
        w1=jnp.asarray(W1, jnp.bfloat16),
        g1=jnp.asarray(raw['bn1_gamma']).reshape(1, 128).astype(jnp.float32),
        be1=jnp.asarray(raw['bn1_beta']).reshape(1, 128).astype(jnp.float32),
        wl=jnp.asarray(WLp, jnp.bfloat16),
        bl=jnp.asarray(blp, jnp.float32),
    )


# ----------------------------- pure-JAX reference (f32) -----------------------------

def reference_forward(raw, x_nchw):
    dn = ('NCHW', 'OIHW', 'NCHW')
    y = lax.conv_general_dilated(x_nchw, raw['conv0_w'], (2, 2), ((1, 1), (1, 1)),
                                 dimension_numbers=dn)
    y = _leaky(y + raw['conv0_b'][None, :, None, None])
    y = lax.conv_general_dilated(y, raw['conv1_w'], (2, 2), ((1, 1), (1, 1)),
                                 dimension_numbers=dn)
    mean = jnp.mean(y, axis=(0, 2, 3), keepdims=True)
    var = jnp.mean((y - mean) ** 2, axis=(0, 2, 3), keepdims=True)
    y = (y - mean) * lax.rsqrt(var + BN_EPS)
    y = y * raw['bn1_gamma'][None, :, None, None] + raw['bn1_beta'][None, :, None, None]
    y = _leaky(y)
    flat = y.reshape(x_nchw.shape[0], -1)          # torch x.view(N, -1): NCHW order
    return flat @ raw['lin_w'].T + raw['lin_b']


if __name__ == "__main__":
    IMG_DIM, Z_DIM, BATCH = 16, 32, 2

    key = jax.random.PRNGKey(0)
    k_x, k_p = jax.random.split(key)
    x = jax.random.normal(k_x, (BATCH, 3, IMG_DIM, IMG_DIM), jnp.float32)

    raw = init_raw_params(k_p, IMG_DIM, Z_DIM)
    kp = pack_params_for_kernel(raw)

    out = jax.block_until_ready(e_model_forward(kp, x, z_dim=Z_DIM))
    assert out.shape == (BATCH, Z_DIM), out.shape
    assert bool(jnp.all(jnp.isfinite(out)))

    # sanity check against a pure-JAX f32 reference (bf16 matmuls -> loose tolerance)
    ref = reference_forward(raw, x)
    assert bool(jnp.allclose(out, ref, atol=1e-1, rtol=1e-1)), (
        "mismatch vs reference, max abs err = "
        + str(float(jnp.max(jnp.abs(out - ref)))))

    print("KERNEL_OK")
</pallas_src>

<mosaic_0001>
module attributes {stable_mosaic.version = 11 : i64} {
  func.func @fused_e_model_kernel(%arg0: i32, %arg1: memref<32x256xbf16, #tpu.memory_space<vmem>>, %arg2: memref<256x640xbf16, #tpu.memory_space<vmem>>, %arg3: memref<4x640x512xbf16, #tpu.memory_space<vmem>>, %arg4: memref<1x128xf32, #tpu.memory_space<vmem>>, %arg5: memref<1x128xf32, #tpu.memory_space<vmem>>, %arg6: memref<4x512x128xbf16, #tpu.memory_space<vmem>>, %arg7: memref<1x128xf32, #tpu.memory_space<vmem>>, %arg8: memref<2x128xf32, #tpu.memory_space<vmem>>) attributes {dimension_semantics = [#tpu.dimension_semantics<arbitrary>], iteration_bounds = array<i64: 1>, scalar_prefetch = 0 : i64, scratch_operands = 0 : i64, tpu.core_type = #tpu.core_type<tc>, window_params = [{pipeline_mode = #tpu.pipeline_mode<synchronous>, transform_indices = @transform_0, window_bounds = array<i64: 32, 256>}, {pipeline_mode = #tpu.pipeline_mode<synchronous>, transform_indices = @transform_1, window_bounds = array<i64: 256, 640>}, {pipeline_mode = #tpu.pipeline_mode<synchronous>, transform_indices = @transform_2, window_bounds = array<i64: 4, 640, 512>}, {pipeline_mode = #tpu.pipeline_mode<synchronous>, transform_indices = @transform_3, window_bounds = array<i64: 1, 128>}, {pipeline_mode = #tpu.pipeline_mode<synchronous>, transform_indices = @transform_4, window_bounds = array<i64: 1, 128>}, {pipeline_mode = #tpu.pipeline_mode<synchronous>, transform_indices = @transform_5, window_bounds = array<i64: 4, 512, 128>}, {pipeline_mode = #tpu.pipeline_mode<synchronous>, transform_indices = @transform_6, window_bounds = array<i64: 1, 128>}, {pipeline_mode = #tpu.pipeline_mode<synchronous>, transform_indices = @transform_7, window_bounds = array<i64: 2, 128>}]} {
    %c0 = arith.constant 0 : index
    %c0_0 = arith.constant 0 : index
    %0 = vector.load %arg1[%c0, %c0_0] : memref<32x256xbf16, #tpu.memory_space<vmem>>, vector<32x256xbf16>
    %c0_1 = arith.constant 0 : index
    %c0_2 = arith.constant 0 : index
    %1 = vector.load %arg2[%c0_1, %c0_2] : memref<256x640xbf16, #tpu.memory_space<vmem>>, vector<256x640xbf16>
    %cst = arith.constant dense<0.000000e+00> : vector<32x640xf32>
    %2 = tpu.matmul %0, %1, %cst {dimension_numbers = #tpu.dot_dimension_numbers<[1], [0], [0], [1], [0, 0, 1, 1], [], []>} : vector<32x256xbf16>, vector<256x640xbf16>, vector<32x640xf32> -> vector<32x640xf32>
    %cst_3 = arith.constant 0.000000e+00 : f32
    %3 = vector.broadcast %cst_3 : f32 to vector<32x640xf32>
    %4 = arith.cmpf oge, %2, %3 : vector<32x640xf32>
    %cst_4 = arith.constant 2.000000e-01 : f32
    %5 = vector.broadcast %cst_4 : f32 to vector<32x640xf32>
    %6 = arith.mulf %5, %2 : vector<32x640xf32>
    %7 = arith.select %4, %2, %6 : vector<32x640xi1>, vector<32x640xf32>
    %8 = arith.truncf %7 : vector<32x640xf32> to vector<32x640xbf16>
    %c0_5 = arith.constant 0 : index
    %c0_6 = arith.constant 0 : index
    %c0_7 = arith.constant 0 : index
    %9 = vector.load %arg3[%c0_5, %c0_6, %c0_7] : memref<4x640x512xbf16, #tpu.memory_space<vmem>>, vector<1x640x512xbf16>
    %10 = vector.shape_cast %9 : vector<1x640x512xbf16> to vector<640x512xbf16>
    %cst_8 = arith.constant dense<0.000000e+00> : vector<32x512xf32>
    %11 = tpu.matmul %8, %10, %cst_8 {dimension_numbers = #tpu.dot_dimension_numbers<[1], [0], [0], [1], [0, 0, 1, 1], [], []>} : vector<32x640xbf16>, vector<640x512xbf16>, vector<32x512xf32> -> vector<32x512xf32>
    %12 = vector.extract_strided_slice %8 {offsets = [1, 0], sizes = [31, 640], strides = [1, 1]} : vector<32x640xbf16> to vector<31x640xbf16>
    %13 = vector.extract_strided_slice %8 {offsets = [0, 0], sizes = [1, 640], strides = [1, 1]} : vector<32x640xbf16> to vector<1x640xbf16>
    %14 = tpu.concatenate %12, %13 in 0 : vector<31x640xbf16>, vector<1x640xbf16> -> vector<32x640xbf16>
    %c1 = arith.constant 1 : index
    %c0_9 = arith.constant 0 : index
    %c0_10 = arith.constant 0 : index
    %15 = vector.load %arg3[%c1, %c0_9, %c0_10] : memref<4x640x512xbf16, #tpu.memory_space<vmem>>, vector<1x640x512xbf16>
    %16 = vector.shape_cast %15 : vector<1x640x512xbf16> to vector<640x512xbf16>
    %cst_11 = arith.constant dense<0.000000e+00> : vector<32x512xf32>
    %17 = tpu.matmul %14, %16, %cst_11 {dimension_numbers = #tpu.dot_dimension_numbers<[1], [0], [0], [1], [0, 0, 1, 1], [], []>} : vector<32x640xbf16>, vector<640x512xbf16>, vector<32x512xf32> -> vector<32x512xf32>
    %18 = arith.addf %11, %17 : vector<32x512xf32>
    %19 = vector.extract_strided_slice %8 {offsets = [8, 0], sizes = [24, 640], strides = [1, 1]} : vector<32x640xbf16> to vector<24x640xbf16>
    %20 = vector.extract_strided_slice %8 {offsets = [0, 0], sizes = [8, 640], strides = [1, 1]} : vector<32x640xbf16> to vector<8x640xbf16>
    %21 = tpu.concatenate %19, %20 in 0 : vector<24x640xbf16>, vector<8x640xbf16> -> vector<32x640xbf16>
    %c2 = arith.constant 2 : index
    %c0_12 = arith.constant 0 : index
    %c0_13 = arith.constant 0 : index
    %22 = vector.load %arg3[%c2, %c0_12, %c0_13] : memref<4x640x512xbf16, #tpu.memory_space<vmem>>, vector<1x640x512xbf16>
    %23 = vector.shape_cast %22 : vector<1x640x512xbf16> to vector<640x512xbf16>
    %cst_14 = arith.constant dense<0.000000e+00> : vector<32x512xf32>
    %24 = tpu.matmul %21, %23, %cst_14 {dimension_numbers = #tpu.dot_dimension_numbers<[1], [0], [0], [1], [0, 0, 1, 1], [], []>} : vector<32x640xbf16>, vector<640x512xbf16>, vector<32x512xf32> -> vector<32x512xf32>
    %25 = arith.addf %18, %24 : vector<32x512xf32>
    %26 = vector.extract_strided_slice %8 {offsets = [9, 0], sizes = [23, 640], strides = [1, 1]} : vector<32x640xbf16> to vector<23x640xbf16>
    %27 = vector.extract_strided_slice %8 {offsets = [0, 0], sizes = [9, 640], strides = [1, 1]} : vector<32x640xbf16> to vector<9x640xbf16>
    %28 = tpu.concatenate %26, %27 in 0 : vector<23x640xbf16>, vector<9x640xbf16> -> vector<32x640xbf16>
    %c3 = arith.constant 3 : index
    %c0_15 = arith.constant 0 : index
    %c0_16 = arith.constant 0 : index
    %29 = vector.load %arg3[%c3, %c0_15, %c0_16] : memref<4x640x512xbf16, #tpu.memory_space<vmem>>, vector<1x640x512xbf16>
    %30 = vector.shape_cast %29 : vector<1x640x512xbf16> to vector<640x512xbf16>
    %cst_17 = arith.constant dense<0.000000e+00> : vector<32x512xf32>
    %31 = tpu.matmul %28, %30, %cst_17 {dimension_numbers = #tpu.dot_dimension_numbers<[1], [0], [0], [1], [0, 0, 1, 1], [], []>} : vector<32x640xbf16>, vector<640x512xbf16>, vector<32x512xf32> -> vector<32x512xf32>
    %32 = arith.addf %25, %31 : vector<32x512xf32>
    %33 = tpu.iota {dimensions = array<i32: 0>} : vector<32x512xi32>
    %c15_i32 = arith.constant 15 : i32
    %34 = vector.broadcast %c15_i32 : i32 to vector<32x512xi32>
    %35 = arith.andi %33, %34 : vector<32x512xi32>
    %c4_i32 = arith.constant 4 : i32
    %36 = vector.broadcast %c4_i32 : i32 to vector<32x512xi32>
    %37 = arith.cmpi slt, %35, %36 : vector<32x512xi32>
    %38 = arith.extui %37 : vector<32x512xi1> to vector<32x512xi32>
    %39 = arith.sitofp %38 : vector<32x512xi32> to vector<32x512xf32>
    %40 = arith.mulf %32, %39 : vector<32x512xf32>
    %cst_18 = arith.constant dense<0.000000e+00> : vector<512xf32>
    %41 = vector.multi_reduction <add>, %40, %cst_18 [0] : vector<32x512xf32> to vector<512xf32>
    %42 = vector.shape_cast %41 : vector<512xf32> to vector<1x512xf32>
    %43 = arith.mulf %40, %32 : vector<32x512xf32>
    %cst_19 = arith.constant dense<0.000000e+00> : vector<512xf32>
    %44 = vector.multi_reduction <add>, %43, %cst_19 [0] : vector<32x512xf32> to vector<512xf32>
    %45 = vector.shape_cast %44 : vector<512xf32> to vector<1x512xf32>
    %46 = vector.extract_strided_slice %42 {offsets = [0, 0], sizes = [1, 128], strides = [1, 1]} : vector<1x512xf32> to vector<1x128xf32>
    %47 = vector.extract_strided_slice %42 {offsets = [0, 128], sizes = [1, 128], strides = [1, 1]} : vector<1x512xf32> to vector<1x128xf32>
    %48 = arith.addf %46, %47 : vector<1x128xf32>
    %49 = vector.extract_strided_slice %42 {offsets = [0, 256], sizes = [1, 128], strides = [1, 1]} : vector<1x512xf32> to vector<1x128xf32>
    %50 = arith.addf %48, %49 : vector<1x128xf32>
    %51 = vector.extract_strided_slice %42 {offsets = [0, 384], sizes = [1, 128], strides = [1, 1]} : vector<1x512xf32> to vector<1x128xf32>
    %52 = arith.addf %50, %51 : vector<1x128xf32>
    %53 = vector.extract_strided_slice %45 {offsets = [0, 0], sizes = [1, 128], strides = [1, 1]} : vector<1x512xf32> to vector<1x128xf32>
    %54 = vector.extract_strided_slice %45 {offsets = [0, 128], sizes = [1, 128], strides = [1, 1]} : vector<1x512xf32> to vector<1x128xf32>
    %55 = arith.addf %53, %54 : vector<1x128xf32>
    %56 = vector.extract_strided_slice %45 {offsets = [0, 256], sizes = [1, 128], strides = [1, 1]} : vector<1x512xf32> to vector<1x128xf32>
    %57 = arith.addf %55, %56 : vector<1x128xf32>
    %58 = vector.extract_strided_slice %45 {offsets = [0, 384], sizes = [1, 128], strides = [1, 1]} : vector<1x512xf32> to vector<1x128xf32>
    %59 = arith.addf %57, %58 : vector<1x128xf32>
    %cst_20 = arith.constant 3.200000e+01 : f32
    %60 = vector.broadcast %cst_20 : f32 to vector<1x128xf32>
    %61 = arith.divf %52, %60 : vector<1x128xf32>
    %cst_21 = arith.constant 3.200000e+01 : f32
    %62 = vector.broadcast %cst_21 : f32 to vector<1x128xf32>
    %63 = arith.divf %59, %62 : vector<1x128xf32>
    %64 = arith.mulf %61, %61 : vector<1x128xf32>
    %65 = arith.subf %63, %64 : vector<1x128xf32>
    %cst_22 = arith.constant 9.99999974E-6 : f32
    %66 = vector.broadcast %cst_22 : f32 to vector<1x128xf32>
    %67 = arith.addf %65, %66 : vector<1x128xf32>
    %68 = math.rsqrt %67 : vector<1x128xf32>
    %c0_23 = arith.constant 0 : index
    %c0_24 = arith.constant 0 : index
    %69 = vector.load %arg4[%c0_23, %c0_24] : memref<1x128xf32, #tpu.memory_space<vmem>>, vector<1x128xf32>
    %70 = arith.mulf %68, %69 : vector<1x128xf32>
    %c0_25 = arith.constant 0 : index
    %c0_26 = arith.constant 0 : index
    %71 = vector.load %arg5[%c0_25, %c0_26] : memref<1x128xf32, #tpu.memory_space<vmem>>, vector<1x128xf32>
    %72 = arith.mulf %61, %70 : vector<1x128xf32>
    %73 = arith.subf %71, %72 : vector<1x128xf32>
    %74 = tpu.concatenate %70, %70, %70, %70 in 1 : vector<1x128xf32>, vector<1x128xf32>, vector<1x128xf32>, vector<1x128xf32> -> vector<1x512xf32>
    %75 = tpu.concatenate %73, %73, %73, %73 in 1 : vector<1x128xf32>, vector<1x128xf32>, vector<1x128xf32>, vector<1x128xf32> -> vector<1x512xf32>
    %76 = vector.broadcast %74 : vector<1x512xf32> to vector<32x512xf32>
    %77 = arith.mulf %32, %76 : vector<32x512xf32>
    %78 = vector.broadcast %75 : vector<1x512xf32> to vector<32x512xf32>
    %79 = arith.addf %77, %78 : vector<32x512xf32>
    %cst_27 = arith.constant 0.000000e+00 : f32
    %80 = vector.broadcast %cst_27 : f32 to vector<32x512xf32>
    %81 = arith.cmpf oge, %79, %80 : vector<32x512xf32>
    %cst_28 = arith.constant 2.000000e-01 : f32
    %82 = vector.broadcast %cst_28 : f32 to vector<32x512xf32>
    %83 = arith.mulf %82, %79 : vector<32x512xf32>
    %84 = arith.select %81, %79, %83 : vector<32x512xi1>, vector<32x512xf32>
    %85 = arith.truncf %84 : vector<32x512xf32> to vector<32x512xbf16>
    %86 = tpu.iota {dimensions = array<i32: 1>} : vector<2x32xi32>
    %87 = tpu.iota {dimensions = array<i32: 0>} : vector<2x32xi32>
    %c16_i32 = arith.constant 16 : i32
    %88 = vector.broadcast %c16_i32 : i32 to vector<2x32xi32>
    %89 = arith.muli %87, %88 : vector<2x32xi32>
    %cst_29 = arith.constant 0.000000e+00 : f32
    %90 = vector.broadcast %cst_29 : f32 to vector<2x128xf32>
    %c0_i32 = arith.constant 0 : i32
    %91 = vector.broadcast %c0_i32 : i32 to vector<2x32xi32>
    %92 = arith.addi %89, %91 : vector<2x32xi32>
    %93 = arith.cmpi eq, %86, %92 : vector<2x32xi32>
    %94 = arith.extui %93 : vector<2x32xi1> to vector<2x32xi32>
    %95 = arith.sitofp %94 : vector<2x32xi32> to vector<2x32xf32>
    %96 = arith.truncf %95 : vector<2x32xf32> to vector<2x32xbf16>
    %cst_30 = arith.constant dense<0.000000e+00> : vector<2x512xf32>
    %97 = tpu.matmul %96, %85, %cst_30 {dimension_numbers = #tpu.dot_dimension_numbers<[1], [0], [0], [1], [0, 0, 1, 1], [], []>} : vector<2x32xbf16>, vector<32x512xbf16>, vector<2x512xf32> -> vector<2x512xf32>
    %98 = arith.truncf %97 : vector<2x512xf32> to vector<2x512xbf16>
    %c0_31 = arith.constant 0 : index
    %c0_32 = arith.constant 0 : index
    %c0_33 = arith.constant 0 : index
    %99 = vector.load %arg6[%c0_31, %c0_32, %c0_33] : memref<4x512x128xbf16, #tpu.memory_space<vmem>>, vector<1x512x128xbf16>
    %100 = vector.shape_cast %99 : vector<1x512x128xbf16> to vector<512x128xbf16>
    %cst_34 = arith.constant dense<0.000000e+00> : vector<2x128xf32>
    %101 = tpu.matmul %98, %100, %cst_34 {dimension_numbers = #tpu.dot_dimension_numbers<[1], [0], [0], [1], [0, 0, 1, 1], [], []>} : vector<2x512xbf16>, vector<512x128xbf16>, vector<2x128xf32> -> vector<2x128xf32>
    %102 = arith.addf %90, %101 : vector<2x128xf32>
    %c1_i32 = arith.constant 1 : i32
    %103 = vector.broadcast %c1_i32 : i32 to vector<2x32xi32>
    %104 = arith.addi %89, %103 : vector<2x32xi32>
    %105 = arith.cmpi eq, %86, %104 : vector<2x32xi32>
    %106 = arith.extui %105 : vector<2x32xi1> to vector<2x32xi32>
    %107 = arith.sitofp %106 : vector<2x32xi32> to vector<2x32xf32>
    %108 = arith.truncf %107 : vector<2x32xf32> to vector<2x32xbf16>
    %cst_35 = arith.constant dense<0.000000e+00> : vector<2x512xf32>
    %109 = tpu.matmul %108, %85, %cst_35 {dimension_numbers = #tpu.dot_dimension_numbers<[1], [0], [0], [1], [0, 0, 1, 1], [], []>} : vector<2x32xbf16>, vector<32x512xbf16>, vector<2x512xf32> -> vector<2x512xf32>
    %110 = arith.truncf %109 : vector<2x512xf32> to vector<2x512xbf16>
    %c1_36 = arith.constant 1 : index
    %c0_37 = arith.constant 0 : index
    %c0_38 = arith.constant 0 : index
    %111 = vector.load %arg6[%c1_36, %c0_37, %c0_38] : memref<4x512x128xbf16, #tpu.memory_space<vmem>>, vector<1x512x128xbf16>
    %112 = vector.shape_cast %111 : vector<1x512x128xbf16> to vector<512x128xbf16>
    %cst_39 = arith.constant dense<0.000000e+00> : vector<2x128xf32>
    %113 = tpu.matmul %110, %112, %cst_39 {dimension_numbers = #tpu.dot_dimension_numbers<[1], [0], [0], [1], [0, 0, 1, 1], [], []>} : vector<2x512xbf16>, vector<512x128xbf16>, vector<2x128xf32> -> vector<2x128xf32>
    %114 = arith.addf %102, %113 : vector<2x128xf32>
    %c2_i32 = arith.constant 2 : i32
    %115 = vector.broadcast %c2_i32 : i32 to vector<2x32xi32>
    %116 = arith.addi %89, %115 : vector<2x32xi32>
    %117 = arith.cmpi eq, %86, %116 : vector<2x32xi32>
    %118 = arith.extui %117 : vector<2x32xi1> to vector<2x32xi32>
    %119 = arith.sitofp %118 : vector<2x32xi32> to vector<2x32xf32>
    %120 = arith.truncf %119 : vector<2x32xf32> to vector<2x32xbf16>
    %cst_40 = arith.constant dense<0.000000e+00> : vector<2x512xf32>
    %121 = tpu.matmul %120, %85, %cst_40 {dimension_numbers = #tpu.dot_dimension_numbers<[1], [0], [0], [1], [0, 0, 1, 1], [], []>} : vector<2x32xbf16>, vector<32x512xbf16>, vector<2x512xf32> -> vector<2x512xf32>
    %122 = arith.truncf %121 : vector<2x512xf32> to vector<2x512xbf16>
    %c2_41 = arith.constant 2 : index
    %c0_42 = arith.constant 0 : index
    %c0_43 = arith.constant 0 : index
    %123 = vector.load %arg6[%c2_41, %c0_42, %c0_43] : memref<4x512x128xbf16, #tpu.memory_space<vmem>>, vector<1x512x128xbf16>
    %124 = vector.shape_cast %123 : vector<1x512x128xbf16> to vector<512x128xbf16>
    %cst_44 = arith.constant dense<0.000000e+00> : vector<2x128xf32>
    %125 = tpu.matmul %122, %124, %cst_44 {dimension_numbers = #tpu.dot_dimension_numbers<[1], [0], [0], [1], [0, 0, 1, 1], [], []>} : vector<2x512xbf16>, vector<512x128xbf16>, vector<2x128xf32> -> vector<2x128xf32>
    %126 = arith.addf %114, %125 : vector<2x128xf32>
    %c3_i32 = arith.constant 3 : i32
    %127 = vector.broadcast %c3_i32 : i32 to vector<2x32xi32>
    %128 = arith.addi %89, %127 : vector<2x32xi32>
    %129 = arith.cmpi eq, %86, %128 : vector<2x32xi32>
    %130 = arith.extui %129 : vector<2x32xi1> to vector<2x32xi32>
    %131 = arith.sitofp %130 : vector<2x32xi32> to vector<2x32xf32>
    %132 = arith.truncf %131 : vector<2x32xf32> to vector<2x32xbf16>
    %cst_45 = arith.constant dense<0.000000e+00> : vector<2x512xf32>
    %133 = tpu.matmul %132, %85, %cst_45 {dimension_numbers = #tpu.dot_dimension_numbers<[1], [0], [0], [1], [0, 0, 1, 1], [], []>} : vector<2x32xbf16>, vector<32x512xbf16>, vector<2x512xf32> -> vector<2x512xf32>
    %134 = arith.truncf %133 : vector<2x512xf32> to vector<2x512xbf16>
    %c3_46 = arith.constant 3 : index
    %c0_47 = arith.constant 0 : index
    %c0_48 = arith.constant 0 : index
    %135 = vector.load %arg6[%c3_46, %c0_47, %c0_48] : memref<4x512x128xbf16, #tpu.memory_space<vmem>>, vector<1x512x128xbf16>
    %136 = vector.shape_cast %135 : vector<1x512x128xbf16> to vector<512x128xbf16>
    %cst_49 = arith.constant dense<0.000000e+00> : vector<2x128xf32>
    %137 = tpu.matmul %134, %136, %cst_49 {dimension_numbers = #tpu.dot_dimension_numbers<[1], [0], [0], [1], [0, 0, 1, 1], [], []>} : vector<2x512xbf16>, vector<512x128xbf16>, vector<2x128xf32> -> vector<2x128xf32>
    %138 = arith.addf %126, %137 : vector<2x128xf32>
    %c0_50 = arith.constant 0 : index
    %c0_51 = arith.constant 0 : index
    %139 = vector.load %arg7[%c0_50, %c0_51] : memref<1x128xf32, #tpu.memory_space<vmem>>, vector<1x128xf32>
    %140 = vector.broadcast %139 : vector<1x128xf32> to vector<2x128xf32>
    %141 = arith.addf %138, %140 : vector<2x128xf32>
    %c0_52 = arith.constant 0 : index
    %c0_53 = arith.constant 0 : index
    %142 = vector.load %arg8[%c0_52, %c0_53] : memref<2x128xf32, #tpu.memory_space<vmem>>, vector<2x128xf32>
    tpu.vector_store %arg8[%c0_52, %c0_53], %141 {strides = array<i32>} : memref<2x128xf32, #tpu.memory_space<vmem>>, vector<2x128xf32>,
    return
  }
  func.func @transform_0(%arg0: i32) -> (i32, i32) {
    %c0_i32 = arith.constant 0 : i32
    %c0_i32_0 = arith.constant 0 : i32
    %c0_i32_1 = arith.constant 0 : i32
    return %c0_i32, %c0_i32_0 : i32, i32
  }
  func.func @transform_1(%arg0: i32) -> (i32, i32) {
    %c0_i32 = arith.constant 0 : i32
    %c0_i32_0 = arith.constant 0 : i32
    %c0_i32_1 = arith.constant 0 : i32
    return %c0_i32, %c0_i32_0 : i32, i32
  }
  func.func @transform_2(%arg0: i32) -> (i32, i32, i32) {
    %c0_i32 = arith.constant 0 : i32
    %c0_i32_0 = arith.constant 0 : i32
    %c0_i32_1 = arith.constant 0 : i32
    %c0_i32_2 = arith.constant 0 : i32
    return %c0_i32, %c0_i32_0, %c0_i32_1 : i32, i32, i32
  }
  func.func @transform_3(%arg0: i32) -> (i32, i32) {
    %c0_i32 = arith.constant 0 : i32
    %c0_i32_0 = arith.constant 0 : i32
    %c0_i32_1 = arith.constant 0 : i32
    return %c0_i32, %c0_i32_0 : i32, i32
  }
  func.func @transform_4(%arg0: i32) -> (i32, i32) {
    %c0_i32 = arith.constant 0 : i32
    %c0_i32_0 = arith.constant 0 : i32
    %c0_i32_1 = arith.constant 0 : i32
    return %c0_i32, %c0_i32_0 : i32, i32
  }
  func.func @transform_5(%arg0: i32) -> (i32, i32, i32) {
    %c0_i32 = arith.constant 0 : i32
    %c0_i32_0 = arith.constant 0 : i32
    %c0_i32_1 = arith.constant 0 : i32
    %c0_i32_2 = arith.constant 0 : i32
    return %c0_i32, %c0_i32_0, %c0_i32_1 : i32, i32, i32
  }
  func.func @transform_6(%arg0: i32) -> (i32, i32) {
    %c0_i32 = arith.constant 0 : i32
    %c0_i32_0 = arith.constant 0 : i32
    %c0_i32_1 = arith.constant 0 : i32
    return %c0_i32, %c0_i32_0 : i32, i32
  }
  func.func @transform_7(%arg0: i32) -> (i32, i32) {
    %c0_i32 = arith.constant 0 : i32
    %c0_i32_0 = arith.constant 0 : i32
    %c0_i32_1 = arith.constant 0 : i32
    return %c0_i32, %c0_i32_0 : i32, i32
  }
}

</mosaic_0001>

<bundles_post_ra>
// kernel: e_model_forward.1
= control target key start
LH: loop header
LB: loop body
LE: loop exit
PB: predicated region body
PF: predicated region fallthrough
CT: control target
= control target key end

     0   :  { %12 = vsyncpa [#allocation3], 0  ;;  %s11614_s0 = inlined_call_operand.vmem [shape: bf16[32,256], index: 0, kind: input, shape index: {}]   ;;  %s11615_s1 = inlined_call_operand.hbm [shape: bf16[256,640], index: 1, kind: input, shape index: {}]   ;;  %s11616_s2 = inlined_call_operand.hbm [shape: bf16[4,640,512], index: 2, kind: input, shape index: {}]   ;;  %s11617_s3 = inlined_call_operand.hbm [shape: f32[1,128], index: 3, kind: input, shape index: {}]   ;;  %s11618_s4 = inlined_call_operand.hbm [shape: f32[1,128], index: 4, kind: input, shape index: {}]   ;;  %s11619_s5 = inlined_call_operand.hbm [shape: bf16[4,512,128], index: 5, kind: input, shape index: {}]   ;;  %s11620_s6 = inlined_call_operand.hbm [shape: f32[1,128], index: 6, kind: input, shape index: {}]   ;;  %s11621_s7 = inlined_call_operand.hbm [shape: f32[2,128], index: 7, kind: output, shape index: {}]  }
   0x1   :  { %13 = vsyncpa [#allocation6], 0 }
   0x2   :  { %14 = vsyncpa [#allocation9], 0 }
   0x3   :  { %15 = vsyncpa [#allocation12], 0 }
   0x4   :  { %16 = vsyncpa [#allocation4], 0  ;;  %s10657_s24 = smov [#allocation5]  }
   0x5   :  { %s36_s25 = sshll.u32 %s10657_s24, 4  ;;  %s37_s25 = int_to_ptr.vmem [resolvable:$true] %s36_s25 }
   0x6   :  { %s10515_s26 = scalar_lea.vmem %s37_s25, 81920  ;;  %p10520_p1 = scmp.lt.s32.totalorder %s37_s25, %s37_s25 }
   0x7   :  { %p10516_p0 = scmp.ne.s32.totalorder %s37_s25, %s10515_s26  ;;  %p10521_p2 = scmp.lt.s32.totalorder %s10515_s26, %s10515_s26 }
   0x9   :  { %p10522_p3 = por %p10521_p2, %p10520_p1 }
   0xb   :  { %p10523_p4 = pnand %p10522_p3, %p10516_p0 }
   0xd   :  { %10526 = shalt.err (!%p10523_p4)
}
   0xe   :  { %s10658_s27 = smov 256   ;;  %s10659_s28 = smov 16  }
   0xf   :  { %42 = dma.hbm_to_vmem [thread:$0]  %s11616_s2, 81920, %s37_s25, [#allocation6], %s10658_s27, %s10658_s27, %s10659_s28  }
  0x10   :  { %s10660_s8 = smov [#allocation8]   ;;  %s10661_s10 = smov [#allocation2]  }
  0x11   :  { %s59_s9 = sshll.u32 %s10660_s8, 4  ;;  %s24_s11 = sshll.u32 %s10661_s10, 4  ;;  %s60_s9 = int_to_ptr.vmem [resolvable:$true] %s59_s9  ;;  %s25_s11 = int_to_ptr.vmem [resolvable:$true] %s24_s11 }
  0x12   :  { %s10535_s12 = scalar_lea.vmem %s60_s9, 16  ;;  %s10539_s13 = scalar_lea.vmem %s60_s9, 32 }
  0x13   :  { %p10536_p5 = scmp.ne.s32.totalorder %s60_s9, %s10535_s12  ;;  %p10540_p6 = scmp.lt.s32.totalorder %s60_s9, %s60_s9 }
  0x14   :  { %p10541_p7 = scmp.lt.s32.totalorder %s10539_s13, %s10535_s12 }
  0x16   :  { %p10542_p8 = por %p10541_p7, %p10540_p6 }
  0x18   :  { %p10543_p9 = pnand %p10542_p8, %p10536_p5 }
  0x1a   :  { %10546 = shalt.err (!%p10543_p9)
}
  0x1b   :  { %62 = dma.hbm_to_vmem [thread:$0]  %s11618_s4, 16, %s60_s9, [#allocation9]  }
  0x1c   :  { %s10555_s16 = scalar_lea.vmem %s25_s11, 10240  ;;  %p10560_p11 = scmp.lt.s32.totalorder %s25_s11, %s25_s11 }
  0x1d   :  { %p10556_p10 = scmp.ne.s32.totalorder %s25_s11, %s10555_s16  ;;  %p10561_p12 = scmp.lt.s32.totalorder %s10555_s16, %s10555_s16 }
  0x1f   :  { %p10562_p13 = por %p10561_p12, %p10560_p11 }
  0x21   :  { %p10563_p0 = pnand %p10562_p13, %p10556_p10 }
  0x23   :  { %10566 = shalt.err (!%p10563_p0)
}
  0x24   :  { %s10662_s2 = smov 320   ;;  %s10663_s17 = smov 20  }
  0x25   :  { %30 = dma.hbm_to_vmem [thread:$0]  %s11615_s1, 10240, %s25_s11, [#allocation3], %s10662_s2, %s10662_s2, %s10663_s17  }
  0x26   :  { %s10664_s20 = smov [#allocation7]   ;;  %s10665_s22 = smov [#allocation10]  }
  0x27   :  { %s49_s21 = sshll.u32 %s10664_s20, 4  ;;  %s68_s23 = sshll.u32 %s10665_s22, 4  ;;  %s50_s21 = int_to_ptr.vmem [resolvable:$true] %s49_s21  ;;  %s69_s23 = int_to_ptr.vmem [resolvable:$true] %s68_s23 }
  0x28   :  { %s10575_s4 = scalar_lea.vmem %s50_s21, 16  ;;  %s10579_s24 = scalar_lea.vmem %s50_s21, 32 }
  0x29   :  { %p10576_p1 = scmp.ne.s32.totalorder %s50_s21, %s10575_s4  ;;  %p10580_p2 = scmp.lt.s32.totalorder %s50_s21, %s50_s21 }
  0x2a   :  { %p10581_p3 = scmp.lt.s32.totalorder %s10579_s24, %s10575_s4 }
  0x2c   :  { %p10582_p4 = por %p10581_p3, %p10580_p2 }
  0x2e   :  { %p10583_p5 = pnand %p10582_p4, %p10576_p1 }
  0x30   :  { %10586 = shalt.err (!%p10583_p5)
}
  0x31   :  { %52 = dma.hbm_to_vmem [thread:$0]  %s11617_s3, 16, %s50_s21, [#allocation6]  }
  0x32   :  { %s10595_s27 = scalar_lea.vmem %s69_s23, 16384  ;;  %p10600_p7 = scmp.lt.s32.totalorder %s69_s23, %s69_s23 }
  0x33   :  { %p10596_p6 = scmp.ne.s32.totalorder %s69_s23, %s10595_s27  ;;  %p10601_p8 = scmp.lt.s32.totalorder %s10595_s27, %s10595_s27 }
  0x35   :  { %p10602_p9 = por %p10601_p8, %p10600_p7 }
  0x37   :  { %p10603_p10 = pnand %p10602_p9, %p10596_p6 }
  0x39   :  { %10606 = shalt.err (!%p10603_p10)
}
  0x3a   :  { %s10666_s1 = smov 64   ;;  %s10667_s28 = smov 4  }
  0x3b   :  { %74 = dma.hbm_to_vmem [thread:$0]  %s11619_s5, 16384, %s69_s23, [#allocation9], %s10666_s1, %s10666_s1, %s10667_s28  }
  0x3c   :  { %s10668_s8 = smov [#allocation11]  }
  0x3d   :  { %s81_s9 = sshll.u32 %s10668_s8, 4  ;;  %s82_s9 = int_to_ptr.vmem [resolvable:$true] %s81_s9 }
  0x3e   :  { %s10615_s10 = scalar_lea.vmem %s82_s9, 16  ;;  %s10619_s3 = scalar_lea.vmem %s82_s9, 32 }
  0x3f   :  { %p10616_p11 = scmp.ne.s32.totalorder %s82_s9, %s10615_s10  ;;  %p10620_p12 = scmp.lt.s32.totalorder %s82_s9, %s82_s9 }
  0x40   :  { %p10621_p13 = scmp.lt.s32.totalorder %s10619_s3, %s10615_s10 }
  0x42   :  { %p10622_p0 = por %p10621_p13, %p10620_p12 }
  0x44   :  { %p10623_p1 = pnand %p10622_p0, %p10616_p11 }
  0x46   :  { %10626 = shalt.err (!%p10623_p1)
}
  0x47   :  { %84 = dma.hbm_to_vmem [thread:$0]  %s11620_s6, 16, %s82_s9, [#allocation12]  }
  0x48   :  { %10647 = dma.done.wait [#allocation3], 10240  }
  0x49   :  { %10648 = vsyncadd [#allocation3], 4294957056 }
  0x4a   :  { %10649 = dma.done.wait [#allocation6], 81936  }
  0x4b   :  { %10650 = vsyncadd [#allocation6], 4294885360 }
  0x4c   :  { %10651 = dma.done.wait [#allocation9], 16400  }
  0x4d   :  { %10652 = vsyncadd [#allocation9], 4294950896 }
  0x4e   :  { %10653 = dma.done.wait [#allocation12], 16  }
  0x4f   :  { %10654 = vsyncadd [#allocation12], 4294967280  ;;  %v9299_v0 = vld [vmem:[#allocation2 + $0x11c] ss:$20 sps:$4 sm:$0xff]   ;;  %v9301_v1 = vld [vmem:[#allocation2 + $0x124] ss:$20 sps:$4 sm:$0xff]  }
  0x50   :  { %640 = vmatprep.subr.bf16.mxu0 %v9299_v0  ;;  %v9303_v2 = vld [vmem:[#allocation2 + $0x118] ss:$20 sps:$4 sm:$0xff]   ;;  %v9304_v3 = vld [vmem:[#allocation2 + $0x120] ss:$20 sps:$4 sm:$0xff]   ;;  %693 = vmatprep.subr.bf16.mxu1 %v9301_v1  ;;  %v9307_v5 = vld [vmem:[#allocation2 + $0xfc] ss:$20 sps:$4 sm:$0xff]  }
  0x51   :  { %v9305_v4 = vld [vmem:[#allocation2 + $0xf4] ss:$20 sps:$4 sm:$0xff]   ;;  %641 = vmatpush1.bf16.msra.mxu0 %v9303_v2  ;;  %694 = vmatpush1.bf16.msra.mxu1 %v9304_v3  ;;  %v9309_v6 = vld [vmem:[#allocation2 + $0xf0] ss:$20 sps:$4 sm:$0xff]   ;;  %v9310_v7 = vld [vmem:[#allocation2 + $0xf8] ss:$20 sps:$4 sm:$0xff]  }
  0x52   :  { %642 = vmatprep.subr.bf16.mxu0 %v9305_v4  ;;  %695 = vmatprep.subr.bf16.mxu1 %v9307_v5  ;;  %v9311_v8 = vld [vmem:[#allocation2 + $0xcc] ss:$20 sps:$4 sm:$0xff]   ;;  %v9313_v9 = vld [vmem:[#allocation2 + $0xd4] ss:$20 sps:$4 sm:$0xff]   ;;  %v9316_v11 = vld [vmem:[#allocation2 + $0xd0] ss:$20 sps:$4 sm:$0xff]  }
  0x53   :  { %v9315_v10 = vld [vmem:[#allocation2 + $0xc8] ss:$20 sps:$4 sm:$0xff]   ;;  %v9317_v12 = vld [vmem:[#allocation2 + $0xa4] ss:$20 sps:$4 sm:$0xff]   ;;  %v9319_v13 = vld [vmem:[#allocation2 + $0xac] ss:$20 sps:$4 sm:$0xff]  }
  0x54   :  { %v9321_v14 = vld [vmem:[#allocation2 + $0xa0] ss:$20 sps:$4 sm:$0xff]   ;;  %v9322_v15 = vld [vmem:[#allocation2 + $0xa8] ss:$20 sps:$4 sm:$0xff]   ;;  %v9325_v17 = vld [vmem:[#allocation2 + $0x84] ss:$20 sps:$4 sm:$0xff]  }
  0x55   :  { %643 = vmatpush1.bf16.msra.mxu0 %v9309_v6  ;;  %696 = vmatpush1.bf16.msra.mxu1 %v9310_v7  ;;  %v9323_v16 = vld [vmem:[#allocation2 + $0x7c] ss:$20 sps:$4 sm:$0xff]   ;;  %v9327_v18 = vld [vmem:[#allocation2 + $0x78] ss:$20 sps:$4 sm:$0xff]   ;;  %v9328_v19 = vld [vmem:[#allocation2 + $0x80] ss:$20 sps:$4 sm:$0xff]  }
  0x56   :  { %644 = vmatprep.subr.bf16.mxu0 %v9311_v8  ;;  %697 = vmatprep.subr.bf16.mxu1 %v9313_v9  ;;  %v9329_v20 = vld [vmem:[#allocation2 + $0x54] ss:$20 sps:$4 sm:$0xff]   ;;  %v9331_v21 = vld [vmem:[#allocation2 + $0x5c] ss:$20 sps:$4 sm:$0xff]   ;;  %v9334_v23 = vld [vmem:[#allocation2 + $0x58] ss:$20 sps:$4 sm:$0xff]  }
  0x57   :  { %v9333_v22 = vld [vmem:[#allocation2 + $0x50] ss:$20 sps:$4 sm:$0xff]   ;;  %v9335_v24 = vld [vmem:[#allocation2 + $0x2c] ss:$20 sps:$4 sm:$0xff]   ;;  %v9337_v25 = vld [vmem:[#allocation2 + $0x34] ss:$20 sps:$4 sm:$0xff]  }
  0x58   :  { %v9339_v26 = vld [vmem:[#allocation2 + $0x28] ss:$20 sps:$4 sm:$0xff]   ;;  %v9340_v27 = vld [vmem:[#allocation2 + $0x30] ss:$20 sps:$4 sm:$0xff]   ;;  %v9343_v29 = vld [vmem:[#allocation2 + $0xc] ss:$20 sps:$4 sm:$0xff]  }
  0x59   :  { %645 = vmatpush1.bf16.msra.mxu0 %v9315_v10  ;;  %698 = vmatpush1.bf16.msra.mxu1 %v9316_v11  ;;  %v9341_v28 = vld [vmem:[#allocation2 + $0x4] ss:$20 sps:$4 sm:$0xff]   ;;  %v9345_v30 = vld [vmem:[#allocation2] ss:$20 sps:$4 sm:$0xff]   ;;  %v9346_v31 = vld [vmem:[#allocation2 + $0x8] ss:$20 sps:$4 sm:$0xff]  }
  0x5a   :  { %646 = vmatprep.subr.bf16.mxu0 %v9317_v12  ;;  %699 = vmatprep.subr.bf16.mxu1 %v9319_v13  ;;  %v9347_v32 = vld [vmem:[#allocation2 + $0x25c] ss:$20 sps:$4 sm:$0xff]   ;;  %v9349_v33 = vld [vmem:[#allocation2 + $0x264] ss:$20 sps:$4 sm:$0xff]   ;;  %v9352_v35 = vld [vmem:[#allocation2 + $0x260] ss:$20 sps:$4 sm:$0xff]  }
  0x5b   :  { %v9351_v34 = vld [vmem:[#allocation2 + $0x258] ss:$20 sps:$4 sm:$0xff]   ;;  %v9353_v36 = vld [vmem:[#allocation2 + $0x234] ss:$20 sps:$4 sm:$0xff]   ;;  %v9355_v37 = vld [vmem:[#allocation2 + $0x23c] ss:$20 sps:$4 sm:$0xff]  }
  0x5c   :  { %v9357_v38 = vld [vmem:[#allocation2 + $0x230] ss:$20 sps:$4 sm:$0xff]   ;;  %v9358_v39 = vld [vmem:[#allocation2 + $0x238] ss:$20 sps:$4 sm:$0xff]   ;;  %v9361_v41 = vld [vmem:[#allocation2 + $0x214] ss:$20 sps:$4 sm:$0xff]  }
  0x5d   :  { %647 = vmatpush1.bf16.msra.mxu0 %v9321_v14  ;;  %700 = vmatpush1.bf16.msra.mxu1 %v9322_v15  ;;  %v9359_v40 = vld [vmem:[#allocation2 + $0x20c] ss:$20 sps:$4 sm:$0xff]   ;;  %v9363_v42 = vld [vmem:[#allocation2 + $0x208] ss:$20 sps:$4 sm:$0xff]   ;;  %v9364_v43 = vld [vmem:[#allocation2 + $0x210] ss:$20 sps:$4 sm:$0xff]  }
  0x5e   :  { %648 = vmatprep.subr.bf16.mxu0 %v9323_v16  ;;  %701 = vmatprep.subr.bf16.mxu1 %v9325_v17  ;;  %v9365_v44 = vld [vmem:[#allocation2 + $0x1e4] ss:$20 sps:$4 sm:$0xff]   ;;  %v9367_v45 = vld [vmem:[#allocation2 + $0x1ec] ss:$20 sps:$4 sm:$0xff]   ;;  %v9370_v47 = vld [vmem:[#allocation2 + $0x1e8] ss:$20 sps:$4 sm:$0xff]  }
  0x5f   :  { %v9369_v46 = vld [vmem:[#allocation2 + $0x1e0] ss:$20 sps:$4 sm:$0xff]   ;;  %v10733_v48 = vld [vmem:[%s11614_s0 + $0x4] ss:$8 sps:$4 sm:$0xff]   ;;  %v9371_v49 = vld [vmem:[#allocation2 + $0x1bc] ss:$20 sps:$4 sm:$0xff]  }
  0x60   :  { %v9373_v50 = vld [vmem:[#allocation2 + $0x1c4] ss:$20 sps:$4 sm:$0xff]   ;;  %672 = vmatprep.mubr.bf16.mxu0 %v10733_v48  ;;  %725 = vmatprep.mubr.bf16.mxu1 %v10733_v48  ;;  %v9376_v52 = vld [vmem:[#allocation2 + $0x1c0] ss:$20 sps:$4 sm:$0xff]   ;;  %v9379_v54 = vld [vmem:[#allocation2 + $0x19c] ss:$20 sps:$4 sm:$0xff]  }
  0x61   :  { %649 = vmatpush1.bf16.msra.mxu0 %v9327_v18  ;;  %702 = vmatpush1.bf16.msra.mxu1 %v9328_v19  ;;  %v9375_v51 = vld [vmem:[#allocation2 + $0x1b8] ss:$20 sps:$4 sm:$0xff]   ;;  %v9377_v53 = vld [vmem:[#allocation2 + $0x194] ss:$20 sps:$4 sm:$0xff]   ;;  %v9381_v55 = vld [vmem:[#allocation2 + $0x190] ss:$20 sps:$4 sm:$0xff]  }
  0x62   :  { %650 = vmatprep.subr.bf16.mxu0 %v9329_v20  ;;  %703 = vmatprep.subr.bf16.mxu1 %v9331_v21  ;;  %v9382_v56 = vld [vmem:[#allocation2 + $0x198] ss:$20 sps:$4 sm:$0xff]   ;;  %v9385_v58 = vld [vmem:[#allocation2 + $0x174] ss:$20 sps:$4 sm:$0xff]   ;;  %v9388_v60 = vld [vmem:[#allocation2 + $0x170] ss:$20 sps:$4 sm:$0xff]  }
  0x63   :  { %v9383_v57 = vld [vmem:[#allocation2 + $0x16c] ss:$20 sps:$4 sm:$0xff]   ;;  %v9387_v59 = vld [vmem:[#allocation2 + $0x168] ss:$20 sps:$4 sm:$0xff]   ;;  %v9389_v61 = vld [vmem:[#allocation2 + $0x144] ss:$20 sps:$4 sm:$0xff]  }
  0x64   :  { %v9391_v62 = vld [vmem:[#allocation2 + $0x14c] ss:$20 sps:$4 sm:$0xff]   ;;  %v9394_v0 = vld [vmem:[#allocation2 + $0x148] ss:$20 sps:$4 sm:$0xff]   ;;  %v9422_v4 = vld [vmem:[#allocation5 + $0x5e4] ss:$16 sps:$4 sm:$0xff]  }
  0x65   :  { %651 = vmatpush1.bf16.msra.mxu0 %v9333_v22  ;;  %704 = vmatpush1.bf16.msra.mxu1 %v9334_v23  ;;  %v9393_v63 = vld [vmem:[#allocation2 + $0x140] ss:$20 sps:$4 sm:$0xff]   ;;  %v9398_v1 = vld [vmem:[#allocation2 + $0x268] ss:$20 sps:$4 sm:$0xff]   ;;  %v9405_v10 = vld [vmem:[#allocation2 + $0x218] ss:$20 sps:$4 sm:$0xff]  }
  0x66   :  { %652 = vmatprep.subr.bf16.mxu0 %v9335_v24  ;;  %705 = vmatprep.subr.bf16.mxu1 %v9337_v25  ;;  %v10740_v2 = vld [vmem:[%s11614_s0] ss:$8 sps:$4 sm:$0xff]   ;;  %v10745_v5 = vld [vmem:[%s11614_s0 + $0x14] ss:$8 sps:$4 sm:$0xff]   ;;  %v10754_v12 = vld [vmem:[%s11614_s0 + $0x10] ss:$8 sps:$4 sm:$0xff]  }
  0x67   :  { %v9399_v3 = vld [vmem:[#allocation2 + $0x128] ss:$20 sps:$4 sm:$0xff]   ;;  %v9400_v6 = vld [vmem:[#allocation2 + $0x240] ss:$20 sps:$4 sm:$0xff]   ;;  %v9406_v13 = vld [vmem:[#allocation2 + $0xd8] ss:$20 sps:$4 sm:$0xff]  }
  0x68   :  { %v9420_v7 = vld [vmem:[#allocation5 + $0x5e0] ss:$16 sps:$4 sm:$0xff]   ;;  %v9428_v8 = vld [vmem:[#allocation5 + $0x5c4] ss:$16 sps:$4 sm:$0xff]   ;;  %v9409_v19 = vld [vmem:[#allocation2 + $0x1c8] ss:$20 sps:$4 sm:$0xff]  }
  0x69   :  { %653 = vmatpush1.bf16.msra.mxu0 %v9339_v26  ;;  %706 = vmatpush1.bf16.msra.mxu1 %v9340_v27  ;;  %v9401_v9 = vld [vmem:[#allocation2 + $0x100] ss:$20 sps:$4 sm:$0xff]   ;;  %v9407_v14 = vld [vmem:[#allocation2 + $0x1f0] ss:$20 sps:$4 sm:$0xff]   ;;  %v9410_v22 = vld [vmem:[#allocation2 + $0x88] ss:$20 sps:$4 sm:$0xff]  }
  0x6a   :  { %654 = vmatprep.subr.bf16.mxu0 %v9341_v28  ;;  %707 = vmatprep.subr.bf16.mxu1 %v9343_v29  ;;  %v9426_v11 = vld [vmem:[#allocation5 + $0x5c0] ss:$16 sps:$4 sm:$0xff]   ;;  %v9434_v15 = vld [vmem:[#allocation5 + $0x5a4] ss:$16 sps:$4 sm:$0xff]   ;;  %v9413_v27 = vld [vmem:[#allocation2 + $0x178] ss:$20 sps:$4 sm:$0xff]  }
  0x6b   :  { %v9432_v16 = vld [vmem:[#allocation5 + $0x5a0] ss:$16 sps:$4 sm:$0xff]   ;;  %v9440_v17 = vld [vmem:[#allocation5 + $0x584] ss:$16 sps:$4 sm:$0xff]   ;;  %v9414_v28 = vld [vmem:[#allocation2 + $0x38] ss:$20 sps:$4 sm:$0xff]  }
  0x6c   :  { %v9408_v18 = vld [vmem:[#allocation2 + $0xb0] ss:$20 sps:$4 sm:$0xff]   ;;  %v9411_v23 = vld [vmem:[#allocation2 + $0x1a0] ss:$20 sps:$4 sm:$0xff]   ;;  %vm1025_vm14 = vsmask.f32 7424 }
  0x6d   :  { %655 = vmatpush1.bf16.msra.mxu0 %v9345_v30  ;;  %708 = vmatpush1.bf16.msra.mxu1 %v9346_v31  ;;  %v9438_v20 = vld [vmem:[#allocation5 + $0x580] ss:$16 sps:$4 sm:$0xff]   ;;  %v9446_v21 = vld [vmem:[#allocation5 + $0x564] ss:$16 sps:$4 sm:$0xff]   ;;  %vm1116_vm15 = vcmask 1047552   ;;  %s10671_s0 = smov [#allocation13]  }
  0x6e   :  { %656 = vmatprep.subr.bf16.mxu0 %v9347_v32  ;;  %709 = vmatprep.subr.bf16.mxu1 %v9349_v33  ;;  %v9444_v24 = vld [vmem:[#allocation5 + $0x560] ss:$16 sps:$4 sm:$0xff]   ;;  %v9452_v25 = vld [vmem:[#allocation5 + $0x544] ss:$16 sps:$4 sm:$0xff]   ;;  %s8201_s18 = sshll.u32 %s10671_s0, 4  ;;  %s8202_s18 = int_to_ptr.vmem [resolvable:$true] %s8201_s18 }
  0x6f   :  { %v9412_v26 = vld [vmem:[#allocation2 + $0x60] ss:$20 sps:$4 sm:$0xff]   ;;  %v9415_v30 = vld [vmem:[#allocation2 + $0x150] ss:$20 sps:$4 sm:$0xff]   ;;  %s10627_s19 = scalar_lea.vmem %s8202_s18, 32  ;;  %p10632_p3 = scmp.lt.s32.totalorder %s8202_s18, %s8202_s18 }
  0x70   :  { %v9450_v29 = vld [vmem:[#allocation5 + $0x540] ss:$16 sps:$4 sm:$0xff]   ;;  %v9458_v31 = vld [vmem:[#allocation5 + $0x524] ss:$16 sps:$4 sm:$0xff]   ;;  %p10628_p2 = scmp.ne.s32.totalorder %s8202_s18, %s10627_s19  ;;  %p10633_p4 = scmp.lt.s32.totalorder %s10627_s19, %s10627_s19 }
  0x71   :  { %657 = vmatpush2.bf16.msra.mxu0 %v9351_v34  ;;  %710 = vmatpush2.bf16.msra.mxu1 %v9352_v35  ;;  %v9456_v32 = vld [vmem:[#allocation5 + $0x520] ss:$16 sps:$4 sm:$0xff]   ;;  %v9464_v33 = vld [vmem:[#allocation5 + $0x504] ss:$16 sps:$4 sm:$0xff]  }
  0x72   :  { %658 = vmatprep.subr.bf16.mxu0 %v9353_v36  ;;  %711 = vmatprep.subr.bf16.mxu1 %v9355_v37  ;;  %v9416_v34 = vld [vmem:[#allocation2 + $0x10] ss:$20 sps:$4 sm:$0xff]   ;;  %p10634_p5 = por %p10633_p4, %p10632_p3 }
  0x73   :  { %v9419_v35 = vld [vmem:[#allocation5 + $0x7e4] ss:$16 sps:$4 sm:$0xff]   ;;  %v9462_v36 = vld [vmem:[#allocation5 + $0x500] ss:$16 sps:$4 sm:$0xff]  }
  0x74   :  { %v9470_v37 = vld [vmem:[#allocation5 + $0x6e4] ss:$16 sps:$4 sm:$0xff]   ;;  %p10635_p6 = pnand %p10634_p5, %p10628_p2 }
  0x75   :  { %659 = vmatpush2.bf16.msra.mxu0 %v9357_v38  ;;  %712 = vmatpush2.bf16.msra.mxu1 %v9358_v39  ;;  %v9417_v38 = vld [vmem:[#allocation5 + $0x7e0] ss:$16 sps:$4 sm:$0xff]   ;;  %v9425_v39 = vld [vmem:[#allocation5 + $0x7c4] ss:$16 sps:$4 sm:$0xff]  }
  0x76   :  { %660 = vmatprep.subr.bf16.mxu0 %v9359_v40  ;;  %713 = vmatprep.subr.bf16.mxu1 %v9361_v41  ;;  %v9468_v40 = vld [vmem:[#allocation5 + $0x6e0] ss:$16 sps:$4 sm:$0xff]   ;;  %v9476_v41 = vld [vmem:[#allocation5 + $0x6c4] ss:$16 sps:$4 sm:$0xff]  }
  0x79   :  { %661 = vmatpush2.bf16.msra.mxu0 %v9363_v42  ;;  %714 = vmatpush2.bf16.msra.mxu1 %v9364_v43  ;;  %v9423_v42 = vld [vmem:[#allocation5 + $0x7c0] ss:$16 sps:$4 sm:$0xff]   ;;  %v9431_v43 = vld [vmem:[#allocation5 + $0x7a4] ss:$16 sps:$4 sm:$0xff]  }
  0x7a   :  { %662 = vmatprep.subr.bf16.mxu0 %v9365_v44  ;;  %715 = vmatprep.subr.bf16.mxu1 %v9367_v45  ;;  %v9474_v44 = vld [vmem:[#allocation5 + $0x6c0] ss:$16 sps:$4 sm:$0xff]  }
  0x7b   :  { %v9429_v45 = vld [vmem:[#allocation5 + $0x7a0] ss:$16 sps:$4 sm:$0xff]  }
  0x7d   :  { %663 = vmatpush2.bf16.msra.mxu0 %v9369_v46  ;;  %716 = vmatpush2.bf16.msra.mxu1 %v9370_v47  ;;  %v9437_v46 = vld [vmem:[#allocation5 + $0x784] ss:$16 sps:$4 sm:$0xff]   ;;  %v9435_v47 = vld [vmem:[#allocation5 + $0x780] ss:$16 sps:$4 sm:$0xff]  }
  0x7e   :  { %664 = vmatprep.subr.bf16.mxu0 %v9371_v49  ;;  %717 = vmatprep.subr.bf16.mxu1 %v9373_v50  ;;  %v9441_v49 = vld [vmem:[#allocation5 + $0x760] ss:$16 sps:$4 sm:$0xff]   ;;  %v9449_v50 = vld [vmem:[#allocation5 + $0x744] ss:$16 sps:$4 sm:$0xff]  }
  0x81   :  { %665 = vmatpush2.bf16.msra.mxu0 %v9375_v51  ;;  %718 = vmatpush2.bf16.msra.mxu1 %v9376_v52  ;;  %v9447_v51 = vld [vmem:[#allocation5 + $0x740] ss:$16 sps:$4 sm:$0xff]   ;;  %v9455_v52 = vld [vmem:[#allocation5 + $0x724] ss:$16 sps:$4 sm:$0xff]  }
  0x82   :  { %666 = vmatprep.subr.bf16.mxu0 %v9377_v53  ;;  %719 = vmatprep.subr.bf16.mxu1 %v9379_v54  ;;  %v9453_v53 = vld [vmem:[#allocation5 + $0x720] ss:$16 sps:$4 sm:$0xff]   ;;  %v9461_v54 = vld [vmem:[#allocation5 + $0x704] ss:$16 sps:$4 sm:$0xff]  }
  0x85   :  { %667 = vmatpush2.bf16.msra.mxu0 %v9381_v55  ;;  %720 = vmatpush2.bf16.msra.mxu1 %v9382_v56  ;;  %v9459_v55 = vld [vmem:[#allocation5 + $0x700] ss:$16 sps:$4 sm:$0xff]   ;;  %v9467_v56 = vld [vmem:[#allocation5 + $0x8e4] ss:$16 sps:$4 sm:$0xff]  }
  0x86   :  { %668 = vmatprep.subr.bf16.mxu0 %v9383_v57  ;;  %721 = vmatprep.subr.bf16.mxu1 %v9385_v58  ;;  %v9465_v57 = vld [vmem:[#allocation5 + $0x8e0] ss:$16 sps:$4 sm:$0xff]   ;;  %v9473_v58 = vld [vmem:[#allocation5 + $0x8c4] ss:$16 sps:$4 sm:$0xff]  }
  0x89   :  { %669 = vmatpush2.bf16.msra.mxu0 %v9387_v59  ;;  %722 = vmatpush2.bf16.msra.mxu1 %v9388_v60  ;;  %v9471_v59 = vld [vmem:[#allocation5 + $0x8c0] ss:$16 sps:$4 sm:$0xff]   ;;  %v9479_v60 = vld [vmem:[#allocation5 + $0x8a4] ss:$16 sps:$4 sm:$0xff]  }
  0x8a   :  { %670 = vmatprep.subr.bf16.mxu0 %v9389_v61  ;;  %723 = vmatprep.subr.bf16.mxu1 %v9391_v62  ;;  %v9482_v61 = vld [vmem:[#allocation5 + $0x6a4] ss:$16 sps:$4 sm:$0xff]   ;;  %v9480_v62 = vld [vmem:[#allocation5 + $0x6a0] ss:$16 sps:$4 sm:$0xff]  }
  0x8d   :  { %671 = vmatpush2.bf16.msra.mxu0 %v9393_v63  ;;  %724 = vmatpush2.bf16.msra.mxu1 %v9394_v0  ;;  %v9477_v63 = vld [vmem:[#allocation5 + $0x8a0] ss:$16 sps:$4 sm:$0xff]   ;;  %v9485_v0 = vld [vmem:[#allocation5 + $0x884] ss:$16 sps:$4 sm:$0xff]  }
  0x8e   :  { %9080 = vmatprep.subr.bf16.mxu0 %v9398_v1  ;;  %2084 = vmatprep.subr.bf16.mxu1 %v9422_v4  ;;  %v9488_v1 = vld [vmem:[#allocation5 + $0x684] ss:$16 sps:$4 sm:$0xff]  }
  0x8f   :  { %v9491_v4 = vld [vmem:[#allocation5 + $0x864] ss:$16 sps:$4 sm:$0xff]  }
  0x90   :  { %673 = vmatmul.mubr.bf16.vlgmr.msra.gmra.mxu0 %v10740_v2  ;;  %726 = vmatmul.mubr.bf16.vlgmr.msra.gmra.mxu1 %v10740_v2 }
  0x91   :  { %9081 = vmatpush3.bf16.msra.mxu0 %v9399_v3  ;;  %682 = vmatprep.mubr.bf16.mxu0 %v10745_v5  ;;  %v9483_v3 = vld [vmem:[#allocation5 + $0x880] ss:$16 sps:$4 sm:$0xff]  }
  0x92   :  { %9082 = vmatprep.subr.bf16.mxu0 %v9400_v6  ;;  %735 = vmatprep.mubr.bf16.mxu1 %v10745_v5  ;;  %v9492_v6 = vld [vmem:[#allocation5 + $0x660] ss:$16 sps:$4 sm:$0xff]  }
  0x93   :  { %2085 = vmatpush1.bf16.msra.mxu1 %v9420_v7  ;;  %v9489_v7 = vld [vmem:[#allocation5 + $0x860] ss:$16 sps:$4 sm:$0xff]  }
  0x94   :  { %2086 = vmatprep.subr.bf16.mxu1 %v9428_v8  ;;  %v9497_v8 = vld [vmem:[#allocation5 + $0x844] ss:$16 sps:$4 sm:$0xff]  }
  0x95   :  { %9083 = vmatpush3.bf16.msra.mxu0 %v9401_v9  ;;  %v9500_v9 = vld [vmem:[#allocation5 + $0x644] ss:$16 sps:$4 sm:$0xff]  }
  0x96   :  { %9084 = vmatprep.subr.bf16.mxu0 %v9405_v10  ;;  %v9498_v10 = vld [vmem:[#allocation5 + $0x640] ss:$16 sps:$4 sm:$0xff]  }
  0x97   :  { %2087 = vmatpush1.bf16.msra.mxu1 %v9426_v11  ;;  %v9495_v11 = vld [vmem:[#allocation5 + $0x840] ss:$16 sps:$4 sm:$0xff]  }
  0x98   :  { %683 = vmatmul.mubr.bf16.gmra.mxu0 %v10754_v12  ;;  %736 = vmatmul.mubr.bf16.gmra.mxu1 %v10754_v12 }
  0x99   :  { %9085 = vmatpush3.bf16.msra.mxu0 %v9406_v13  ;;  %778 = vmatprep.mubr.bf16.mxu0 %v10733_v48  ;;  %v9443_v48 = vld [vmem:[#allocation5 + $0x764] ss:$16 sps:$4 sm:$0xff]  }
  0x9a   :  { %9086 = vmatprep.subr.bf16.mxu0 %v9407_v14  ;;  %2088 = vmatprep.subr.bf16.mxu1 %v9434_v15  ;;  %v9506_v13 = vld [vmem:[#allocation5 + $0x624] ss:$16 sps:$4 sm:$0xff]   ;;  %v9504_v14 = vld [vmem:[#allocation5 + $0x620] ss:$16 sps:$4 sm:$0xff]  }
  0x9b   :  { %2089 = vmatpush1.bf16.msra.mxu1 %v9432_v16  ;;  %v9501_v15 = vld [vmem:[#allocation5 + $0x820] ss:$16 sps:$4 sm:$0xff]  }
  0x9c   :  { %2090 = vmatprep.subr.bf16.mxu1 %v9440_v17  ;;  %v9510_v16 = vld [vmem:[#allocation5 + $0x600] ss:$16 sps:$4 sm:$0xff]   ;;  %v9509_v17 = vld [vmem:[#allocation5 + $0x804] ss:$16 sps:$4 sm:$0xff]  }
  0x9d   :  { %9087 = vmatpush3.bf16.msra.mxu0 %v9408_v18  ;;  %v9512_v18 = vld [vmem:[#allocation5 + $0x604] ss:$16 sps:$4 sm:$0xff]  }
  0x9e   :  { %9088 = vmatprep.subr.bf16.mxu0 %v9409_v19  ;;  %v9507_v19 = vld [vmem:[#allocation5 + $0x800] ss:$16 sps:$4 sm:$0xff]  }
  0x9f   :  { %2091 = vmatpush1.bf16.msra.mxu1 %v9438_v20  ;;  %v9515_v20 = vld [vmem:[#allocation5 + $0x5ec] ss:$16 sps:$4 sm:$0xff]  }
  0xa0   :  { %2092 = vmatprep.subr.bf16.mxu1 %v9446_v21  ;;  %v9518_v21 = vld [vmem:[#allocation5 + $0x9e4] ss:$16 sps:$4 sm:$0xff]  }
  0xa1   :  { %9089 = vmatpush3.bf16.msra.mxu0 %v9410_v22 }
  0xa2   :  { %9090 = vmatprep.subr.bf16.mxu0 %v9411_v23 }
  0xa3   :  { %2093 = vmatpush1.bf16.msra.mxu1 %v9444_v24 }
  0xa4   :  { %2094 = vmatprep.subr.bf16.mxu1 %v9452_v25 }
  0xa5   :  { %9091 = vmatpush3.bf16.msra.mxu0 %v9412_v26 }
  0xa6   :  { %9092 = vmatprep.subr.bf16.mxu0 %v9413_v27 }
  0xa7   :  { %2095 = vmatpush1.bf16.msra.mxu1 %v9450_v29 }
  0xa8   :  { %2096 = vmatprep.subr.bf16.mxu1 %v9458_v31 }
  0xa9   :  { %9093 = vmatpush3.bf16.msra.mxu0 %v9414_v28 }
  0xaa   :  { %9094 = vmatprep.subr.bf16.mxu0 %v9415_v30 }
  0xab   :  { %2097 = vmatpush1.bf16.msra.mxu1 %v9456_v32 }
  0xac   :  { %2098 = vmatprep.subr.bf16.mxu1 %v9464_v33 }
  0xad   :  { %9095 = vmatpush3.bf16.msra.mxu0 %v9416_v34 }
  0xae   :  { %2137 = vmatprep.subr.bf16.mxu0 %v9419_v35 }
  0xaf   :  { %2099 = vmatpush1.bf16.msra.mxu1 %v9462_v36 }
  0xb0   :  { %779 = vmatmul.mubr.bf16.vlgmr.msra.gmra.mxu0 %v10740_v2  ;;  %2100 = vmatprep.subr.bf16.mxu1 %v9470_v37  ;;  %v9486_v2 = vld [vmem:[#allocation5 + $0x680] ss:$16 sps:$4 sm:$0xff]  }
  0xb1   :  { %786 = vmatprep.mubr.bf16.mxu0 %v10745_v5  ;;  %2138 = vmatpush1.bf16.msra.mxu0 %v9417_v38  ;;  %v9494_v5 = vld [vmem:[#allocation5 + $0x664] ss:$16 sps:$4 sm:$0xff]  }
  0xb2   :  { %2139 = vmatprep.subr.bf16.mxu0 %v9425_v39 }
  0xb3   :  { %2101 = vmatpush2.bf16.msra.mxu1 %v9468_v40 }
  0xb4   :  { %2102 = vmatprep.subr.bf16.mxu1 %v9476_v41 }
  0xb5   :  { %2140 = vmatpush1.bf16.msra.mxu0 %v9423_v42 }
  0xb6   :  { %2141 = vmatprep.subr.bf16.mxu0 %v9431_v43 }
  0xb7   :  { %2103 = vmatpush2.bf16.msra.mxu1 %v9474_v44 }
  0xb8   :  { %787 = vmatmul.mubr.bf16.gmra.mxu0 %v10754_v12  ;;  %2104 = vmatprep.subr.bf16.mxu1 %v9482_v61  ;;  %v9503_v12 = vld [vmem:[#allocation5 + $0x824] ss:$16 sps:$4 sm:$0xff]  }
  0xb9   :  { %2142 = vmatpush1.bf16.msra.mxu0 %v9429_v45 }
  0xba   :  { %2143 = vmatprep.subr.bf16.mxu0 %v9437_v46 }
  0xbb   :  { %2105 = vmatpush2.bf16.msra.mxu1 %v9480_v62 }
  0xbc   :  { %2106 = vmatprep.subr.bf16.mxu1 %v9488_v1 }
  0xbd   :  { %2144 = vmatpush1.bf16.msra.mxu0 %v9435_v47 }
  0xbe   :  { %2145 = vmatprep.subr.bf16.mxu0 %v9443_v48 }
  0xbf   :  { %2107 = vmatpush2.bf16.msra.mxu1 %v9486_v2 }
  0xc0   :  { %2108 = vmatprep.subr.bf16.mxu1 %v9494_v5 }
  0xc1   :  { %2146 = vmatpush1.bf16.msra.mxu0 %v9441_v49 }
  0xc2   :  { %2147 = vmatprep.subr.bf16.mxu0 %v9449_v50 }
  0xc3   :  { %2109 = vmatpush2.bf16.msra.mxu1 %v9492_v6 }
  0xc4   :  { %2110 = vmatprep.subr.bf16.mxu1 %v9500_v9 }
  0xc5   :  { %2148 = vmatpush1.bf16.msra.mxu0 %v9447_v51 }
  0xc6   :  { %2149 = vmatprep.subr.bf16.mxu0 %v9455_v52 }
  0xc7   :  { %2111 = vmatpush2.bf16.msra.mxu1 %v9498_v10 }
  0xc8   :  { %2112 = vmatprep.subr.bf16.mxu1 %v9506_v13 }
  0xc9   :  { %2150 = vmatpush1.bf16.msra.mxu0 %v9453_v53 }
  0xca   :  { %2151 = vmatprep.subr.bf16.mxu0 %v9461_v54 }
  0xcb   :  { %2113 = vmatpush2.bf16.msra.mxu1 %v9504_v14 }
  0xcc   :  { %2114 = vmatprep.subr.bf16.mxu1 %v9512_v18 }
  0xcd   :  { %2152 = vmatpush1.bf16.msra.mxu0 %v9459_v55 }
  0xce   :  { %2153 = vmatprep.subr.bf16.mxu0 %v9467_v56 }
  0xcf   :  { %2115 = vmatpush2.bf16.msra.mxu1 %v9510_v16 }
  0xd0   :  { %2190 = vmatprep.subr.bf16.mxu1 %v9518_v21 }
  0xd1   :  { %2154 = vmatpush2.bf16.msra.mxu0 %v9465_v57 }
  0xd2   :  { %2155 = vmatprep.subr.bf16.mxu0 %v9473_v58 }
  0xd5   :  { %2156 = vmatpush2.bf16.msra.mxu0 %v9471_v59 }
  0xd6   :  { %2157 = vmatprep.subr.bf16.mxu0 %v9479_v60 }
  0xd9   :  { %2158 = vmatpush2.bf16.msra.mxu0 %v9477_v63 }
  0xda   :  { %2159 = vmatprep.subr.bf16.mxu0 %v9485_v0 }
  0xdd   :  { %2160 = vmatpush2.bf16.msra.mxu0 %v9483_v3 }
  0xde   :  { %2161 = vmatprep.subr.bf16.mxu0 %v9491_v4 }
  0xe1   :  { %2162 = vmatpush2.bf16.msra.mxu0 %v9489_v7 }
  0xe2   :  { %2163 = vmatprep.subr.bf16.mxu0 %v9497_v8 }
  0xe5   :  { %2164 = vmatpush2.bf16.msra.mxu0 %v9495_v11 }
  0xe6   :  { %2165 = vmatprep.subr.bf16.mxu0 %v9503_v12 }
  0xe9   :  { %2166 = vmatpush2.bf16.msra.mxu0 %v9501_v15 }
  0xea   :  { %2167 = vmatprep.subr.bf16.mxu0 %v9509_v17 }
  0xed   :  { %2168 = vmatpush2.bf16.msra.mxu0 %v9507_v19 }
  0xee   :  { %2243 = vmatprep.subr.bf16.mxu0 %v9515_v20 }
 0x150   :  { %v674_v22 = vpop.f32.mrf.mxu0  ;;  %v727_v23 = vpop.f32.mrf.mxu1 }
 0x151   :  { %v815_v24 = vmul.f32 0.2, %v674_v22  ;;  %vm795_vm0 = vcmp.ge.f32.partialorder %v674_v22, 0.0  ;;  %v817_v27 = vmul.f32 0.2, %v727_v23  ;;  %vm797_vm1 = vcmp.ge.f32.partialorder %v727_v23, 0.0 }
 0x152   :  { %v676_v25 = vpop.f32.mrf.mxu0  ;;  %v729_v26 = vpop.f32.mrf.mxu1 }
 0x153   :  { %vm796_vm2 = vcmp.ge.f32.partialorder %v676_v25, 0.0  ;;  %v816_v28 = vmul.f32 0.2, %v676_v25  ;;  %v818_v31 = vmul.f32 0.2, %v729_v26  ;;  %v835_v33 = vsel %vm795_vm0, %v674_v22, %v815_v24 }
 0x154   :  { %v678_v29 = vpop.f32.mrf.mxu0  ;;  %v731_v30 = vpop.f32.mrf.mxu1  ;;  %vm798_vm5 = vcmp.ge.f32.partialorder %v729_v26, 0.0  ;;  %v837_v37 = vsel %vm797_vm1, %v727_v23, %v817_v27 }
 0x155   :  { %vm800_vm3 = vcmp.ge.f32.partialorder %v678_v29, 0.0  ;;  %v820_v32 = vmul.f32 0.2, %v678_v29  ;;  %vm802_vm4 = vcmp.ge.f32.partialorder %v731_v30, 0.0  ;;  %v822_v34 = vmul.f32 0.2, %v731_v30 }
 0x156   :  { %v680_v35 = vpop.f32.mrf.mxu0  ;;  %v733_v36 = vpop.f32.mrf.mxu1  ;;  %v836_v39 = vsel %vm796_vm2, %v676_v25, %v816_v28  ;;  %v838_v45 = vsel %vm798_vm5, %v729_v26, %v818_v31  ;;  %vm10825_vm2 = vmand %vm1116_vm15, %vm1025_vm14 }
 0x157   :  { %vm801_vm6 = vcmp.ge.f32.partialorder %v680_v35, 0.0  ;;  %v821_v38 = vmul.f32 0.2, %v680_v35  ;;  %vm803_vm7 = vcmp.ge.f32.partialorder %v733_v36, 0.0  ;;  %v840_v40 = vsel %vm800_vm3, %v678_v29, %v820_v32 }
 0x158   :  { %v842_v41 = vsel %vm802_vm4, %v731_v30, %v822_v34  ;;  %v823_v42 = vmul.f32 0.2, %v733_v36  ;;  %v684_v43 = vpop.f32.mrf.mxu0  ;;  %v737_v44 = vpop.f32.mrf.mxu1  ;;  %v10765_v53 = vpack.c.bf16 %v840_v40, %v835_v33  ;;  %vm3530_vm3 = vcmask 1043456  }
 0x159   :  { %v841_v46 = vsel %vm801_vm6, %v680_v35, %v821_v38  ;;  %vm805_vm8 = vcmp.ge.f32.partialorder %v684_v43, 0.0  ;;  %v825_v47 = vmul.f32 0.2, %v684_v43  ;;  %vm807_vm9 = vcmp.ge.f32.partialorder %v737_v44, 0.0 }
 0x15a   :  { %v10763_v48 = vpack.c.bf16 %v841_v46, %v836_v39  ;;  %v843_v49 = vsel %vm803_vm7, %v733_v36, %v823_v42  ;;  %v827_v50 = vmul.f32 0.2, %v737_v44  ;;  %v686_v51 = vpop.f32.mrf.mxu0  ;;  %v739_v52 = vpop.f32.mrf.mxu1  ;;  %v10767_v54 = vpack.c.bf16 %v842_v41, %v837_v37  ;;  %v9513_v37 = vld [vmem:[#allocation5 + $0x5e8] ss:$16 sps:$4 sm:$0xff]   ;;  %v9516_v42 = vld [vmem:[#allocation5 + $0x9e0] ss:$16 sps:$4 sm:$0xff]  }
 0x15b   :  { %vm806_vm10 = vcmp.ge.f32.partialorder %v686_v51, 0.0  ;;  %v826_v55 = vmul.f32 0.2, %v686_v51  ;;  %v10769_v56 = vpack.c.bf16 %v843_v49, %v838_v45  ;;  %v845_v57 = vsel %vm805_vm8, %v684_v43, %v825_v47  ;;  %v9521_v49 = vld [vmem:[#allocation5 + $0x5cc] ss:$16 sps:$4 sm:$0xff]  }
 0x15c   :  { %v847_v58 = vsel %vm807_vm9, %v737_v44, %v827_v50  ;;  %v828_v59 = vmul.f32 0.2, %v739_v52  ;;  %v688_v60 = vpop.f32.mrf.mxu0  ;;  %v741_v61 = vpop.f32.mrf.mxu1  ;;  %vm808_vm11 = vcmp.ge.f32.partialorder %v739_v52, 0.0  ;;  %v1039_v3 = vshrl.u32 %v10763_v48, 16  ;;  %v9591_v46 = vld [vmem:[#allocation5 + $0x648] ss:$16 sps:$4 sm:$0xff]  }
 0x15d   :  { %vm810_vm12 = vcmp.ge.f32.partialorder %v688_v60, 0.0  ;;  %v830_v62 = vmul.f32 0.2, %v688_v60  ;;  %vm812_vm13 = vcmp.ge.f32.partialorder %v741_v61, 0.0  ;;  %v846_v63 = vsel %vm806_vm10, %v686_v51, %v826_v55  ;;  %v9524_v55 = vld [vmem:[#allocation5 + $0x9c4] ss:$16 sps:$4 sm:$0xff]  }
 0x15e   :  { %v832_v0 = vmul.f32 0.2, %v741_v61  ;;  %v690_v1 = vpop.f32.mrf.mxu0  ;;  %v743_v2 = vpop.f32.mrf.mxu1  ;;  %v1041_v4 = vshll.u32 %v10763_v48, 16  ;;  %v848_v7 = vsel %vm808_vm11, %v739_v52, %v828_v59  ;;  %v1065_v14 = vshll.u32 %v10769_v56, 16  ;;  %v9519_v52 = vld [vmem:[#allocation5 + $0x5c8] ss:$16 sps:$4 sm:$0xff]  }
 0x15f   :  { %v850_v5 = vsel %vm810_vm12, %v688_v60, %v830_v62  ;;  %vm811_vm0 = vcmp.ge.f32.partialorder %v690_v1, 0.0  ;;  %v831_v6 = vmul.f32 0.2, %v690_v1  ;;  %vm813_vm1 = vcmp.ge.f32.partialorder %v743_v2, 0.0  ;;  %v9522_v60 = vld [vmem:[#allocation5 + $0x9c0] ss:$16 sps:$4 sm:$0xff]  }
 0x160   :  { %v10774_v8 = vpack.c.bf16 %v850_v5, %v845_v57  ;;  %v852_v9 = vsel %vm812_vm13, %v741_v61, %v832_v0  ;;  %v833_v10 = vmul.f32 0.2, %v743_v2  ;;  %v1043_v13 = vrot.slane %v1041_v4, 1  ;;  %v9527_v61 = vld [vmem:[#allocation5 + $0x5ac] ss:$16 sps:$4 sm:$0xff]  }
 0x161   :  { %v10776_v11 = vpack.c.bf16 %v852_v9, %v847_v58  ;;  %v851_v12 = vsel %vm811_vm0, %v690_v1, %v831_v6  ;;  %v1063_v17 = vshrl.u32 %v10769_v56, 16  ;;  %v1029_v18 = vshll.u32 %v10765_v53, 16  ;;  %v9530_v1 = vld [vmem:[#allocation5 + $0x9a4] ss:$16 sps:$4 sm:$0xff]  }
 0x162   :  { %v10781_v15 = vpack.c.bf16 %v851_v12, %v846_v63  ;;  %v853_v16 = vsel %vm813_vm1, %v743_v2, %v833_v10  ;;  %v1067_v20 = vrot.slane %v1065_v14, 1  ;;  %v1027_v21 = vshrl.u32 %v10765_v53, 16  ;;  %v9525_v63 = vld [vmem:[#allocation5 + $0x5a8] ss:$16 sps:$4 sm:$0xff]   ;;  %v9528_v2 = vld [vmem:[#allocation5 + $0x9a0] ss:$16 sps:$4 sm:$0xff]  }
 0x163   :  { %v10785_v19 = vpack.c.bf16 %v853_v16, %v848_v7  ;;  %v1034_v22 = vshll.u32 %v10774_v8, 16  ;;  %v1031_v24 = vrot.slane %v1029_v18, 1  ;;  %v1053_v25 = vshll.u32 %v10767_v54, 16  ;;  %v9533_v12 = vld [vmem:[#allocation5 + $0x58c] ss:$16 sps:$4 sm:$0xff]  }
 0x164   :  { %v1046_v23 = vshll.u32 %v10781_v15, 16  ;;  %v1058_v26 = vshll.u32 %v10776_v11, 16  ;;  %v1044_v27 = vor.u32 %v1043_v13, %v1039_v3  ;;  %v1051_v30 = vshrl.u32 %v10767_v54, 16 }
 0x165   :  { %v1070_v28 = vshll.u32 %v10785_v19, 16  ;;  %v1036_v29 = vrot.slane %v1034_v22, 1  ;;  %v1055_v32 = vrot.slane %v1053_v25, 1  ;;  %v1089_v34 = vshrl.u32 %v10781_v15, 16 }
 0x166   :  { %v1048_v31 = vrot.slane %v1046_v23, 1  ;;  %v1060_v33 = vrot.slane %v1058_v26, 1  ;;  %v1068_v35 = vor.u32 %v1067_v20, %v1063_v17  ;;  %v1032_v38 = vor.u32 %v1031_v24, %v1027_v21 }
 0x167   :  { %v1072_v36 = vrot.slane %v1070_v28, 1  ;;  %v1095_v39 = vshrl.u32 %v10785_v19, 16  ;;  %v1056_v41 = vor.u32 %v1055_v32, %v1051_v30  ;;  %v1086_v58 = vshrl.u32 %v10774_v8, 16 }
 0x168   :  { %v1049_v40 = vsel %vm1025_vm14, %v1044_v27, %v1048_v31  ;;  %v1091_v43 = vor.u32 %v1089_v34, %v1048_v31  ;;  %v10821_v45 = vsel %vm1025_vm14, %v1032_v38, %v1036_v29  ;;  %v1092_v59 = vshrl.u32 %v10776_v11, 16  ;;  %v9531_v27 = vld [vmem:[#allocation5 + $0x588] ss:$16 sps:$4 sm:$0xff]  }
 0x169   :  { %2116 = vmatprep.mubr.bf16.mxu1 %v1049_v40  ;;  %v10818_v44 = vsel %vm1025_vm14, %v1068_v35, %v1072_v36  ;;  %v1097_v47 = vor.u32 %v1095_v39, %v1072_v36  ;;  %v10832_v50 = vsel %vm1025_vm14, %v1056_v41, %v1060_v33  ;;  %v1088_v62 = vor.u32 %v1086_v58, %v1036_v29 }
 0x16a   :  { %2169 = vmatprep.mubr.bf16.mxu0 %v10818_v44  ;;  %2117 = vmatmul.mubr.bf16.vlgmr.msra.gmra.mxu1 %v10821_v45  ;;  %v10836_v51 = vsel %vm10825_vm2, %v1091_v43, %v1043_v13  ;;  %v1094_v0 = vor.u32 %v1092_v59, %v1060_v33  ;;  %v4889_v5 = vrot.slane %v1063_v17, 4  ;;  %v4890_v6 = vrot.slane %v1065_v14, 5  ;;  %v9536_v13 = vld [vmem:[#allocation5 + $0x984] ss:$16 sps:$4 sm:$0xff]   ;;  %v9534_v33 = vld [vmem:[#allocation5 + $0x980] ss:$16 sps:$4 sm:$0xff]  }
 0x16b   :  { %2170 = vmatmul.mubr.bf16.vlgmr.msra.gmra.mxu0 %v10832_v50  ;;  %2126 = vmatprep.mubr.bf16.mxu1 %v10836_v51  ;;  %v10842_v57 = vsel %vm10825_vm2, %v1097_v47, %v1067_v20  ;;  %v4892_v9 = vrot.slane %v1095_v39, 4  ;;  %v10849_v10 = vsel %vm10825_vm2, %v1088_v62, %v1031_v24  ;;  %vm4867_vm4 = vsmask.f32 3328  ;;  %v9537_v43 = vld [vmem:[#allocation5 + $0x568] ss:$16 sps:$4 sm:$0xff]  }
 0x16c   :  { %2244 = vmatpush1.bf16.msra.mxu0 %v9513_v37  ;;  %2179 = vmatprep.mubr.bf16.mxu0 %v10842_v57  ;;  %v4891_v16 = vor.u32 %v4890_v6, %v4889_v5  ;;  %v10854_v14 = vsel %vm10825_vm2, %v1094_v0, %v1055_v32  ;;  %v4885_v17 = vrot.slane %v1092_v59, 4  ;;  %v4893_v29 = vrot.slane %v1070_v28, 5  ;;  %vm10876_vm6 = vmand %vm3530_vm3, %vm4867_vm4  ;;  %v9540_v59 = vld [vmem:[#allocation5 + $0x960] ss:$16 sps:$4 sm:$0xff]  }
 0x16d   :  { %2191 = vmatpush1.bf16.msra.mxu1 %v9516_v42  ;;  %2245 = vmatprep.subr.bf16.mxu0 %v9521_v49  ;;  %v4875_v24 = vrot.slane %v1039_v3, 4  ;;  %v11622_v35 = vmov 0   ;;  %v4876_v32 = vrot.slane %v1041_v4, 5  ;;  %v4878_v36 = vrot.slane %v1089_v34, 4  ;;  %v9539_v34 = vld [vmem:[#allocation5 + $0x56c] ss:$16 sps:$4 sm:$0xff]  }
 0x16e   :  { %2192 = vmatprep.subr.bf16.mxu1 %v9524_v55  ;;  %v4879_v37 = vrot.slane %v1046_v23, 5  ;;  %v4894_v3 = vor.u32 %v4893_v29, %v4892_v9  ;;  %v4882_v38 = vrot.slane %v1051_v30, 4  ;;  %v4883_v39 = vrot.slane %v1053_v25, 5  ;;  %v9542_v25 = vld [vmem:[#allocation5 + $0x964] ss:$16 sps:$4 sm:$0xff]  }
 0x16f   :  { %v4886_v41 = vrot.slane %v1058_v26, 5  ;;  %v4871_v4 = vrot.slane %v1086_v58, 4  ;;  %v4877_v42 = vor.u32 %v4876_v32, %v4875_v24  ;;  %v4869_v0 = vrot.slane %v1029_v18, 5  ;;  %v9543_v9 = vld [vmem:[#allocation5 + $0x548] ss:$16 sps:$4 sm:$0xff]  }
 0x170   :  { %2246 = vmatpush1.bf16.msra.mxu0 %v9519_v52  ;;  %v9096_v7 = vpop.f32.mrf.mxu0  ;;  %v4880_v23 = vor.u32 %v4879_v37, %v4878_v36  ;;  %v10881_v47 = vsel %vm4867_vm4, %v4891_v16, %v4894_v3  ;;  %v4884_v26 = vor.u32 %v4883_v39, %v4882_v38  ;;  %v10885_v52 = vsel %vm10876_vm6, %v4894_v3, %v4891_v16  ;;  %v9548_v18 = vld [vmem:[#allocation5 + $0x944] ss:$16 sps:$4 sm:$0xff]   ;;  %v9551_v32 = vld [vmem:[#allocation5 + $0x52c] ss:$16 sps:$4 sm:$0xff]  }
 0x171   :  { %2193 = vmatpush1.bf16.msra.mxu1 %v9522_v60  ;;  %2247 = vmatprep.subr.bf16.mxu0 %v9527_v61  ;;  %v4887_v49 = vor.u32 %v4886_v41, %v4885_v17  ;;  %v4868_v61 = vrot.slane %v1027_v21, 4  ;;  %v9545_v21 = vld [vmem:[#allocation5 + $0x54c] ss:$16 sps:$4 sm:$0xff]   ;;  %v9554_v37 = vld [vmem:[#allocation5 + $0x924] ss:$16 sps:$4 sm:$0xff]  }
 0x172   :  { %v9097_v20 = vpop.f32.mrf.mxu0  ;;  %2127 = vmatmul.mubr.bf16.gmra.mxu1 %v10849_v10  ;;  %2194 = vmatprep.subr.bf16.mxu1 %v9530_v1  ;;  %v10888_v60 = vsel %vm4867_vm4, %v4877_v42, %v4880_v23  ;;  %v4872_v1 = vrot.slane %v1034_v22, 5  ;;  %v9552_v41 = vld [vmem:[#allocation5 + $0x920] ss:$16 sps:$4 sm:$0xff]  }
 0x173   :  { %v9098_v31 = vadd.f32 %v9097_v20, %v9096_v7  ;;  %2180 = vmatmul.mubr.bf16.gmra.mxu0 %v10854_v14  ;;  %2222 = vmatprep.mubr.bf16.mxu1 %v11622_v35  ;;  %v10905_v6 = vsel %vm10876_vm6, %v4887_v49, %v4884_v26 }
 0x174   :  { %2248 = vmatpush1.bf16.msra.mxu0 %v9525_v63  ;;  %2275 = vmatprep.mubr.bf16.mxu0 %v1049_v40  ;;  %v9099_v28 = vpop.f32.mrf.mxu0  ;;  %v10893_v63 = vsel %vm4867_vm4, %v4884_v26, %v4887_v49  ;;  %v9579_v40 = vld [vmem:[#allocation5 + $0x688] ss:$16 sps:$4 sm:$0xff]  }
 0x175   :  { %vm799_vm5 = vcmp.ge.f32.partialorder %v9098_v31, 0.0  ;;  %2195 = vmatpush1.bf16.msra.mxu1 %v9528_v2  ;;  %2249 = vmatprep.subr.bf16.mxu0 %v9533_v12  ;;  %v819_v55 = vmul.f32 0.2, %v9098_v31  ;;  %v10901_v2 = vsel %vm10876_vm6, %v4880_v23, %v4877_v42  ;;  %v4870_v12 = vor.u32 %v4869_v0, %v4868_v61  ;;  %v9557_v23 = vld [vmem:[#allocation5 + $0x50c] ss:$16 sps:$4 sm:$0xff]  }
 0x176   :  { %v9100_v30 = vpop.f32.mrf.mxu0  ;;  %2196 = vmatprep.subr.bf16.mxu1 %v9536_v13  ;;  %v4873_v13 = vor.u32 %v4872_v1, %v4871_v4  ;;  %v9563_v61 = vld [vmem:[#allocation5 + $0x6ec] ss:$16 sps:$4 sm:$0xff]  }
 0x177   :  { %v9101_v58 = vadd.f32 %v9100_v30, %v9099_v28  ;;  %v839_v22 = vsel %vm799_vm5, %v9098_v31, %v819_v55  ;;  %v9549_v31 = vld [vmem:[#allocation5 + $0x528] ss:$16 sps:$4 sm:$0xff]   ;;  %v9566_v0 = vld [vmem:[#allocation5 + $0x7ec] ss:$16 sps:$4 sm:$0xff]  }
 0x178   :  { %2250 = vmatpush1.bf16.msra.mxu0 %v9531_v27  ;;  %v9102_v62 = vpop.f32.mrf.mxu0  ;;  %v10911_v29 = vsel %vm4867_vm4, %v4870_v12, %v4873_v13  ;;  %v10915_v24 = vsel %vm10876_vm6, %v4873_v13, %v4870_v12  ;;  %v9555_v30 = vld [vmem:[#allocation5 + $0x508] ss:$16 sps:$4 sm:$0xff]   ;;  %v9572_v12 = vld [vmem:[#allocation5 + $0x7cc] ss:$16 sps:$4 sm:$0xff]  }
 0x179   :  { %vm804_vm7 = vcmp.ge.f32.partialorder %v9101_v58, 0.0  ;;  %v824_v5 = vmul.f32 0.2, %v9101_v58  ;;  %2197 = vmatpush1.bf16.msra.mxu1 %v9534_v33  ;;  %2251 = vmatprep.subr.bf16.mxu0 %v9539_v34  ;;  %v9546_v33 = vld [vmem:[#allocation5 + $0x940] ss:$16 sps:$4 sm:$0xff]  }
 0x17a   :  { %v9103_v7 = vpop.f32.mrf.mxu0  ;;  %2198 = vmatprep.subr.bf16.mxu1 %v9542_v25 }
 0x17b   :  { %v844_v16 = vsel %vm804_vm7, %v9101_v58, %v824_v5  ;;  %v9104_v20 = vadd.f32 %v9103_v7, %v9102_v62  ;;  %v9561_v62 = vld [vmem:[#allocation5 + $0x6e8] ss:$16 sps:$4 sm:$0xff]   ;;  %v9569_v7 = vld [vmem:[#allocation5 + $0x6cc] ss:$16 sps:$4 sm:$0xff]  }
 0x17c   :  { %v10908_v17 = vpack.c.bf16 %v844_v16, %v839_v22  ;;  %2252 = vmatpush1.bf16.msra.mxu0 %v9537_v43  ;;  %v9105_v27 = vpop.f32.mrf.mxu0  ;;  %v9560_v43 = vld [vmem:[#allocation5 + $0x904] ss:$16 sps:$4 sm:$0xff]  }
 0x17d   :  { %2199 = vmatpush1.bf16.msra.mxu1 %v9540_v59  ;;  %2253 = vmatprep.subr.bf16.mxu0 %v9545_v21  ;;  %v829_v38 = vmul.f32 0.2, %v9104_v20  ;;  %vm809_vm8 = vcmp.ge.f32.partialorder %v9104_v20, 0.0  ;;  %v9558_v59 = vld [vmem:[#allocation5 + $0x900] ss:$16 sps:$4 sm:$0xff]  }
 0x17e   :  { %v9106_v36 = vpop.f32.mrf.mxu0  ;;  %2200 = vmatprep.subr.bf16.mxu1 %v9548_v18  ;;  %v1075_v28 = vshrl.u32 %v10908_v17, 16  ;;  %v1077_v3 = vshll.u32 %v10908_v17, 16  ;;  %v9564_v21 = vld [vmem:[#allocation5 + $0x7e8] ss:$16 sps:$4 sm:$0xff]  }
 0x17f   :  { %v9107_v39 = vadd.f32 %v9106_v36, %v9105_v27  ;;  %v849_v26 = vsel %vm809_vm8, %v9104_v20, %v829_v38  ;;  %v9567_v20 = vld [vmem:[#allocation5 + $0x6c8] ss:$16 sps:$4 sm:$0xff]  }
 0x180   :  { %2254 = vmatpush1.bf16.msra.mxu0 %v9543_v9  ;;  %v4896_v4 = vrot.slane %v1075_v28, 4  ;;  %v4897_v34 = vrot.slane %v1077_v3, 5  ;;  %v1079_v58 = vrot.slane %v1077_v3, 1  ;;  %v9576_v3 = vld [vmem:[#allocation5 + $0x7a8] ss:$16 sps:$4 sm:$0xff]  }
 0x181   :  { %vm814_vm9 = vcmp.ge.f32.partialorder %v9107_v39, 0.0  ;;  %v834_v42 = vmul.f32 0.2, %v9107_v39  ;;  %2201 = vmatpush1.bf16.msra.mxu1 %v9546_v33  ;;  %2255 = vmatprep.subr.bf16.mxu0 %v9551_v32  ;;  %v9570_v33 = vld [vmem:[#allocation5 + $0x7c8] ss:$16 sps:$4 sm:$0xff]  }
 0x182   :  { %2202 = vmatprep.subr.bf16.mxu1 %v9554_v37  ;;  %v4898_v25 = vor.u32 %v4897_v34, %v4896_v4  ;;  %v1080_v9 = vor.u32 %v1079_v58, %v1075_v28  ;;  %v9575_v32 = vld [vmem:[#allocation5 + $0x6ac] ss:$16 sps:$4 sm:$0xff]   ;;  %v9573_v37 = vld [vmem:[#allocation5 + $0x6a8] ss:$16 sps:$4 sm:$0xff]  }
 0x183   :  { %v854_v49 = vsel %vm814_vm9, %v9107_v39, %v834_v42  ;;  %v9578_v28 = vld [vmem:[#allocation5 + $0x7ac] ss:$16 sps:$4 sm:$0xff]   ;;  %v9582_v34 = vld [vmem:[#allocation5 + $0x788] ss:$16 sps:$4 sm:$0xff]  }
 0x184   :  { %v10919_v55 = vpack.c.bf16 %v854_v49, %v849_v26  ;;  %2256 = vmatpush1.bf16.msra.mxu0 %v9549_v31  ;;  %v9581_v39 = vld [vmem:[#allocation5 + $0x68c] ss:$16 sps:$4 sm:$0xff]   ;;  %v9594_v49 = vld [vmem:[#allocation5 + $0x748] ss:$16 sps:$4 sm:$0xff]  }
 0x185   :  { %2203 = vmatpush1.bf16.msra.mxu1 %v9552_v41  ;;  %2257 = vmatprep.subr.bf16.mxu0 %v9557_v23  ;;  %v9584_v41 = vld [vmem:[#allocation5 + $0x78c] ss:$16 sps:$4 sm:$0xff]   ;;  %v9585_v23 = vld [vmem:[#allocation5 + $0x668] ss:$16 sps:$4 sm:$0xff]  }
 0x186   :  { %2204 = vmatprep.subr.bf16.mxu1 %v9560_v43  ;;  %v1082_v1 = vshll.u32 %v10919_v55, 16  ;;  %v1098_v5 = vshrl.u32 %v10919_v55, 16  ;;  %v9587_v42 = vld [vmem:[#allocation5 + $0x66c] ss:$16 sps:$4 sm:$0xff]   ;;  %v9588_v43 = vld [vmem:[#allocation5 + $0x768] ss:$16 sps:$4 sm:$0xff]  }
 0x187   :  { %v9596_v26 = vld [vmem:[#allocation5 + $0x74c] ss:$16 sps:$4 sm:$0xff]  }
 0x188   :  { %2258 = vmatpush1.bf16.msra.mxu0 %v9555_v30  ;;  %v1084_v18 = vrot.slane %v1082_v1, 1  ;;  %v4899_v13 = vrot.slane %v1098_v5, 4  ;;  %v4900_v22 = vrot.slane %v1082_v1, 5  ;;  %v9590_v30 = vld [vmem:[#allocation5 + $0x76c] ss:$16 sps:$4 sm:$0xff]  }
 0x189   :  { %2205 = vmatpush1.bf16.msra.mxu1 %v9558_v59  ;;  %2259 = vmatprep.subr.bf16.mxu0 %v9563_v61  ;;  %v9597_v59 = vld [vmem:[#allocation5 + $0x628] ss:$16 sps:$4 sm:$0xff]   ;;  %v9608_v1 = vld [vmem:[#allocation5 + $0x70c] ss:$16 sps:$4 sm:$0xff]  }
 0x18a   :  { %2296 = vmatprep.subr.bf16.mxu1 %v9566_v0  ;;  %v10924_v16 = vsel %vm1025_vm14, %v1080_v9, %v1084_v18  ;;  %v4901_v27 = vor.u32 %v4900_v22, %v4899_v13  ;;  %v1100_v38 = vor.u32 %v1098_v5, %v1084_v18  ;;  %v9600_v61 = vld [vmem:[#allocation5 + $0x728] ss:$16 sps:$4 sm:$0xff]   ;;  %v9614_v9 = vld [vmem:[#allocation5 + $0x8ec] ss:$16 sps:$4 sm:$0xff]  }
 0x18b   :  { %v9603_v0 = vld [vmem:[#allocation5 + $0x608] ss:$16 sps:$4 sm:$0xff]   ;;  %v9620_v22 = vld [vmem:[#allocation5 + $0x8cc] ss:$16 sps:$4 sm:$0xff]  }
 0x18c   :  { %2260 = vmatpush2.bf16.msra.mxu0 %v9561_v62  ;;  %2223 = vmatmul.mubr.bf16.vlgmr.msra.gmra.mxu1 %v10924_v16  ;;  %v10928_v36 = vsel %vm4867_vm4, %v4898_v25, %v4901_v27  ;;  %v10932_v31 = vsel %vm10876_vm6, %v4901_v27, %v4898_v25  ;;  %v10937_v4 = vsel %vm10825_vm2, %v1100_v38, %v1079_v58  ;;  %v9593_v25 = vld [vmem:[#allocation5 + $0x64c] ss:$16 sps:$4 sm:$0xff]   ;;  %v9606_v5 = vld [vmem:[#allocation5 + $0x708] ss:$16 sps:$4 sm:$0xff]  }
 0x18d   :  { %2297 = vmatpush1.bf16.msra.mxu1 %v9564_v21  ;;  %2261 = vmatprep.subr.bf16.mxu0 %v9569_v7  ;;  %v9599_v58 = vld [vmem:[#allocation5 + $0x62c] ss:$16 sps:$4 sm:$0xff]   ;;  %v9609_v7 = vld [vmem:[#allocation5 + $0x9e8] ss:$16 sps:$4 sm:$0xff]  }
 0x18e   :  { %2298 = vmatprep.subr.bf16.mxu1 %v9572_v12  ;;  %2232 = vmatprep.mubr.bf16.mxu1 %v11622_v35  ;;  %v9605_v62 = vld [vmem:[#allocation5 + $0x60c] ss:$16 sps:$4 sm:$0xff]   ;;  %v9612_v18 = vld [vmem:[#allocation5 + $0x8e8] ss:$16 sps:$4 sm:$0xff]  }
 0x18f   :  { %v9611_v21 = vld [vmem:[#allocation5 + $0x9ec] ss:$16 sps:$4 sm:$0xff]   ;;  %v9615_v13 = vld [vmem:[#allocation5 + $0x9c8] ss:$16 sps:$4 sm:$0xff]  }
 0x190   :  { %2262 = vmatpush2.bf16.msra.mxu0 %v9567_v20  ;;  %v9617_v12 = vld [vmem:[#allocation5 + $0x9cc] ss:$16 sps:$4 sm:$0xff]   ;;  %v9618_v20 = vld [vmem:[#allocation5 + $0x8c8] ss:$16 sps:$4 sm:$0xff]  }
 0x191   :  { %2299 = vmatpush1.bf16.msra.mxu1 %v9570_v33  ;;  %2263 = vmatprep.subr.bf16.mxu0 %v9575_v32  ;;  %v9623_v27 = vld [vmem:[#allocation5 + $0x9ac] ss:$16 sps:$4 sm:$0xff]   ;;  %v9621_v33 = vld [vmem:[#allocation5 + $0x9a8] ss:$16 sps:$4 sm:$0xff]  }
 0x192   :  { %2300 = vmatprep.subr.bf16.mxu1 %v9578_v28  ;;  %v9626_v32 = vld [vmem:[#allocation5 + $0x8ac] ss:$16 sps:$4 sm:$0xff]  }
 0x193   :  { %v9629_v28 = vld [vmem:[#allocation5 + $0x98c] ss:$16 sps:$4 sm:$0xff]  }
 0x194   :  { %2264 = vmatpush2.bf16.msra.mxu0 %v9573_v37  ;;  %2233 = vmatmul.mubr.bf16.gmra.mxu1 %v10937_v4  ;;  %v9624_v37 = vld [vmem:[#allocation5 + $0x8a8] ss:$16 sps:$4 sm:$0xff]   ;;  %v9632_v38 = vld [vmem:[#allocation5 + $0x88c] ss:$16 sps:$4 sm:$0xff]  }
 0x195   :  { %2301 = vmatpush1.bf16.msra.mxu1 %v9576_v3  ;;  %2328 = vmatprep.mubr.bf16.mxu1 %v10818_v44  ;;  %v9602_v44 = vld [vmem:[#allocation5 + $0x72c] ss:$16 sps:$4 sm:$0xff]   ;;  %v9627_v3 = vld [vmem:[#allocation5 + $0x988] ss:$16 sps:$4 sm:$0xff]  }
 0x196   :  { %2265 = vmatprep.subr.bf16.mxu0 %v9581_v39  ;;  %2302 = vmatprep.subr.bf16.mxu1 %v9584_v41  ;;  %v9633_v39 = vld [vmem:[#allocation5 + $0x968] ss:$16 sps:$4 sm:$0xff]   ;;  %v9638_v41 = vld [vmem:[#allocation5 + $0x86c] ss:$16 sps:$4 sm:$0xff]  }
 0x198   :  { %2266 = vmatpush2.bf16.msra.mxu0 %v9579_v40  ;;  %v9636_v40 = vld [vmem:[#allocation5 + $0x868] ss:$16 sps:$4 sm:$0xff]  }
 0x199   :  { %2303 = vmatpush1.bf16.msra.mxu1 %v9582_v34  ;;  %2267 = vmatprep.subr.bf16.mxu0 %v9587_v42  ;;  %v9641_v34 = vld [vmem:[#allocation5 + $0x94c] ss:$16 sps:$4 sm:$0xff]   ;;  %v9639_v42 = vld [vmem:[#allocation5 + $0x948] ss:$16 sps:$4 sm:$0xff]  }
 0x19a   :  { %2304 = vmatprep.subr.bf16.mxu1 %v9590_v30  ;;  %v9647_v30 = vld [vmem:[#allocation5 + $0x92c] ss:$16 sps:$4 sm:$0xff]  }
 0x19c   :  { %2268 = vmatpush2.bf16.msra.mxu0 %v9585_v23  ;;  %v9644_v23 = vld [vmem:[#allocation5 + $0x84c] ss:$16 sps:$4 sm:$0xff]  }
 0x19d   :  { %2305 = vmatpush1.bf16.msra.mxu1 %v9588_v43  ;;  %2269 = vmatprep.subr.bf16.mxu0 %v9593_v25  ;;  %v9645_v43 = vld [vmem:[#allocation5 + $0x928] ss:$16 sps:$4 sm:$0xff]   ;;  %v9650_v25 = vld [vmem:[#allocation5 + $0x82c] ss:$16 sps:$4 sm:$0xff]  }
 0x19e   :  { %2306 = vmatprep.subr.bf16.mxu1 %v9596_v26  ;;  %v9653_v26 = vld [vmem:[#allocation5 + $0x90c] ss:$16 sps:$4 sm:$0xff]  }
 0x1a0   :  { %2270 = vmatpush2.bf16.msra.mxu0 %v9591_v46  ;;  %v9648_v46 = vld [vmem:[#allocation5 + $0x828] ss:$16 sps:$4 sm:$0xff]  }
 0x1a1   :  { %2307 = vmatpush1.bf16.msra.mxu1 %v9594_v49  ;;  %2271 = vmatprep.subr.bf16.mxu0 %v9599_v58  ;;  %v9651_v49 = vld [vmem:[#allocation5 + $0x908] ss:$16 sps:$4 sm:$0xff]   ;;  %v9656_v58 = vld [vmem:[#allocation5 + $0x80c] ss:$16 sps:$4 sm:$0xff]  }
 0x1a2   :  { %2308 = vmatprep.subr.bf16.mxu1 %v9602_v44  ;;  %v9659_v44 = vld [vmem:[#allocation5 + $0x2e4] ss:$16 sps:$4 sm:$0xff]  }
 0x1a4   :  { %2272 = vmatpush2.bf16.msra.mxu0 %v9597_v59  ;;  %v9654_v59 = vld [vmem:[#allocation5 + $0x808] ss:$16 sps:$4 sm:$0xff]  }
 0x1a5   :  { %2309 = vmatpush1.bf16.msra.mxu1 %v9600_v61  ;;  %2273 = vmatprep.subr.bf16.mxu0 %v9605_v62  ;;  %v9657_v61 = vld [vmem:[#allocation5 + $0x2e0] ss:$16 sps:$4 sm:$0xff]   ;;  %v9662_v62 = vld [vmem:[#allocation5 + $0xe4] ss:$16 sps:$4 sm:$0xff]  }
 0x1a6   :  { %2310 = vmatprep.subr.bf16.mxu1 %v9608_v1  ;;  %v9665_v1 = vld [vmem:[#allocation5 + $0x2c4] ss:$16 sps:$4 sm:$0xff]  }
 0x1a8   :  { %2274 = vmatpush2.bf16.msra.mxu0 %v9603_v0  ;;  %v9660_v0 = vld [vmem:[#allocation5 + $0xe0] ss:$16 sps:$4 sm:$0xff]  }
 0x1a9   :  { %2311 = vmatpush1.bf16.msra.mxu1 %v9606_v5  ;;  %2349 = vmatprep.subr.bf16.mxu0 %v9611_v21  ;;  %v9668_v5 = vld [vmem:[#allocation5 + $0xc4] ss:$16 sps:$4 sm:$0xff]   ;;  %v9663_v21 = vld [vmem:[#allocation5 + $0x2c0] ss:$16 sps:$4 sm:$0xff]  }
 0x1aa   :  { %2312 = vmatprep.subr.bf16.mxu1 %v9614_v9  ;;  %v9671_v9 = vld [vmem:[#allocation5 + $0x2a4] ss:$16 sps:$4 sm:$0xff]  }
 0x1ab   :  { %2276 = vmatmul.mubr.bf16.vlgmr.msra.gmra.mxu0 %v10821_v45  ;;  %v9630_v45 = vld [vmem:[#allocation5 + $0x888] ss:$16 sps:$4 sm:$0xff]  }
 0x1ac   :  { %2285 = vmatprep.mubr.bf16.mxu0 %v10836_v51  ;;  %2350 = vmatpush1.bf16.msra.mxu0 %v9609_v7  ;;  %v9635_v51 = vld [vmem:[#allocation5 + $0x96c] ss:$16 sps:$4 sm:$0xff]   ;;  %v9666_v7 = vld [vmem:[#allocation5 + $0xc0] ss:$16 sps:$4 sm:$0xff]  }
 0x1ad   :  { %2313 = vmatpush2.bf16.msra.mxu1 %v9612_v18  ;;  %2351 = vmatprep.subr.bf16.mxu0 %v9617_v12  ;;  %v9674_v18 = vld [vmem:[#allocation5 + $0xa4] ss:$16 sps:$4 sm:$0xff]   ;;  %v9669_v12 = vld [vmem:[#allocation5 + $0x2a0] ss:$16 sps:$4 sm:$0xff]  }
 0x1ae   :  { %2314 = vmatprep.subr.bf16.mxu1 %v9620_v22  ;;  %v9677_v22 = vld [vmem:[#allocation5 + $0x284] ss:$16 sps:$4 sm:$0xff]  }
 0x1b0   :  { %2352 = vmatpush1.bf16.msra.mxu0 %v9615_v13  ;;  %v9672_v13 = vld [vmem:[#allocation5 + $0xa0] ss:$16 sps:$4 sm:$0xff]  }
 0x1b1   :  { %2315 = vmatpush2.bf16.msra.mxu1 %v9618_v20  ;;  %2353 = vmatprep.subr.bf16.mxu0 %v9623_v27  ;;  %v9683_v20 = vld [vmem:[#allocation5 + $0x264] ss:$16 sps:$4 sm:$0xff]  }
 0x1b2   :  { %2316 = vmatprep.subr.bf16.mxu1 %v9626_v32  ;;  %v9686_v27 = vld [vmem:[#allocation5 + $0x64] ss:$16 sps:$4 sm:$0xff]   ;;  %v9684_v32 = vld [vmem:[#allocation5 + $0x60] ss:$16 sps:$4 sm:$0xff]  }
 0x1b3   :  { %2286 = vmatmul.mubr.bf16.gmra.mxu0 %v10849_v10  ;;  %v9642_v10 = vld [vmem:[#allocation5 + $0x848] ss:$16 sps:$4 sm:$0xff]  }
 0x1b4   :  { %2354 = vmatpush1.bf16.msra.mxu0 %v9621_v33  ;;  %2381 = vmatprep.mubr.bf16.mxu0 %v11622_v35  ;;  %v9681_v33 = vld [vmem:[#allocation5 + $0x260] ss:$16 sps:$4 sm:$0xff]  }
 0x1b5   :  { %2317 = vmatpush2.bf16.msra.mxu1 %v9624_v37  ;;  %2355 = vmatprep.subr.bf16.mxu0 %v9629_v28  ;;  %v9689_v37 = vld [vmem:[#allocation5 + $0x244] ss:$16 sps:$4 sm:$0xff]  }
 0x1b6   :  { %2318 = vmatprep.subr.bf16.mxu1 %v9632_v38  ;;  %v9692_v28 = vld [vmem:[#allocation5 + $0x44] ss:$16 sps:$4 sm:$0xff]   ;;  %v9693_v38 = vld [vmem:[#allocation5 + $0x220] ss:$16 sps:$4 sm:$0xff]  }
 0x1b8   :  { %2356 = vmatpush1.bf16.msra.mxu0 %v9627_v3  ;;  %v9695_v3 = vld [vmem:[#allocation5 + $0x224] ss:$16 sps:$4 sm:$0xff]  }
 0x1b9   :  { %2319 = vmatpush2.bf16.msra.mxu1 %v9630_v45  ;;  %2357 = vmatprep.subr.bf16.mxu0 %v9635_v51  ;;  %v9698_v45 = vld [vmem:[#allocation5 + $0x24] ss:$16 sps:$4 sm:$0xff]   ;;  %v9696_v51 = vld [vmem:[#allocation5 + $0x20] ss:$16 sps:$4 sm:$0xff]  }
 0x1ba   :  { %2320 = vmatprep.subr.bf16.mxu1 %v9638_v41  ;;  %v9699_v41 = vld [vmem:[#allocation5 + $0x200] ss:$16 sps:$4 sm:$0xff]  }
 0x1bc   :  { %2358 = vmatpush1.bf16.msra.mxu0 %v9633_v39  ;;  %v9701_v39 = vld [vmem:[#allocation5 + $0x204] ss:$16 sps:$4 sm:$0xff]  }
 0x1bd   :  { %2321 = vmatpush2.bf16.msra.mxu1 %v9636_v40  ;;  %2359 = vmatprep.subr.bf16.mxu0 %v9641_v34  ;;  %v9704_v40 = vld [vmem:[#allocation5 + $0x4] ss:$16 sps:$4 sm:$0xff]   ;;  %v9702_v34 = vld [vmem:[#allocation5] ss:$16 sps:$4 sm:$0xff]  }
 0x1be   :  { %2322 = vmatprep.subr.bf16.mxu1 %v9644_v23  ;;  %v9705_v23 = vld [vmem:[#allocation5 + $0x3e0] ss:$16 sps:$4 sm:$0xff]  }
 0x1c0   :  { %2360 = vmatpush1.bf16.msra.mxu0 %v9639_v42  ;;  %v9707_v42 = vld [vmem:[#allocation5 + $0x3e4] ss:$16 sps:$4 sm:$0xff]  }
 0x1c1   :  { %2323 = vmatpush2.bf16.msra.mxu1 %v9642_v10  ;;  %2361 = vmatprep.subr.bf16.mxu0 %v9647_v30  ;;  %v9710_v10 = vld [vmem:[#allocation5 + $0x1e4] ss:$16 sps:$4 sm:$0xff]   ;;  %v9708_v30 = vld [vmem:[#allocation5 + $0x1e0] ss:$16 sps:$4 sm:$0xff]  }
 0x1c2   :  { %2324 = vmatprep.subr.bf16.mxu1 %v9650_v25  ;;  %v9716_v25 = vld [vmem:[#allocation5 + $0x1c4] ss:$16 sps:$4 sm:$0xff]  }
 0x1c4   :  { %2362 = vmatpush1.bf16.msra.mxu0 %v9645_v43  ;;  %v9713_v43 = vld [vmem:[#allocation5 + $0x3c4] ss:$16 sps:$4 sm:$0xff]  }
 0x1c5   :  { %2325 = vmatpush2.bf16.msra.mxu1 %v9648_v46  ;;  %2363 = vmatprep.subr.bf16.mxu0 %v9653_v26  ;;  %v9711_v46 = vld [vmem:[#allocation5 + $0x3c0] ss:$16 sps:$4 sm:$0xff]  }
 0x1c6   :  { %2326 = vmatprep.subr.bf16.mxu1 %v9656_v58  ;;  %v9714_v26 = vld [vmem:[#allocation5 + $0x1c0] ss:$16 sps:$4 sm:$0xff]   ;;  %v9722_v58 = vld [vmem:[#allocation5 + $0x1a4] ss:$16 sps:$4 sm:$0xff]  }
 0x1c8   :  { %2364 = vmatpush1.bf16.msra.mxu0 %v9651_v49  ;;  %v9719_v49 = vld [vmem:[#allocation5 + $0x3a4] ss:$16 sps:$4 sm:$0xff]  }
 0x1c9   :  { %2327 = vmatpush2.bf16.msra.mxu1 %v9654_v59  ;;  %3255 = vmatprep.subr.bf16.mxu0 %v9659_v44  ;;  %v9717_v59 = vld [vmem:[#allocation5 + $0x3a0] ss:$16 sps:$4 sm:$0xff]  }
 0x1ca   :  { %3202 = vmatprep.subr.bf16.mxu1 %v9662_v62  ;;  %v9720_v44 = vld [vmem:[#allocation5 + $0x1a0] ss:$16 sps:$4 sm:$0xff]   ;;  %v9728_v62 = vld [vmem:[#allocation5 + $0x184] ss:$16 sps:$4 sm:$0xff]  }
 0x1cb   :  { %2382 = vmatmul.mubr.bf16.vlgmr.msra.gmra.mxu0 %v10924_v16  ;;  %v9680_v16 = vld [vmem:[#allocation5 + $0x84] ss:$16 sps:$4 sm:$0xff]  }
 0x1cc   :  { %2329 = vmatmul.mubr.bf16.vlgmr.msra.gmra.mxu1 %v10832_v50  ;;  %3256 = vmatpush1.bf16.msra.mxu0 %v9657_v61  ;;  %v9675_v50 = vld [vmem:[#allocation5 + $0x280] ss:$16 sps:$4 sm:$0xff]   ;;  %v9725_v61 = vld [vmem:[#allocation5 + $0x384] ss:$16 sps:$4 sm:$0xff]  }
 0x1cd   :  { %2338 = vmatprep.mubr.bf16.mxu1 %v10842_v57  ;;  %3203 = vmatpush1.bf16.msra.mxu1 %v9660_v0  ;;  %v9678_v57 = vld [vmem:[#allocation5 + $0x80] ss:$16 sps:$4 sm:$0xff]  }
 0x1ce   :  { %3257 = vmatprep.subr.bf16.mxu0 %v9665_v1  ;;  %3204 = vmatprep.subr.bf16.mxu1 %v9668_v5  ;;  %v9723_v0 = vld [vmem:[#allocation5 + $0x380] ss:$16 sps:$4 sm:$0xff]   ;;  %v9731_v5 = vld [vmem:[#allocation5 + $0x364] ss:$16 sps:$4 sm:$0xff]  }
 0x1cf   :  { %2391 = vmatprep.mubr.bf16.mxu0 %v11622_v35  ;;  %v9726_v1 = vld [vmem:[#allocation5 + $0x180] ss:$16 sps:$4 sm:$0xff]  }
 0x1d0   :  { %3258 = vmatpush1.bf16.msra.mxu0 %v9663_v21  ;;  %v9734_v21 = vld [vmem:[#allocation5 + $0x164] ss:$16 sps:$4 sm:$0xff]  }
 0x1d1   :  { %3205 = vmatpush1.bf16.msra.mxu1 %v9666_v7  ;;  %3259 = vmatprep.subr.bf16.mxu0 %v9671_v9  ;;  %v9729_v7 = vld [vmem:[#allocation5 + $0x360] ss:$16 sps:$4 sm:$0xff]  }
 0x1d2   :  { %3206 = vmatprep.subr.bf16.mxu1 %v9674_v18  ;;  %v9732_v9 = vld [vmem:[#allocation5 + $0x160] ss:$16 sps:$4 sm:$0xff]   ;;  %v9737_v18 = vld [vmem:[#allocation5 + $0x344] ss:$16 sps:$4 sm:$0xff]  }
 0x1d3   :  { %2392 = vmatmul.mubr.bf16.gmra.mxu0 %v10937_v4  ;;  %v9690_v4 = vld [vmem:[#allocation5 + $0x40] ss:$16 sps:$4 sm:$0xff]  }
 0x1d4   :  { %2339 = vmatmul.mubr.bf16.gmra.mxu1 %v10854_v14  ;;  %3260 = vmatpush1.bf16.msra.mxu0 %v9669_v12  ;;  %v9687_v14 = vld [vmem:[#allocation5 + $0x240] ss:$16 sps:$4 sm:$0xff]  }
 0x1d5   :  { %3287 = vmatprep.mubr.bf16.mxu0 %v10769_v56  ;;  %3207 = vmatpush1.bf16.msra.mxu1 %v9672_v13  ;;  %v9735_v12 = vld [vmem:[#allocation5 + $0x340] ss:$16 sps:$4 sm:$0xff]   ;;  %v9740_v13 = vld [vmem:[#allocation5 + $0x144] ss:$16 sps:$4 sm:$0xff]  }
 0x1d6   :  { %3234 = vmatprep.mubr.bf16.mxu1 %v10763_v48  ;;  %3261 = vmatprep.subr.bf16.mxu0 %v9677_v22  ;;  %v9738_v22 = vld [vmem:[#allocation5 + $0x140] ss:$16 sps:$4 sm:$0xff]  }
 0x1d7   :  { %3208 = vmatprep.subr.bf16.mxu1 %v9680_v16  ;;  %v9743_v16 = vld [vmem:[#allocation5 + $0x324] ss:$16 sps:$4 sm:$0xff]  }
 0x1d8   :  { %3262 = vmatpush1.bf16.msra.mxu0 %v9675_v50  ;;  %v9741_v50 = vld [vmem:[#allocation5 + $0x320] ss:$16 sps:$4 sm:$0xff]  }
 0x1d9   :  { %3209 = vmatpush1.bf16.msra.mxu1 %v9678_v57  ;;  %3263 = vmatprep.subr.bf16.mxu0 %v9683_v20  ;;  %v9746_v57 = vld [vmem:[#allocation5 + $0x124] ss:$16 sps:$4 sm:$0xff]   ;;  %v9744_v20 = vld [vmem:[#allocation5 + $0x120] ss:$16 sps:$4 sm:$0xff]  }
 0x1da   :  { %3210 = vmatprep.subr.bf16.mxu1 %v9686_v27  ;;  %v9749_v27 = vld [vmem:[#allocation5 + $0x304] ss:$16 sps:$4 sm:$0xff]  }
 0x1dc   :  { %3264 = vmatpush1.bf16.msra.mxu0 %v9681_v33  ;;  %v9747_v33 = vld [vmem:[#allocation5 + $0x300] ss:$16 sps:$4 sm:$0xff]  }
 0x1dd   :  { %3211 = vmatpush1.bf16.msra.mxu1 %v9684_v32  ;;  %3265 = vmatprep.subr.bf16.mxu0 %v9689_v37  ;;  %v9752_v32 = vld [vmem:[#allocation5 + $0x104] ss:$16 sps:$4 sm:$0xff]   ;;  %v9750_v37 = vld [vmem:[#allocation5 + $0x100] ss:$16 sps:$4 sm:$0xff]  }
 0x1de   :  { %3212 = vmatprep.subr.bf16.mxu1 %v9692_v28  ;;  %v9755_v28 = vld [vmem:[#allocation5 + $0xec] ss:$16 sps:$4 sm:$0xff]  }
 0x1e0   :  { %3266 = vmatpush1.bf16.msra.mxu0 %v9687_v14  ;;  %v9758_v14 = vld [vmem:[#allocation5 + $0x4e4] ss:$16 sps:$4 sm:$0xff]  }
 0x1e1   :  { %3213 = vmatpush1.bf16.msra.mxu1 %v9690_v4  ;;  %3267 = vmatprep.subr.bf16.mxu0 %v9695_v3  ;;  %v9753_v4 = vld [vmem:[#allocation5 + $0xe8] ss:$16 sps:$4 sm:$0xff]   ;;  %v9756_v3 = vld [vmem:[#allocation5 + $0x4e0] ss:$16 sps:$4 sm:$0xff]  }
 0x1e2   :  { %3214 = vmatprep.subr.bf16.mxu1 %v9698_v45  ;;  %v9759_v45 = vld [vmem:[#allocation5 + $0xc8] ss:$16 sps:$4 sm:$0xff]  }
 0x1e4   :  { %3268 = vmatpush1.bf16.msra.mxu0 %v9693_v38  ;;  %v9761_v38 = vld [vmem:[#allocation5 + $0xcc] ss:$16 sps:$4 sm:$0xff]  }
 0x1e5   :  { %3215 = vmatpush1.bf16.msra.mxu1 %v9696_v51  ;;  %3269 = vmatprep.subr.bf16.mxu0 %v9701_v39  ;;  %v9764_v51 = vld [vmem:[#allocation5 + $0x4c4] ss:$16 sps:$4 sm:$0xff]   ;;  %v9762_v39 = vld [vmem:[#allocation5 + $0x4c0] ss:$16 sps:$4 sm:$0xff]  }
 0x1e6   :  { %3216 = vmatprep.subr.bf16.mxu1 %v9704_v40  ;;  %v9765_v40 = vld [vmem:[#allocation5 + $0xa8] ss:$16 sps:$4 sm:$0xff]  }
 0x1e8   :  { %3270 = vmatpush1.bf16.msra.mxu0 %v9699_v41  ;;  %v9767_v41 = vld [vmem:[#allocation5 + $0xac] ss:$16 sps:$4 sm:$0xff]  }
 0x1e9   :  { %3217 = vmatpush1.bf16.msra.mxu1 %v9702_v34  ;;  %3271 = vmatprep.subr.bf16.mxu0 %v9707_v42  ;;  %v9770_v34 = vld [vmem:[#allocation5 + $0x4a4] ss:$16 sps:$4 sm:$0xff]   ;;  %v9768_v42 = vld [vmem:[#allocation5 + $0x4a0] ss:$16 sps:$4 sm:$0xff]  }
 0x1ea   :  { %3218 = vmatprep.subr.bf16.mxu1 %v9710_v10  ;;  %v9771_v10 = vld [vmem:[#allocation5 + $0x88] ss:$16 sps:$4 sm:$0xff]  }
 0x1ec   :  { %3272 = vmatpush2.bf16.msra.mxu0 %v9705_v23  ;;  %v9773_v23 = vld [vmem:[#allocation5 + $0x8c] ss:$16 sps:$4 sm:$0xff]  }
 0x1ed   :  { %3219 = vmatpush2.bf16.msra.mxu1 %v9708_v30  ;;  %3273 = vmatprep.subr.bf16.mxu0 %v9713_v43  ;;  %v9776_v30 = vld [vmem:[#allocation5 + $0x484] ss:$16 sps:$4 sm:$0xff]   ;;  %v9774_v43 = vld [vmem:[#allocation5 + $0x480] ss:$16 sps:$4 sm:$0xff]  }
 0x1ee   :  { %3220 = vmatprep.subr.bf16.mxu1 %v9716_v25  ;;  %v9779_v25 = vld [vmem:[#allocation5 + $0x6c] ss:$16 sps:$4 sm:$0xff]  }
 0x1f0   :  { %3274 = vmatpush2.bf16.msra.mxu0 %v9711_v46  ;;  %v9777_v46 = vld [vmem:[#allocation5 + $0x68] ss:$16 sps:$4 sm:$0xff]  }
 0x1f1   :  { %3221 = vmatpush2.bf16.msra.mxu1 %v9714_v26  ;;  %3275 = vmatprep.subr.bf16.mxu0 %v9719_v49  ;;  %v9782_v26 = vld [vmem:[#allocation5 + $0x464] ss:$16 sps:$4 sm:$0xff]   ;;  %v9780_v49 = vld [vmem:[#allocation5 + $0x460] ss:$16 sps:$4 sm:$0xff]  }
 0x1f2   :  { %3222 = vmatprep.subr.bf16.mxu1 %v9722_v58  ;;  %v9785_v58 = vld [vmem:[#allocation5 + $0x4c] ss:$16 sps:$4 sm:$0xff]  }
 0x1f4   :  { %3276 = vmatpush2.bf16.msra.mxu0 %v9717_v59  ;;  %v9788_v59 = vld [vmem:[#allocation5 + $0x444] ss:$16 sps:$4 sm:$0xff]  }
 0x1f5   :  { %3223 = vmatpush2.bf16.msra.mxu1 %v9720_v44  ;;  %3277 = vmatprep.subr.bf16.mxu0 %v9725_v61  ;;  %v9783_v44 = vld [vmem:[#allocation5 + $0x48] ss:$16 sps:$4 sm:$0xff]   ;;  %v9786_v61 = vld [vmem:[#allocation5 + $0x440] ss:$16 sps:$4 sm:$0xff]  }
 0x1f6   :  { %3224 = vmatprep.subr.bf16.mxu1 %v9728_v62  ;;  %v9791_v62 = vld [vmem:[#allocation5 + $0x2c] ss:$16 sps:$4 sm:$0xff]  }
 0x1f8   :  { %3278 = vmatpush2.bf16.msra.mxu0 %v9723_v0  ;;  %v9789_v0 = vld [vmem:[#allocation5 + $0x28] ss:$16 sps:$4 sm:$0xff]  }
 0x1f9   :  { %3225 = vmatpush2.bf16.msra.mxu1 %v9726_v1  ;;  %3279 = vmatprep.subr.bf16.mxu0 %v9731_v5  ;;  %v9794_v1 = vld [vmem:[#allocation5 + $0x424] ss:$16 sps:$4 sm:$0xff]   ;;  %v9792_v5 = vld [vmem:[#allocation5 + $0x420] ss:$16 sps:$4 sm:$0xff]  }
 0x1fa   :  { %3226 = vmatprep.subr.bf16.mxu1 %v9734_v21  ;;  %v9797_v21 = vld [vmem:[#allocation5 + $0xc] ss:$16 sps:$4 sm:$0xff]  }
 0x1fc   :  { %3280 = vmatpush2.bf16.msra.mxu0 %v9729_v7  ;;  %v9795_v7 = vld [vmem:[#allocation5 + $0x8] ss:$16 sps:$4 sm:$0xff]  }
 0x1fd   :  { %3227 = vmatpush2.bf16.msra.mxu1 %v9732_v9  ;;  %3281 = vmatprep.subr.bf16.mxu0 %v9737_v18  ;;  %v9800_v9 = vld [vmem:[#allocation5 + $0x404] ss:$16 sps:$4 sm:$0xff]   ;;  %v9798_v18 = vld [vmem:[#allocation5 + $0x400] ss:$16 sps:$4 sm:$0xff]  }
 0x1fe   :  { %3228 = vmatprep.subr.bf16.mxu1 %v9740_v13  ;;  %v9801_v13 = vld [vmem:[#allocation5 + $0x1e8] ss:$16 sps:$4 sm:$0xff]  }
 0x200   :  { %3282 = vmatpush2.bf16.msra.mxu0 %v9735_v12  ;;  %v9803_v12 = vld [vmem:[#allocation5 + $0x1ec] ss:$16 sps:$4 sm:$0xff]  }
 0x201   :  { %3229 = vmatpush2.bf16.msra.mxu1 %v9738_v22  ;;  %3283 = vmatprep.subr.bf16.mxu0 %v9743_v16  ;;  %v9806_v22 = vld [vmem:[#allocation5 + $0x2ec] ss:$16 sps:$4 sm:$0xff]   ;;  %v9804_v16 = vld [vmem:[#allocation5 + $0x2e8] ss:$16 sps:$4 sm:$0xff]  }
 0x202   :  { %3230 = vmatprep.subr.bf16.mxu1 %v9746_v57  ;;  %v9812_v57 = vld [vmem:[#allocation5 + $0x2cc] ss:$16 sps:$4 sm:$0xff]  }
 0x204   :  { %3284 = vmatpush2.bf16.msra.mxu0 %v9741_v50  ;;  %v9809_v50 = vld [vmem:[#allocation5 + $0x1cc] ss:$16 sps:$4 sm:$0xff]  }
 0x205   :  { %3231 = vmatpush2.bf16.msra.mxu1 %v9744_v20  ;;  %3285 = vmatprep.subr.bf16.mxu0 %v9749_v27 }
 0x206   :  { %3232 = vmatprep.subr.bf16.mxu1 %v9752_v32 }
 0x208   :  { %3286 = vmatpush2.bf16.msra.mxu0 %v9747_v33 }
 0x209   :  { %3233 = vmatpush2.bf16.msra.mxu1 %v9750_v37  ;;  %3361 = vmatprep.subr.bf16.mxu0 %v9755_v28  ;;  %v9807_v37 = vld [vmem:[#allocation5 + $0x1c8] ss:$16 sps:$4 sm:$0xff]  }
 0x20a   :  { %3308 = vmatprep.subr.bf16.mxu1 %v9758_v14  ;;  %v9810_v14 = vld [vmem:[#allocation5 + $0x2c8] ss:$16 sps:$4 sm:$0xff]  }
 0x20b   :  { %3288 = vmatmul.mubr.bf16.vlgmr.msra.gmra.mxu0 %v10767_v54 }
 0x20c   :  { %3235 = vmatmul.mubr.bf16.vlgmr.msra.gmra.mxu1 %v10765_v53  ;;  %3297 = vmatprep.mubr.bf16.mxu0 %v10785_v19 }
 0x20d   :  { %3362 = vmatpush1.bf16.msra.mxu0 %v9753_v4  ;;  %3244 = vmatprep.mubr.bf16.mxu1 %v10781_v15  ;;  %v9815_v4 = vld [vmem:[#allocation5 + $0x1ac] ss:$16 sps:$4 sm:$0xff]  }
 0x20e   :  { %3309 = vmatpush1.bf16.msra.mxu1 %v9756_v3  ;;  %3363 = vmatprep.subr.bf16.mxu0 %v9761_v38 }
 0x20f   :  { %3310 = vmatprep.subr.bf16.mxu1 %v9764_v51  ;;  %v9813_v51 = vld [vmem:[#allocation5 + $0x1a8] ss:$16 sps:$4 sm:$0xff]  }
 0x211   :  { %3364 = vmatpush1.bf16.msra.mxu0 %v9759_v45 }
 0x212   :  { %3311 = vmatpush1.bf16.msra.mxu1 %v9762_v39  ;;  %3365 = vmatprep.subr.bf16.mxu0 %v9767_v41  ;;  %v9818_v39 = vld [vmem:[#allocation5 + $0x2ac] ss:$16 sps:$4 sm:$0xff]  }
 0x213   :  { %3298 = vmatmul.mubr.bf16.gmra.mxu0 %v10776_v11  ;;  %3312 = vmatprep.subr.bf16.mxu1 %v9770_v34  ;;  %v9816_v34 = vld [vmem:[#allocation5 + $0x2a8] ss:$16 sps:$4 sm:$0xff]  }
 0x214   :  { %3245 = vmatmul.mubr.bf16.gmra.mxu1 %v10774_v8  ;;  %3393 = vmatprep.mubr.bf16.mxu0 %v10763_v48 }
 0x215   :  { %3366 = vmatpush1.bf16.msra.mxu0 %v9765_v40  ;;  %3340 = vmatprep.mubr.bf16.mxu1 %v11622_v35 }
 0x216   :  { %3313 = vmatpush1.bf16.msra.mxu1 %v9768_v42  ;;  %3367 = vmatprep.subr.bf16.mxu0 %v9773_v23  ;;  %v9821_v23 = vld [vmem:[#allocation5 + $0x18c] ss:$16 sps:$4 sm:$0xff]  }
 0x217   :  { %3314 = vmatprep.subr.bf16.mxu1 %v9776_v30 }
 0x219   :  { %3368 = vmatpush1.bf16.msra.mxu0 %v9771_v10  ;;  %v9824_v10 = vld [vmem:[#allocation5 + $0x28c] ss:$16 sps:$4 sm:$0xff]  }
 0x21a   :  { %3315 = vmatpush1.bf16.msra.mxu1 %v9774_v43  ;;  %3369 = vmatprep.subr.bf16.mxu0 %v9779_v25 }
 0x21b   :  { %3316 = vmatprep.subr.bf16.mxu1 %v9782_v26  ;;  %v9819_v26 = vld [vmem:[#allocation5 + $0x188] ss:$16 sps:$4 sm:$0xff]  }
 0x21d   :  { %3370 = vmatpush1.bf16.msra.mxu0 %v9777_v46 }
 0x21e   :  { %3317 = vmatpush1.bf16.msra.mxu1 %v9780_v49  ;;  %3371 = vmatprep.subr.bf16.mxu0 %v9785_v58  ;;  %v9822_v58 = vld [vmem:[#allocation5 + $0x288] ss:$16 sps:$4 sm:$0xff]  }
 0x21f   :  { %3318 = vmatprep.subr.bf16.mxu1 %v9788_v59  ;;  %v9827_v59 = vld [vmem:[#allocation5 + $0x16c] ss:$16 sps:$4 sm:$0xff]  }
 0x221   :  { %3372 = vmatpush1.bf16.msra.mxu0 %v9783_v44 }
 0x222   :  { %3319 = vmatpush1.bf16.msra.mxu1 %v9786_v61  ;;  %3373 = vmatprep.subr.bf16.mxu0 %v9791_v62 }
 0x223   :  { %3320 = vmatprep.subr.bf16.mxu1 %v9794_v1  ;;  %v9830_v1 = vld [vmem:[#allocation5 + $0x26c] ss:$16 sps:$4 sm:$0xff]  }
 0x225   :  { %3374 = vmatpush1.bf16.msra.mxu0 %v9789_v0  ;;  %v9825_v0 = vld [vmem:[#allocation5 + $0x168] ss:$16 sps:$4 sm:$0xff]  }
 0x226   :  { %3321 = vmatpush1.bf16.msra.mxu1 %v9792_v5  ;;  %3375 = vmatprep.subr.bf16.mxu0 %v9797_v21  ;;  %v9828_v21 = vld [vmem:[#allocation5 + $0x268] ss:$16 sps:$4 sm:$0xff]  }
 0x227   :  { %3322 = vmatprep.subr.bf16.mxu1 %v9800_v9  ;;  %v9831_v9 = vld [vmem:[#allocation5 + $0x148] ss:$16 sps:$4 sm:$0xff]  }
 0x229   :  { %3376 = vmatpush1.bf16.msra.mxu0 %v9795_v7  ;;  %v9833_v7 = vld [vmem:[#allocation5 + $0x14c] ss:$16 sps:$4 sm:$0xff]  }
 0x22a   :  { %3323 = vmatpush1.bf16.msra.mxu1 %v9798_v18  ;;  %3377 = vmatprep.subr.bf16.mxu0 %v9803_v12  ;;  %v2118_v20 = vpop.f32.mrf.mxu1  ;;  %v9836_v18 = vld [vmem:[#allocation5 + $0x24c] ss:$16 sps:$4 sm:$0xff]   ;;  %v9834_v12 = vld [vmem:[#allocation5 + $0x248] ss:$16 sps:$4 sm:$0xff]  }
 0x22b   :  { %v2171_v27 = vpop.f32.mrf.mxu0  ;;  %3414 = vmatprep.subr.bf16.mxu1 %v9806_v22  ;;  %v9837_v22 = vld [vmem:[#allocation5 + $0x128] ss:$16 sps:$4 sm:$0xff]  }
 0x22c   :  { %v10961_v33 = vadd.f32 %v2171_v27, %v2118_v20  ;;  %v2120_v32 = vpop.f32.mrf.mxu1  ;;  %v9843_v20 = vld [vmem:[#allocation5 + $0x108] ss:$16 sps:$4 sm:$0xff]   ;;  %v9848_v27 = vld [vmem:[#allocation5 + $0x20c] ss:$16 sps:$4 sm:$0xff]  }
 0x22d   :  { %3341 = vmatmul.mubr.bf16.vlgmr.msra.gmra.mxu1 %v10908_v17  ;;  %3378 = vmatpush2.bf16.msra.mxu0 %v9801_v13  ;;  %v2173_v28 = vpop.f32.mrf.mxu0  ;;  %v9839_v13 = vld [vmem:[#allocation5 + $0x12c] ss:$16 sps:$4 sm:$0xff]  }
 0x22e   :  { %3415 = vmatpush1.bf16.msra.mxu1 %v9804_v16  ;;  %v10964_v3 = vadd.f32 %v2173_v28, %v2120_v32  ;;  %3379 = vmatprep.subr.bf16.mxu0 %v9809_v50  ;;  %v2122_v38 = vpop.f32.mrf.mxu1  ;;  %v9842_v16 = vld [vmem:[#allocation5 + $0x22c] ss:$16 sps:$4 sm:$0xff]   ;;  %v9840_v50 = vld [vmem:[#allocation5 + $0x228] ss:$16 sps:$4 sm:$0xff]  }
 0x22f   :  { %v2175_v45 = vpop.f32.mrf.mxu0  ;;  %3416 = vmatprep.subr.bf16.mxu1 %v9812_v57  ;;  %3350 = vmatprep.mubr.bf16.mxu1 %v11622_v35  ;;  %v9845_v57 = vld [vmem:[#allocation5 + $0x10c] ss:$16 sps:$4 sm:$0xff]   ;;  %v9846_v32 = vld [vmem:[#allocation5 + $0x208] ss:$16 sps:$4 sm:$0xff]  }
 0x230   :  { %v10967_v41 = vadd.f32 %v2175_v45, %v2122_v38  ;;  %v10969_v40 = vpop.f32.mrf.mxu1  ;;  %v9849_v28 = vld [vmem:[#allocation5 + $0x4e8] ss:$16 sps:$4 sm:$0xff]   ;;  %v9857_v38 = vld [vmem:[#allocation5 + $0x4cc] ss:$16 sps:$4 sm:$0xff]  }
 0x231   :  { %3380 = vmatpush2.bf16.msra.mxu0 %v9807_v37  ;;  %v10971_v42 = vpop.f32.mrf.mxu0  ;;  %v9851_v37 = vld [vmem:[#allocation5 + $0x4ec] ss:$16 sps:$4 sm:$0xff]  }
 0x232   :  { %3417 = vmatpush1.bf16.msra.mxu1 %v9810_v14  ;;  %3381 = vmatprep.subr.bf16.mxu0 %v9815_v4  ;;  %v2128_v30 = vpop.f32.mrf.mxu1  ;;  %v9854_v14 = vld [vmem:[#allocation5 + $0x3ec] ss:$16 sps:$4 sm:$0xff]   ;;  %v9852_v4 = vld [vmem:[#allocation5 + $0x3e8] ss:$16 sps:$4 sm:$0xff]  }
 0x233   :  { %v2181_v43 = vpop.f32.mrf.mxu0  ;;  %3418 = vmatprep.subr.bf16.mxu1 %v9818_v39 }
 0x234   :  { %v10973_v25 = vadd.f32 %v2181_v43, %v2128_v30  ;;  %v2130_v46 = vpop.f32.mrf.mxu1  ;;  %v9858_v30 = vld [vmem:[#allocation5 + $0x3c8] ss:$16 sps:$4 sm:$0xff]   ;;  %v9863_v43 = vld [vmem:[#allocation5 + $0x4ac] ss:$16 sps:$4 sm:$0xff]  }
 0x235   :  { %3351 = vmatmul.mubr.bf16.gmra.mxu1 %v10919_v55  ;;  %3382 = vmatpush2.bf16.msra.mxu0 %v9813_v51  ;;  %v2183_v49 = vpop.f32.mrf.mxu0  ;;  %v9860_v51 = vld [vmem:[#allocation5 + $0x3cc] ss:$16 sps:$4 sm:$0xff]  }
 0x236   :  { %3419 = vmatpush1.bf16.msra.mxu1 %v9816_v34  ;;  %3446 = vmatprep.mubr.bf16.mxu1 %v10769_v56  ;;  %v10977_v44 = vadd.f32 %v2183_v49, %v2130_v46  ;;  %v2132_v61 = vpop.f32.mrf.mxu1 }
 0x237   :  { %3383 = vmatprep.subr.bf16.mxu0 %v9821_v23  ;;  %v2185_v62 = vpop.f32.mrf.mxu0  ;;  %3420 = vmatprep.subr.bf16.mxu1 %v9824_v10  ;;  %v9855_v23 = vld [vmem:[#allocation5 + $0x4c8] ss:$16 sps:$4 sm:$0xff]  }
 0x238   :  { %v10979_v5 = vadd.f32 %v2185_v62, %v2132_v61  ;;  %v10981_v45 = vpop.f32.mrf.mxu1  ;;  %v9864_v61 = vld [vmem:[#allocation5 + $0x3a8] ss:$16 sps:$4 sm:$0xff]   ;;  %v9869_v62 = vld [vmem:[#allocation5 + $0x48c] ss:$16 sps:$4 sm:$0xff]  }
 0x239   :  { %3384 = vmatpush2.bf16.msra.mxu0 %v9819_v26  ;;  %v9866_v26 = vld [vmem:[#allocation5 + $0x3ac] ss:$16 sps:$4 sm:$0xff]  }
 0x23a   :  { %3421 = vmatpush1.bf16.msra.mxu1 %v9822_v58  ;;  %3385 = vmatprep.subr.bf16.mxu0 %v9827_v59  ;;  %v9861_v59 = vld [vmem:[#allocation5 + $0x4a8] ss:$16 sps:$4 sm:$0xff]  }
 0x23b   :  { %3422 = vmatprep.subr.bf16.mxu1 %v9830_v1 }
 0x23d   :  { %3386 = vmatpush2.bf16.msra.mxu0 %v9825_v0  ;;  %v9872_v0 = vld [vmem:[#allocation5 + $0x38c] ss:$16 sps:$4 sm:$0xff]  }
 0x23e   :  { %3423 = vmatpush1.bf16.msra.mxu1 %v9828_v21  ;;  %3387 = vmatprep.subr.bf16.mxu0 %v9833_v7  ;;  %v9867_v21 = vld [vmem:[#allocation5 + $0x488] ss:$16 sps:$4 sm:$0xff]  }
 0x23f   :  { %3424 = vmatprep.subr.bf16.mxu1 %v9836_v18  ;;  %v9870_v7 = vld [vmem:[#allocation5 + $0x388] ss:$16 sps:$4 sm:$0xff]  }
 0x241   :  { %3388 = vmatpush2.bf16.msra.mxu0 %v9831_v9  ;;  %v9875_v9 = vld [vmem:[#allocation5 + $0x46c] ss:$16 sps:$4 sm:$0xff]  }
 0x242   :  { %3425 = vmatpush1.bf16.msra.mxu1 %v9834_v12  ;;  %3389 = vmatprep.subr.bf16.mxu0 %v9839_v13  ;;  %v9878_v12 = vld [vmem:[#allocation5 + $0x36c] ss:$16 sps:$4 sm:$0xff]  }
 0x243   :  { %3426 = vmatprep.subr.bf16.mxu1 %v9842_v16  ;;  %v9876_v16 = vld [vmem:[#allocation5 + $0x368] ss:$16 sps:$4 sm:$0xff]  }
 0x245   :  { %3390 = vmatpush2.bf16.msra.mxu0 %v9837_v22 }
 0x246   :  { %3427 = vmatpush1.bf16.msra.mxu1 %v9840_v50  ;;  %3391 = vmatprep.subr.bf16.mxu0 %v9845_v57  ;;  %v9881_v50 = vld [vmem:[#allocation5 + $0x44c] ss:$16 sps:$4 sm:$0xff]  }
 0x247   :  { %3428 = vmatprep.subr.bf16.mxu1 %v9848_v27  ;;  %v9884_v57 = vld [vmem:[#allocation5 + $0x34c] ss:$16 sps:$4 sm:$0xff]  }
 0x248   :  { %v9887_v27 = vld [vmem:[#allocation5 + $0x42c] ss:$16 sps:$4 sm:$0xff]  }
 0x249   :  { %3392 = vmatpush2.bf16.msra.mxu0 %v9843_v20  ;;  %v9879_v20 = vld [vmem:[#allocation5 + $0x448] ss:$16 sps:$4 sm:$0xff]  }
 0x24a   :  { %3429 = vmatpush1.bf16.msra.mxu1 %v9846_v32  ;;  %3467 = vmatprep.subr.bf16.mxu0 %v9851_v37  ;;  %v9890_v32 = vld [vmem:[#allocation5 + $0x32c] ss:$16 sps:$4 sm:$0xff]   ;;  %v9885_v37 = vld [vmem:[#allocation5 + $0x428] ss:$16 sps:$4 sm:$0xff]  }
 0x24b   :  { %3430 = vmatprep.subr.bf16.mxu1 %v9854_v14  ;;  %v9896_v14 = vld [vmem:[#allocation5 + $0x30c] ss:$16 sps:$4 sm:$0xff]  }
 0x24c   :  { %3394 = vmatmul.mubr.bf16.vlgmr.msra.gmra.mxu0 %v10765_v53  ;;  %v2224_v39 = vpop.f32.mrf.mxu1 }
 0x24d   :  { %3403 = vmatprep.mubr.bf16.mxu0 %v10781_v15  ;;  %3468 = vmatpush1.bf16.msra.mxu0 %v9849_v28  ;;  %v10986_v34 = vadd.f32 %v2224_v39, %v10961_v33  ;;  %v9893_v28 = vld [vmem:[#allocation5 + $0x40c] ss:$16 sps:$4 sm:$0xff]   ;;  %v9902_v39 = vld [vmem:[#allocation5 + $0xae4] ss:$16 sps:$4 sm:$0xff]  }
 0x24e   :  { %3431 = vmatpush2.bf16.msra.mxu1 %v9852_v4  ;;  %v2226_v10 = vpop.f32.mrf.mxu1  ;;  %3469 = vmatprep.subr.bf16.mxu0 %v9857_v38  ;;  %v9891_v4 = vld [vmem:[#allocation5 + $0x408] ss:$16 sps:$4 sm:$0xff]  }
 0x24f   :  { %v10989_v46 = vadd.f32 %v2226_v10, %v10964_v3  ;;  %3432 = vmatprep.subr.bf16.mxu1 %v9860_v51  ;;  %v9894_v38 = vld [vmem:[#allocation5 + $0x308] ss:$16 sps:$4 sm:$0xff]   ;;  %v9899_v51 = vld [vmem:[#allocation5 + $0xce4] ss:$16 sps:$4 sm:$0xff]   ;;  %v9900_v10 = vld [vmem:[#allocation5 + $0xae0] ss:$16 sps:$4 sm:$0xff]  }
 0x250   :  { %v2228_v49 = vpop.f32.mrf.mxu1 }
 0x251   :  { %3470 = vmatpush1.bf16.msra.mxu0 %v9855_v23  ;;  %v10992_v58 = vadd.f32 %v2228_v49, %v10967_v41  ;;  %v9897_v23 = vld [vmem:[#allocation5 + $0xce0] ss:$16 sps:$4 sm:$0xff]  }
 0x252   :  { %3433 = vmatpush2.bf16.msra.mxu1 %v9858_v30  ;;  %v10994_v33 = vpop.f32.mrf.mxu1  ;;  %3471 = vmatprep.subr.bf16.mxu0 %v9863_v43  ;;  %v11007_v30 = vpop.f32.mrf.mxu0  ;;  %v9905_v43 = vld [vmem:[#allocation5 + $0xcc4] ss:$16 sps:$4 sm:$0xff]  }
 0x253   :  { %3434 = vmatprep.subr.bf16.mxu1 %v9866_v26  ;;  %v9908_v26 = vld [vmem:[#allocation5 + $0xac4] ss:$16 sps:$4 sm:$0xff]  }
 0x254   :  { %3404 = vmatmul.mubr.bf16.gmra.mxu0 %v10774_v8  ;;  %v2234_v3 = vpop.f32.mrf.mxu1 }
 0x255   :  { %3472 = vmatpush1.bf16.msra.mxu0 %v9861_v59  ;;  %v10998_v1 = vadd.f32 %v2234_v3, %v10973_v25  ;;  %3499 = vmatprep.mubr.bf16.mxu0 %v11622_v35  ;;  %v9873_v25 = vld [vmem:[#allocation5 + $0x468] ss:$16 sps:$4 sm:$0xff]   ;;  %v9903_v59 = vld [vmem:[#allocation5 + $0xcc0] ss:$16 sps:$4 sm:$0xff]  }
 0x256   :  { %3435 = vmatpush2.bf16.msra.mxu1 %v9864_v61  ;;  %v2236_v41 = vpop.f32.mrf.mxu1  ;;  %3473 = vmatprep.subr.bf16.mxu0 %v9869_v62  ;;  %v9906_v61 = vld [vmem:[#allocation5 + $0xac0] ss:$16 sps:$4 sm:$0xff]   ;;  %v9911_v62 = vld [vmem:[#allocation5 + $0xca4] ss:$16 sps:$4 sm:$0xff]  }
 0x257   :  { %v11002_v18 = vadd.f32 %v2236_v41, %v10977_v44  ;;  %3436 = vmatprep.subr.bf16.mxu1 %v9872_v0  ;;  %v9882_v44 = vld [vmem:[#allocation5 + $0x348] ss:$16 sps:$4 sm:$0xff]   ;;  %v9914_v0 = vld [vmem:[#allocation5 + $0xaa4] ss:$16 sps:$4 sm:$0xff]   ;;  %v11626_v41 = vrot.slane %v10785_v19, 4 }
 0x258   :  { %v2238_v13 = vpop.f32.mrf.mxu1 }
 0x259   :  { %3474 = vmatpush1.bf16.msra.mxu0 %v9867_v21  ;;  %v11005_v22 = vadd.f32 %v2238_v13, %v10979_v5  ;;  %v9888_v5 = vld [vmem:[#allocation5 + $0x328] ss:$16 sps:$4 sm:$0xff]   ;;  %v9909_v21 = vld [vmem:[#allocation5 + $0xca0] ss:$16 sps:$4 sm:$0xff]   ;;  %v9917_v13 = vld [vmem:[#allocation5 + $0xc84] ss:$16 sps:$4 sm:$0xff]  }
 0x25a   :  { %3437 = vmatpush2.bf16.msra.mxu1 %v9870_v7  ;;  %3475 = vmatprep.subr.bf16.mxu0 %v9875_v9  ;;  %v9912_v7 = vld [vmem:[#allocation5 + $0xaa0] ss:$16 sps:$4 sm:$0xff]   ;;  %v11624_v9 = vrot.slane %v10781_v15, 4 }
 0x25b   :  { %3438 = vmatprep.subr.bf16.mxu1 %v9878_v12  ;;  %v3540_v12 = vrot.slane %v10769_v56, 4  ;;  %v9999_v56 = vld [vmem:[#allocation5 + $0xac8] ss:$16 sps:$4 sm:$0xff]  }
 0x25d   :  { %3476 = vmatpush1.bf16.msra.mxu0 %v9873_v25  ;;  %v11625_v25 = vrot.slane %v10763_v48, 4 }
 0x25e   :  { %3439 = vmatpush2.bf16.msra.mxu1 %v9876_v16  ;;  %3477 = vmatprep.subr.bf16.mxu0 %v9881_v50  ;;  %v9920_v16 = vld [vmem:[#allocation5 + $0xa84] ss:$16 sps:$4 sm:$0xff]  }
 0x25f   :  { %3440 = vmatprep.subr.bf16.mxu1 %v9884_v57  ;;  %v11030_v57 = vsel %vm3530_vm3, %v3540_v12, %v11626_v41 }
 0x261   :  { %3478 = vmatpush1.bf16.msra.mxu0 %v9879_v20  ;;  %v9915_v20 = vld [vmem:[#allocation5 + $0xc80] ss:$16 sps:$4 sm:$0xff]  }
 0x262   :  { %3441 = vmatpush2.bf16.msra.mxu1 %v9882_v44  ;;  %3479 = vmatprep.subr.bf16.mxu0 %v9887_v27  ;;  %v11038_v44 = vsel %vm3530_vm3, %v11625_v25, %v11624_v9  ;;  %v9918_v27 = vld [vmem:[#allocation5 + $0xa80] ss:$16 sps:$4 sm:$0xff]   ;;  %v9974_v9 = vld [vmem:[#allocation5 + $0xb64] ss:$16 sps:$4 sm:$0xff]  }
 0x263   :  { %3442 = vmatprep.subr.bf16.mxu1 %v9890_v32  ;;  %v9923_v32 = vld [vmem:[#allocation5 + $0xc64] ss:$16 sps:$4 sm:$0xff]  }
 0x265   :  { %3480 = vmatpush1.bf16.msra.mxu0 %v9885_v37  ;;  %v9926_v37 = vld [vmem:[#allocation5 + $0xa64] ss:$16 sps:$4 sm:$0xff]  }
 0x266   :  { %3443 = vmatpush2.bf16.msra.mxu1 %v9888_v5  ;;  %3481 = vmatprep.subr.bf16.mxu0 %v9893_v28  ;;  %v9921_v28 = vld [vmem:[#allocation5 + $0xc60] ss:$16 sps:$4 sm:$0xff]  }
 0x267   :  { %3444 = vmatprep.subr.bf16.mxu1 %v9896_v14  ;;  %v9924_v14 = vld [vmem:[#allocation5 + $0xa60] ss:$16 sps:$4 sm:$0xff]  }
 0x269   :  { %3482 = vmatpush1.bf16.msra.mxu0 %v9891_v4  ;;  %v9929_v4 = vld [vmem:[#allocation5 + $0xc44] ss:$16 sps:$4 sm:$0xff]  }
 0x26a   :  { %3445 = vmatpush2.bf16.msra.mxu1 %v9894_v38  ;;  %4586 = vmatprep.subr.bf16.mxu0 %v9899_v51  ;;  %v9932_v38 = vld [vmem:[#allocation5 + $0xa44] ss:$16 sps:$4 sm:$0xff]  }
 0x26b   :  { %4533 = vmatprep.subr.bf16.mxu1 %v9902_v39  ;;  %v11010_v49 = vpop.f32.mrf.mxu0  ;;  %v9927_v39 = vld [vmem:[#allocation5 + $0xc40] ss:$16 sps:$4 sm:$0xff]  }
 0x26c   :  { %3500 = vmatmul.mubr.bf16.vlgmr.msra.gmra.mxu0 %v10908_v17 }
 0x26d   :  { %3447 = vmatmul.mubr.bf16.vlgmr.msra.gmra.mxu1 %v10767_v54  ;;  %4587 = vmatpush1.bf16.msra.mxu0 %v9897_v23  ;;  %v11015_v3 = vpop.f32.mrf.mxu0  ;;  %v9930_v23 = vld [vmem:[#allocation5 + $0xa40] ss:$16 sps:$4 sm:$0xff]  }
 0x26e   :  { %3456 = vmatprep.mubr.bf16.mxu1 %v10785_v19  ;;  %4534 = vmatpush1.bf16.msra.mxu1 %v9900_v10  ;;  %v9935_v10 = vld [vmem:[#allocation5 + $0xc24] ss:$16 sps:$4 sm:$0xff]  }
 0x26f   :  { %4588 = vmatprep.subr.bf16.mxu0 %v9905_v43  ;;  %4535 = vmatprep.subr.bf16.mxu1 %v9908_v26  ;;  %v11022_v50 = vpop.f32.mrf.mxu0  ;;  %v9938_v43 = vld [vmem:[#allocation5 + $0xa24] ss:$16 sps:$4 sm:$0xff]  }
 0x270   :  { %3509 = vmatprep.mubr.bf16.mxu0 %v11622_v35 }
 0x271   :  { %4589 = vmatpush1.bf16.msra.mxu0 %v9903_v59  ;;  %v11041_v5 = vpop.f32.mrf.mxu0  ;;  %v9933_v59 = vld [vmem:[#allocation5 + $0xc20] ss:$16 sps:$4 sm:$0xff]  }
 0x272   :  { %4536 = vmatpush1.bf16.msra.mxu1 %v9906_v61  ;;  %4590 = vmatprep.subr.bf16.mxu0 %v9911_v62  ;;  %v9936_v61 = vld [vmem:[#allocation5 + $0xa20] ss:$16 sps:$4 sm:$0xff]   ;;  %v9941_v62 = vld [vmem:[#allocation5 + $0xc04] ss:$16 sps:$4 sm:$0xff]  }
 0x273   :  { %4537 = vmatprep.subr.bf16.mxu1 %v9914_v0  ;;  %v11043_v51 = vpop.f32.mrf.mxu0  ;;  %v9944_v0 = vld [vmem:[#allocation5 + $0xa04] ss:$16 sps:$4 sm:$0xff]  }
 0x274   :  { %3510 = vmatmul.mubr.bf16.gmra.mxu0 %v10919_v55 }
 0x275   :  { %3457 = vmatmul.mubr.bf16.gmra.mxu1 %v10776_v11  ;;  %4591 = vmatpush1.bf16.msra.mxu0 %v9909_v21  ;;  %v11045_v26 = vpop.f32.mrf.mxu0 }
 0x276   :  { %4618 = vmatprep.mubr.bf16.mxu0 %v11030_v57  ;;  %4538 = vmatpush1.bf16.msra.mxu1 %v9912_v7  ;;  %v9939_v7 = vld [vmem:[#allocation5 + $0xc00] ss:$16 sps:$4 sm:$0xff]  }
 0x277   :  { %4565 = vmatprep.mubr.bf16.mxu1 %v11038_v44  ;;  %4592 = vmatprep.subr.bf16.mxu0 %v9917_v13  ;;  %v11047_v21 = vpop.f32.mrf.mxu0  ;;  %v9942_v13 = vld [vmem:[#allocation5 + $0xa00] ss:$16 sps:$4 sm:$0xff]  }
 0x278   :  { %4539 = vmatprep.subr.bf16.mxu1 %v9920_v16  ;;  %v9947_v16 = vld [vmem:[#allocation5 + $0xde4] ss:$16 sps:$4 sm:$0xff]  }
 0x279   :  { %4593 = vmatpush1.bf16.msra.mxu0 %v9915_v20  ;;  %v9950_v20 = vld [vmem:[#allocation5 + $0xbe4] ss:$16 sps:$4 sm:$0xff]  }
 0x27a   :  { %4540 = vmatpush1.bf16.msra.mxu1 %v9918_v27  ;;  %4594 = vmatprep.subr.bf16.mxu0 %v9923_v32  ;;  %v11049_v27 = vpop.f32.mrf.mxu0  ;;  %v9945_v32 = vld [vmem:[#allocation5 + $0xde0] ss:$16 sps:$4 sm:$0xff]  }
 0x27b   :  { %4541 = vmatprep.subr.bf16.mxu1 %v9926_v37  ;;  %v11051_v37 = vpop.f32.mrf.mxu1 }
 0x27d   :  { %4595 = vmatpush1.bf16.msra.mxu0 %v9921_v28  ;;  %v9948_v28 = vld [vmem:[#allocation5 + $0xbe0] ss:$16 sps:$4 sm:$0xff]  }
 0x27e   :  { %4542 = vmatpush1.bf16.msra.mxu1 %v9924_v14  ;;  %4596 = vmatprep.subr.bf16.mxu0 %v9929_v4  ;;  %v9953_v14 = vld [vmem:[#allocation5 + $0xdc4] ss:$16 sps:$4 sm:$0xff]  }
 0x27f   :  { %4543 = vmatprep.subr.bf16.mxu1 %v9932_v38  ;;  %v9956_v38 = vld [vmem:[#allocation5 + $0xbc4] ss:$16 sps:$4 sm:$0xff]  }
 0x281   :  { %4597 = vmatpush1.bf16.msra.mxu0 %v9927_v39 }
 0x282   :  { %4544 = vmatpush1.bf16.msra.mxu1 %v9930_v23  ;;  %4598 = vmatprep.subr.bf16.mxu0 %v9935_v10 }
 0x283   :  { %4545 = vmatprep.subr.bf16.mxu1 %v9938_v43  ;;  %v9951_v43 = vld [vmem:[#allocation5 + $0xdc0] ss:$16 sps:$4 sm:$0xff]  }
 0x285   :  { %4599 = vmatpush1.bf16.msra.mxu0 %v9933_v59 }
 0x286   :  { %4546 = vmatpush1.bf16.msra.mxu1 %v9936_v61  ;;  %4600 = vmatprep.subr.bf16.mxu0 %v9941_v62  ;;  %v9954_v61 = vld [vmem:[#allocation5 + $0xbc0] ss:$16 sps:$4 sm:$0xff]   ;;  %v9959_v62 = vld [vmem:[#allocation5 + $0xda4] ss:$16 sps:$4 sm:$0xff]  }
 0x287   :  { %4547 = vmatprep.subr.bf16.mxu1 %v9944_v0 }
 0x289   :  { %4601 = vmatpush1.bf16.msra.mxu0 %v9939_v7 }
 0x28a   :  { %4548 = vmatpush1.bf16.msra.mxu1 %v9942_v13  ;;  %4602 = vmatprep.subr.bf16.mxu0 %v9947_v16  ;;  %v9962_v13 = vld [vmem:[#allocation5 + $0xba4] ss:$16 sps:$4 sm:$0xff]  }
 0x28b   :  { %v2383_v4 = vpop.f32.mrf.mxu0  ;;  %4549 = vmatprep.subr.bf16.mxu1 %v9950_v20 }
 0x28c   :  { %v2330_v39 = vpop.f32.mrf.mxu1 }
 0x28d   :  { %v2331_v23 = vadd.f32 %v2330_v39, %v11010_v49  ;;  %4603 = vmatpush2.bf16.msra.mxu0 %v9945_v32  ;;  %v2385_v10 = vpop.f32.mrf.mxu0  ;;  %v9957_v32 = vld [vmem:[#allocation5 + $0xda0] ss:$16 sps:$4 sm:$0xff]  }
 0x28e   :  { %4550 = vmatpush2.bf16.msra.mxu1 %v9948_v28  ;;  %v2332_v59 = vpop.f32.mrf.mxu1  ;;  %4604 = vmatprep.subr.bf16.mxu0 %v9953_v14  ;;  %v9960_v14 = vld [vmem:[#allocation5 + $0xba0] ss:$16 sps:$4 sm:$0xff]  }
 0x28f   :  { %v2333_v0 = vadd.f32 %v2332_v59, %v11015_v3  ;;  %v2387_v7 = vpop.f32.mrf.mxu0  ;;  %4551 = vmatprep.subr.bf16.mxu1 %v9956_v38  ;;  %v11055_v16 = vadd.f32 %v2383_v4, %v2331_v23  ;;  %v9965_v3 = vld [vmem:[#allocation5 + $0xd84] ss:$16 sps:$4 sm:$0xff]  }
 0x290   :  { %v2334_v20 = vpop.f32.mrf.mxu1  ;;  %v9968_v38 = vld [vmem:[#allocation5 + $0xb84] ss:$16 sps:$4 sm:$0xff]  }
 0x291   :  { %v2335_v35 = vadd.f32 %v2334_v20, %v11022_v50  ;;  %4605 = vmatpush2.bf16.msra.mxu0 %v9951_v43  ;;  %v11058_v49 = vpop.f32.mrf.mxu0  ;;  %v11060_v39 = vadd.f32 %v2385_v10, %v2333_v0  ;;  %v9963_v20 = vld [vmem:[#allocation5 + $0xd80] ss:$16 sps:$4 sm:$0xff]   ;;  %v9971_v0 = vld [vmem:[#allocation5 + $0xd64] ss:$16 sps:$4 sm:$0xff]  }
 0x292   :  { %4552 = vmatpush2.bf16.msra.mxu1 %v9954_v61  ;;  %v11062_v28 = vpop.f32.mrf.mxu1  ;;  %4606 = vmatprep.subr.bf16.mxu0 %v9959_v62  ;;  %v9966_v61 = vld [vmem:[#allocation5 + $0xb80] ss:$16 sps:$4 sm:$0xff]  }
 0x293   :  { %v2393_v59 = vpop.f32.mrf.mxu0  ;;  %4553 = vmatprep.subr.bf16.mxu1 %v9962_v13  ;;  %v11064_v4 = vadd.f32 %v2387_v7, %v2335_v35 }
 0x294   :  { %v2340_v23 = vpop.f32.mrf.mxu1 }
 0x295   :  { %v2341_v50 = vadd.f32 %v2340_v23, %v11043_v51  ;;  %4607 = vmatpush2.bf16.msra.mxu0 %v9957_v32  ;;  %v2395_v43 = vpop.f32.mrf.mxu0  ;;  %v9969_v51 = vld [vmem:[#allocation5 + $0xd60] ss:$16 sps:$4 sm:$0xff]   ;;  %v9977_v23 = vld [vmem:[#allocation5 + $0xd44] ss:$16 sps:$4 sm:$0xff]  }
 0x296   :  { %4554 = vmatpush2.bf16.msra.mxu1 %v9960_v14  ;;  %v2342_v10 = vpop.f32.mrf.mxu1  ;;  %4608 = vmatprep.subr.bf16.mxu0 %v9965_v3  ;;  %v9972_v3 = vld [vmem:[#allocation5 + $0xb60] ss:$16 sps:$4 sm:$0xff]  }
 0x297   :  { %v2343_v62 = vadd.f32 %v2342_v10, %v11045_v26  ;;  %4555 = vmatprep.subr.bf16.mxu1 %v9968_v38  ;;  %v11068_v25 = vadd.f32 %v2393_v59, %v2341_v50  ;;  %v2397_v13 = vpop.f32.mrf.mxu0  ;;  %v9980_v26 = vld [vmem:[#allocation5 + $0xb44] ss:$16 sps:$4 sm:$0xff]   ;;  %v9975_v50 = vld [vmem:[#allocation5 + $0xd40] ss:$16 sps:$4 sm:$0xff]  }
 0x298   :  { %v2344_v35 = vpop.f32.mrf.mxu1 }
 0x299   :  { %v2345_v7 = vadd.f32 %v2344_v35, %v11047_v21  ;;  %4609 = vmatpush2.bf16.msra.mxu0 %v9963_v20  ;;  %v11071_v32 = vadd.f32 %v2395_v43, %v2343_v62  ;;  %v2399_v59 = vpop.f32.mrf.mxu0  ;;  %v9978_v21 = vld [vmem:[#allocation5 + $0xb40] ss:$16 sps:$4 sm:$0xff]   ;;  %v9983_v43 = vld [vmem:[#allocation5 + $0xd24] ss:$16 sps:$4 sm:$0xff]   ;;  %v3538_v35 = vrot.slane %v10776_v11, 4 }
 0x29a   :  { %4556 = vmatpush2.bf16.msra.mxu1 %v9966_v61  ;;  %v2346_v14 = vpop.f32.mrf.mxu1  ;;  %4610 = vmatprep.subr.bf16.mxu0 %v9971_v0  ;;  %v9986_v20 = vld [vmem:[#allocation5 + $0xb24] ss:$16 sps:$4 sm:$0xff]   ;;  %v9981_v61 = vld [vmem:[#allocation5 + $0xd20] ss:$16 sps:$4 sm:$0xff]  }
 0x29b   :  { %v2347_v41 = vadd.f32 %v2346_v14, %v11049_v27  ;;  %4557 = vmatprep.subr.bf16.mxu1 %v9974_v9  ;;  %v11074_v38 = vadd.f32 %v2397_v13, %v2345_v7  ;;  %v9984_v27 = vld [vmem:[#allocation5 + $0xb20] ss:$16 sps:$4 sm:$0xff]   ;;  %v9989_v9 = vld [vmem:[#allocation5 + $0xd04] ss:$16 sps:$4 sm:$0xff]   ;;  %v9995_v13 = vld [vmem:[#allocation5 + $0xaec] ss:$16 sps:$4 sm:$0xff]  }
 0x29c   :  { %v9992_v0 = vld [vmem:[#allocation5 + $0xb04] ss:$16 sps:$4 sm:$0xff]   ;;  %v9987_v62 = vld [vmem:[#allocation5 + $0xd00] ss:$16 sps:$4 sm:$0xff]   ;;  %v3537_v14 = vrot.slane %v10767_v54, 4  ;;  %v11631_v54 = vrot.slane %v10785_v19, 4 }
 0x29d   :  { %4611 = vmatpush2.bf16.msra.mxu0 %v9969_v51  ;;  %v11076_v10 = vadd.f32 %v2399_v59, %v2347_v41  ;;  %v9990_v41 = vld [vmem:[#allocation5 + $0xb00] ss:$16 sps:$4 sm:$0xff]   ;;  %v9998_v7 = vld [vmem:[#allocation5 + $0xee4] ss:$16 sps:$4 sm:$0xff]   ;;  %v3532_v51 = vrot.slane %v10774_v8, 4 }
 0x29e   :  { %4558 = vmatpush2.bf16.msra.mxu1 %v9972_v3  ;;  %4612 = vmatprep.subr.bf16.mxu0 %v9977_v23  ;;  %v9993_v3 = vld [vmem:[#allocation5 + $0xae8] ss:$16 sps:$4 sm:$0xff]   ;;  %v3531_v23 = vrot.slane %v10765_v53, 4  ;;  %v9996_v59 = vld [vmem:[#allocation5 + $0xee0] ss:$16 sps:$4 sm:$0xff]   ;;  %v11094_v8 = vsel %vm3530_vm3, %v11631_v54, %v3540_v12  ;;  %v11632_v53 = vrot.slane %v10763_v48, 4  ;;  %v11107_v48 = vsel %vm3530_vm3, %v3538_v35, %v3537_v14 }
 0x29f   :  { %4559 = vmatprep.subr.bf16.mxu1 %v9980_v26  ;;  %v11083_v26 = vsel %vm3530_vm3, %v3537_v14, %v3538_v35  ;;  %v10002_v19 = vld [vmem:[#allocation5 + $0xec0] ss:$16 sps:$4 sm:$0xff]   ;;  %v10007_v12 = vld [vmem:[#allocation5 + $0xaac] ss:$16 sps:$4 sm:$0xff]   ;;  %v10022_v14 = vld [vmem:[#allocation5 + $0xe64] ss:$16 sps:$4 sm:$0xff]  }
 0x2a0   :  { %v11087_v11 = vsel %vm3530_vm3, %v3531_v23, %v3532_v51  ;;  %v10014_v35 = vld [vmem:[#allocation5 + $0xe80] ss:$16 sps:$4 sm:$0xff]   ;;  %v10031_v54 = vld [vmem:[#allocation5 + $0xa2c] ss:$16 sps:$4 sm:$0xff]  }
 0x2a1   :  { %4613 = vmatpush2.bf16.msra.mxu0 %v9975_v50  ;;  %v10001_v50 = vld [vmem:[#allocation5 + $0xacc] ss:$16 sps:$4 sm:$0xff]  }
 0x2a2   :  { %4560 = vmatpush2.bf16.msra.mxu1 %v9978_v21  ;;  %4614 = vmatprep.subr.bf16.mxu0 %v9983_v43  ;;  %v10004_v21 = vld [vmem:[#allocation5 + $0xec4] ss:$16 sps:$4 sm:$0xff]   ;;  %v11633_v43 = vrot.slane %v10781_v15, 4  ;;  %v10008_v15 = vld [vmem:[#allocation5 + $0xea0] ss:$16 sps:$4 sm:$0xff]  }
 0x2a3   :  { %4561 = vmatprep.subr.bf16.mxu1 %v9986_v20 }
 0x2a4   :  { %v11103_v20 = vsel %vm3530_vm3, %v11633_v43, %v11632_v53  ;;  %v10029_v53 = vld [vmem:[#allocation5 + $0xa28] ss:$16 sps:$4 sm:$0xff]   ;;  %v10032_v43 = vld [vmem:[#allocation5 + $0xe20] ss:$16 sps:$4 sm:$0xff]  }
 0x2a5   :  { %4615 = vmatpush2.bf16.msra.mxu0 %v9981_v61  ;;  %v10010_v61 = vld [vmem:[#allocation5 + $0xea4] ss:$16 sps:$4 sm:$0xff]  }
 0x2a6   :  { %4562 = vmatpush2.bf16.msra.mxu1 %v9984_v27  ;;  %4616 = vmatprep.subr.bf16.mxu0 %v9989_v9  ;;  %v10005_v27 = vld [vmem:[#allocation5 + $0xaa8] ss:$16 sps:$4 sm:$0xff]   ;;  %v10013_v9 = vld [vmem:[#allocation5 + $0xa8c] ss:$16 sps:$4 sm:$0xff]  }
 0x2a7   :  { %4563 = vmatprep.subr.bf16.mxu1 %v9992_v0  ;;  %v11111_v0 = vsel %vm3530_vm3, %v3532_v51, %v3531_v23  ;;  %v10020_v51 = vld [vmem:[#allocation5 + $0xe60] ss:$16 sps:$4 sm:$0xff]   ;;  %v10025_v23 = vld [vmem:[#allocation5 + $0xa4c] ss:$16 sps:$4 sm:$0xff]  }
 0x2a9   :  { %4617 = vmatpush2.bf16.msra.mxu0 %v9987_v62  ;;  %v10016_v62 = vld [vmem:[#allocation5 + $0xe84] ss:$16 sps:$4 sm:$0xff]  }
 0x2aa   :  { %4564 = vmatpush2.bf16.msra.mxu1 %v9990_v41  ;;  %4692 = vmatprep.subr.bf16.mxu0 %v9995_v13  ;;  %v10011_v41 = vld [vmem:[#allocation5 + $0xa88] ss:$16 sps:$4 sm:$0xff]   ;;  %v11634_v13 = vmov 0  }
 0x2ab   :  { %4639 = vmatprep.subr.bf16.mxu1 %v9998_v7  ;;  %v10019_v7 = vld [vmem:[#allocation5 + $0xa6c] ss:$16 sps:$4 sm:$0xff]  }
 0x2ac   :  { %4619 = vmatmul.mubr.bf16.vlgmr.msra.gmra.mxu0 %v11083_v26 }
 0x2ad   :  { %4566 = vmatmul.mubr.bf16.vlgmr.msra.gmra.mxu1 %v11087_v11  ;;  %4628 = vmatprep.mubr.bf16.mxu0 %v11094_v8 }
 0x2ae   :  { %4693 = vmatpush1.bf16.msra.mxu0 %v9993_v3  ;;  %4575 = vmatprep.mubr.bf16.mxu1 %v11103_v20  ;;  %v10017_v3 = vld [vmem:[#allocation5 + $0xa68] ss:$16 sps:$4 sm:$0xff]  }
 0x2af   :  { %4640 = vmatpush1.bf16.msra.mxu1 %v9996_v59  ;;  %4694 = vmatprep.subr.bf16.mxu0 %v10001_v50  ;;  %v10028_v59 = vld [vmem:[#allocation5 + $0xe44] ss:$16 sps:$4 sm:$0xff]   ;;  %v10026_v50 = vld [vmem:[#allocation5 + $0xe40] ss:$16 sps:$4 sm:$0xff]  }
 0x2b0   :  { %4641 = vmatprep.subr.bf16.mxu1 %v10004_v21  ;;  %v10034_v21 = vld [vmem:[#allocation5 + $0xe24] ss:$16 sps:$4 sm:$0xff]  }
 0x2b2   :  { %4695 = vmatpush1.bf16.msra.mxu0 %v9999_v56  ;;  %v10037_v56 = vld [vmem:[#allocation5 + $0xa0c] ss:$16 sps:$4 sm:$0xff]  }
 0x2b3   :  { %4642 = vmatpush1.bf16.msra.mxu1 %v10002_v19  ;;  %4696 = vmatprep.subr.bf16.mxu0 %v10007_v12  ;;  %v10040_v19 = vld [vmem:[#allocation5 + $0xe04] ss:$16 sps:$4 sm:$0xff]   ;;  %v10035_v12 = vld [vmem:[#allocation5 + $0xa08] ss:$16 sps:$4 sm:$0xff]  }
 0x2b4   :  { %4629 = vmatmul.mubr.bf16.gmra.mxu0 %v11107_v48  ;;  %4643 = vmatprep.subr.bf16.mxu1 %v10010_v61  ;;  %v10038_v61 = vld [vmem:[#allocation5 + $0xe00] ss:$16 sps:$4 sm:$0xff]  }
 0x2b5   :  { %4576 = vmatmul.mubr.bf16.gmra.mxu1 %v11111_v0  ;;  %4724 = vmatprep.mubr.bf16.mxu0 %v11038_v44  ;;  %v10023_v44 = vld [vmem:[#allocation5 + $0xa48] ss:$16 sps:$4 sm:$0xff]  }
 0x2b6   :  { %4697 = vmatpush1.bf16.msra.mxu0 %v10005_v27  ;;  %4671 = vmatprep.mubr.bf16.mxu1 %v11634_v13  ;;  %v10043_v27 = vld [vmem:[#allocation5 + $0xbec] ss:$16 sps:$4 sm:$0xff]  }
 0x2b7   :  { %4644 = vmatpush1.bf16.msra.mxu1 %v10008_v15  ;;  %4698 = vmatprep.subr.bf16.mxu0 %v10013_v9  ;;  %v10046_v15 = vld [vmem:[#allocation5 + $0xcec] ss:$16 sps:$4 sm:$0xff]   ;;  %v3544_v9 = vrot.slane %v10919_v55, 4 }
 0x2b8   :  { %4645 = vmatprep.subr.bf16.mxu1 %v10016_v62  ;;  %v10041_v62 = vld [vmem:[#allocation5 + $0xbe8] ss:$16 sps:$4 sm:$0xff]  }
 0x2ba   :  { %4699 = vmatpush1.bf16.msra.mxu0 %v10011_v41 }
 0x2bb   :  { %4646 = vmatpush1.bf16.msra.mxu1 %v10014_v35  ;;  %4700 = vmatprep.subr.bf16.mxu0 %v10019_v7  ;;  %v3543_v35 = vrot.slane %v10908_v17, 4  ;;  %v10044_v7 = vld [vmem:[#allocation5 + $0xce8] ss:$16 sps:$4 sm:$0xff]  }
 0x2bc   :  { %4647 = vmatprep.subr.bf16.mxu1 %v10022_v14  ;;  %v10049_v14 = vld [vmem:[#allocation5 + $0xbcc] ss:$16 sps:$4 sm:$0xff]  }
 0x2be   :  { %4701 = vmatpush1.bf16.msra.mxu0 %v10017_v3 }
 0x2bf   :  { %4648 = vmatpush1.bf16.msra.mxu1 %v10020_v51  ;;  %4702 = vmatprep.subr.bf16.mxu0 %v10025_v23  ;;  %v10052_v51 = vld [vmem:[#allocation5 + $0xccc] ss:$16 sps:$4 sm:$0xff]  }
 0x2c0   :  { %4649 = vmatprep.subr.bf16.mxu1 %v10028_v59  ;;  %v11120_v59 = vsel %vm3530_vm3, %v3543_v35, %v3544_v9 }
 0x2c2   :  { %4703 = vmatpush1.bf16.msra.mxu0 %v10023_v44 }
 0x2c3   :  { %4650 = vmatpush1.bf16.msra.mxu1 %v10026_v50  ;;  %4704 = vmatprep.subr.bf16.mxu0 %v10031_v54  ;;  %v10047_v50 = vld [vmem:[#allocation5 + $0xbc8] ss:$16 sps:$4 sm:$0xff]   ;;  %v2178_v54 = vadd.f32 %v10971_v42, %v10969_v40 }
 0x2c4   :  { %4651 = vmatprep.subr.bf16.mxu1 %v10034_v21 }
 0x2c6   :  { %4705 = vmatpush1.bf16.msra.mxu0 %v10029_v53  ;;  %v10050_v53 = vld [vmem:[#allocation5 + $0xcc8] ss:$16 sps:$4 sm:$0xff]  }
 0x2c7   :  { %4652 = vmatpush1.bf16.msra.mxu1 %v10032_v43  ;;  %4706 = vmatprep.subr.bf16.mxu0 %v10037_v56  ;;  %v10055_v43 = vld [vmem:[#allocation5 + $0xbac] ss:$16 sps:$4 sm:$0xff]  }
 0x2c8   :  { %4653 = vmatprep.subr.bf16.mxu1 %v10040_v19  ;;  %v10058_v19 = vld [vmem:[#allocation5 + $0xcac] ss:$16 sps:$4 sm:$0xff]  }
 0x2ca   :  { %4707 = vmatpush1.bf16.msra.mxu0 %v10035_v12  ;;  %v2231_v12 = vadd.f32 %v10994_v33, %v2178_v54  ;;  %v2188_v54 = vadd.f32 %v11007_v30, %v10981_v45  ;;  %v10065_v30 = vld [vmem:[#allocation5 + $0xb68] ss:$16 sps:$4 sm:$0xff]  }
 0x2cb   :  { %4654 = vmatpush1.bf16.msra.mxu1 %v10038_v61  ;;  %v3289_v41 = vpop.f32.mrf.mxu0  ;;  %4708 = vmatprep.subr.bf16.mxu0 %v10043_v27 }
 0x2cc   :  { %v3236_v3 = vpop.f32.mrf.mxu1  ;;  %4745 = vmatprep.subr.bf16.mxu1 %v10046_v15 }
 0x2cd   :  { %v3237_v23 = vadd.f32 %v3236_v3, %v10986_v34  ;;  %v3291_v44 = vpop.f32.mrf.mxu0  ;;  %v10061_v3 = vld [vmem:[#allocation5 + $0xb8c] ss:$16 sps:$4 sm:$0xff]  }
 0x2ce   :  { %4672 = vmatmul.mubr.bf16.vlgmr.msra.gmra.mxu1 %v11120_v59  ;;  %4709 = vmatpush2.bf16.msra.mxu0 %v10041_v62  ;;  %v3238_v55 = vpop.f32.mrf.mxu1 }
 0x2cf   :  { %4746 = vmatpush1.bf16.msra.mxu1 %v10044_v7  ;;  %v3239_v17 = vadd.f32 %v3238_v55, %v10989_v46  ;;  %v3293_v21 = vpop.f32.mrf.mxu0  ;;  %4710 = vmatprep.subr.bf16.mxu0 %v10049_v14  ;;  %v11126_v34 = vadd.f32 %v3289_v41, %v3237_v23  ;;  %v10053_v46 = vld [vmem:[#allocation5 + $0xba8] ss:$16 sps:$4 sm:$0xff]  }
 0x2d0   :  { %v3240_v56 = vpop.f32.mrf.mxu1  ;;  %4747 = vmatprep.subr.bf16.mxu1 %v10052_v51  ;;  %4681 = vmatprep.mubr.bf16.mxu1 %v11634_v13  ;;  %v10056_v41 = vld [vmem:[#allocation5 + $0xca8] ss:$16 sps:$4 sm:$0xff]   ;;  %v10064_v51 = vld [vmem:[#allocation5 + $0xc8c] ss:$16 sps:$4 sm:$0xff]  }
 0x2d1   :  { %v3241_v61 = vadd.f32 %v3240_v56, %v10992_v58  ;;  %v3295_v27 = vpop.f32.mrf.mxu0  ;;  %v11131_v40 = vadd.f32 %v3291_v44, %v3239_v17  ;;  %v11137_v58 = vsel %vm3530_vm3, %v3544_v9, %v3543_v35  ;;  %v2241_v56 = vadd.f32 %v11051_v37, %v2188_v54  ;;  %v10071_v37 = vld [vmem:[#allocation5 + $0xb48] ss:$16 sps:$4 sm:$0xff]   ;;  %v10094_v54 = vld [vmem:[#allocation5 + $0xdec] ss:$16 sps:$4 sm:$0xff]  }
 0x2d2   :  { %4711 = vmatpush2.bf16.msra.mxu0 %v10047_v50  ;;  %v3242_v42 = vpop.f32.mrf.mxu1  ;;  %v10059_v50 = vld [vmem:[#allocation5 + $0xb88] ss:$16 sps:$4 sm:$0xff]   ;;  %vm6465_vm3 = vcmask 261120  }
 0x2d3   :  { %4748 = vmatpush1.bf16.msra.mxu1 %v10050_v53  ;;  %v3243_v15 = vadd.f32 %v3242_v42, %v2231_v12  ;;  %v3299_v62 = vpop.f32.mrf.mxu0  ;;  %4712 = vmatprep.subr.bf16.mxu0 %v10055_v43  ;;  %v11133_v7 = vadd.f32 %v3293_v21, %v3241_v61  ;;  %v10067_v21 = vld [vmem:[#allocation5 + $0xb6c] ss:$16 sps:$4 sm:$0xff]  }
 0x2d4   :  { %v3246_v14 = vpop.f32.mrf.mxu1  ;;  %4749 = vmatprep.subr.bf16.mxu1 %v10058_v19  ;;  %v10070_v43 = vld [vmem:[#allocation5 + $0xc6c] ss:$16 sps:$4 sm:$0xff]  }
 0x2d5   :  { %v3247_v33 = vadd.f32 %v3246_v14, %v10998_v1  ;;  %v3301_v23 = vpop.f32.mrf.mxu0  ;;  %v11139_v44 = vadd.f32 %v3295_v27, %v3243_v15  ;;  %v10062_v1 = vld [vmem:[#allocation5 + $0xc88] ss:$16 sps:$4 sm:$0xff]   ;;  %v10073_v61 = vld [vmem:[#allocation5 + $0xb4c] ss:$16 sps:$4 sm:$0xff]  }
 0x2d6   :  { %4682 = vmatmul.mubr.bf16.gmra.mxu1 %v11137_v58  ;;  %4713 = vmatpush2.bf16.msra.mxu0 %v10053_v46  ;;  %v3248_v55 = vpop.f32.mrf.mxu1  ;;  %v10076_v46 = vld [vmem:[#allocation5 + $0xc4c] ss:$16 sps:$4 sm:$0xff]   ;;  %v10077_v14 = vld [vmem:[#allocation5 + $0xb28] ss:$16 sps:$4 sm:$0xff]  }
 0x2d7   :  { %4750 = vmatpush1.bf16.msra.mxu1 %v10056_v41  ;;  %4777 = vmatprep.mubr.bf16.mxu1 %v11030_v57  ;;  %v3249_v17 = vadd.f32 %v3248_v55, %v11002_v18  ;;  %v11146_v9 = vadd.f32 %v3299_v62, %v3247_v33  ;;  %v3303_v35 = vpop.f32.mrf.mxu0  ;;  %v10068_v57 = vld [vmem:[#allocation5 + $0xc68] ss:$16 sps:$4 sm:$0xff]   ;;  %v10079_v62 = vld [vmem:[#allocation5 + $0xb2c] ss:$16 sps:$4 sm:$0xff]  }
 0x2d8   :  { %4714 = vmatprep.subr.bf16.mxu0 %v10061_v3  ;;  %v3250_v53 = vpop.f32.mrf.mxu1  ;;  %4751 = vmatprep.subr.bf16.mxu1 %v10064_v51  ;;  %v10082_v41 = vld [vmem:[#allocation5 + $0xc2c] ss:$16 sps:$4 sm:$0xff]   ;;  %v10080_v3 = vld [vmem:[#allocation5 + $0xc28] ss:$16 sps:$4 sm:$0xff]  }
 0x2d9   :  { %v3251_v19 = vadd.f32 %v3250_v53, %v11005_v22  ;;  %v11150_v12 = vadd.f32 %v3301_v23, %v3249_v17  ;;  %v3305_v42 = vpop.f32.mrf.mxu0  ;;  %v10074_v22 = vld [vmem:[#allocation5 + $0xc48] ss:$16 sps:$4 sm:$0xff]   ;;  %v10085_v51 = vld [vmem:[#allocation5 + $0xb0c] ss:$16 sps:$4 sm:$0xff]  }
 0x2da   :  { %4715 = vmatpush2.bf16.msra.mxu0 %v10059_v50  ;;  %v3252_v45 = vpop.f32.mrf.mxu1  ;;  %v10088_v33 = vld [vmem:[#allocation5 + $0xc0c] ss:$16 sps:$4 sm:$0xff]   ;;  %v10083_v23 = vld [vmem:[#allocation5 + $0xb08] ss:$16 sps:$4 sm:$0xff]  }
 0x2db   :  { %4752 = vmatpush1.bf16.msra.mxu1 %v10062_v1  ;;  %v3253_v18 = vadd.f32 %v3252_v45, %v2241_v56  ;;  %4716 = vmatprep.subr.bf16.mxu0 %v10067_v21  ;;  %v11152_v27 = vadd.f32 %v3303_v35, %v3251_v19  ;;  %v10086_v55 = vld [vmem:[#allocation5 + $0xc08] ss:$16 sps:$4 sm:$0xff]   ;;  %v10091_v50 = vld [vmem:[#allocation5 + $0xeec] ss:$16 sps:$4 sm:$0xff]  }
 0x2dc   :  { %4753 = vmatprep.subr.bf16.mxu1 %v10070_v43  ;;  %v10089_v17 = vld [vmem:[#allocation5 + $0xee8] ss:$16 sps:$4 sm:$0xff]   ;;  %v10097_v21 = vld [vmem:[#allocation5 + $0xecc] ss:$16 sps:$4 sm:$0xff]  }
 0x2dd   :  { %v11154_v15 = vadd.f32 %v3305_v42, %v3253_v18  ;;  %v10092_v1 = vld [vmem:[#allocation5 + $0xde8] ss:$16 sps:$4 sm:$0xff]   ;;  %v10100_v35 = vld [vmem:[#allocation5 + $0xdcc] ss:$16 sps:$4 sm:$0xff]  }
 0x2de   :  { %4717 = vmatpush2.bf16.msra.mxu0 %v10065_v30  ;;  %v10095_v56 = vld [vmem:[#allocation5 + $0xec8] ss:$16 sps:$4 sm:$0xff]   ;;  %v10103_v30 = vld [vmem:[#allocation5 + $0xeac] ss:$16 sps:$4 sm:$0xff]  }
 0x2df   :  { %4754 = vmatpush1.bf16.msra.mxu1 %v10068_v57  ;;  %4718 = vmatprep.subr.bf16.mxu0 %v10073_v61  ;;  %v10098_v45 = vld [vmem:[#allocation5 + $0xdc8] ss:$16 sps:$4 sm:$0xff]   ;;  %v10106_v57 = vld [vmem:[#allocation5 + $0xdac] ss:$16 sps:$4 sm:$0xff]  }
 0x2e0   :  { %4755 = vmatprep.subr.bf16.mxu1 %v10076_v46  ;;  %v10104_v42 = vld [vmem:[#allocation5 + $0xda8] ss:$16 sps:$4 sm:$0xff]   ;;  %v10109_v46 = vld [vmem:[#allocation5 + $0xe8c] ss:$16 sps:$4 sm:$0xff]  }
 0x2e2   :  { %4719 = vmatpush2.bf16.msra.mxu0 %v10071_v37 }
 0x2e3   :  { %4756 = vmatpush1.bf16.msra.mxu1 %v10074_v22  ;;  %4720 = vmatprep.subr.bf16.mxu0 %v10079_v62  ;;  %v10112_v22 = vld [vmem:[#allocation5 + $0xd8c] ss:$16 sps:$4 sm:$0xff]  }
 0x2e4   :  { %4757 = vmatprep.subr.bf16.mxu1 %v10082_v41 }
 0x2e6   :  { %4721 = vmatpush2.bf16.msra.mxu0 %v10077_v14  ;;  %v10110_v14 = vld [vmem:[#allocation5 + $0xd88] ss:$16 sps:$4 sm:$0xff]  }
 0x2e7   :  { %4758 = vmatpush1.bf16.msra.mxu1 %v10080_v3  ;;  %4722 = vmatprep.subr.bf16.mxu0 %v10085_v51  ;;  %v10115_v3 = vld [vmem:[#allocation5 + $0xe6c] ss:$16 sps:$4 sm:$0xff]  }
 0x2e8   :  { %4759 = vmatprep.subr.bf16.mxu1 %v10088_v33  ;;  %v10118_v51 = vld [vmem:[#allocation5 + $0xd6c] ss:$16 sps:$4 sm:$0xff]  }
 0x2ea   :  { %4723 = vmatpush2.bf16.msra.mxu0 %v10083_v23 }
 0x2eb   :  { %4760 = vmatpush1.bf16.msra.mxu1 %v10086_v55  ;;  %4798 = vmatprep.subr.bf16.mxu0 %v10091_v50  ;;  %v10116_v55 = vld [vmem:[#allocation5 + $0xd68] ss:$16 sps:$4 sm:$0xff]   ;;  %v10121_v50 = vld [vmem:[#allocation5 + $0xe4c] ss:$16 sps:$4 sm:$0xff]  }
 0x2ec   :  { %4761 = vmatprep.subr.bf16.mxu1 %v10094_v54 }
 0x2ed   :  { %4725 = vmatmul.mubr.bf16.vlgmr.msra.gmra.mxu0 %v11087_v11  ;;  %v3342_v53 = vpop.f32.mrf.mxu1 }
 0x2ee   :  { %v11158_v43 = vadd.f32 %v3342_v53, %v11126_v34  ;;  %4734 = vmatprep.mubr.bf16.mxu0 %v11103_v20  ;;  %4799 = vmatpush1.bf16.msra.mxu0 %v10089_v17  ;;  %v10101_v34 = vld [vmem:[#allocation5 + $0xea8] ss:$16 sps:$4 sm:$0xff]   ;;  %v10124_v17 = vld [vmem:[#allocation5 + $0xd4c] ss:$16 sps:$4 sm:$0xff]  }
 0x2ef   :  { %4762 = vmatpush2.bf16.msra.mxu1 %v10092_v1  ;;  %v3344_v19 = vpop.f32.mrf.mxu1  ;;  %4800 = vmatprep.subr.bf16.mxu0 %v10097_v21  ;;  %v10122_v1 = vld [vmem:[#allocation5 + $0xd48] ss:$16 sps:$4 sm:$0xff]   ;;  %v10127_v21 = vld [vmem:[#allocation5 + $0xe2c] ss:$16 sps:$4 sm:$0xff]  }
 0x2f0   :  { %v11162_v18 = vadd.f32 %v3344_v19, %v11131_v40  ;;  %4763 = vmatprep.subr.bf16.mxu1 %v10100_v35  ;;  %v10125_v35 = vld [vmem:[#allocation5 + $0xe28] ss:$16 sps:$4 sm:$0xff]   ;;  %v10136_v19 = vld [vmem:[#allocation5 + $0xd0c] ss:$16 sps:$4 sm:$0xff]  }
 0x2f1   :  { %v3346_v61 = vpop.f32.mrf.mxu1  ;;  %v10128_v53 = vld [vmem:[#allocation5 + $0xd28] ss:$16 sps:$4 sm:$0xff]  }
 0x2f2   :  { %v11165_v11 = vadd.f32 %v3346_v61, %v11133_v7  ;;  %4801 = vmatpush1.bf16.msra.mxu0 %v10095_v56  ;;  %v10107_v7 = vld [vmem:[#allocation5 + $0xe88] ss:$16 sps:$4 sm:$0xff]   ;;  %v10133_v56 = vld [vmem:[#allocation5 + $0xe0c] ss:$16 sps:$4 sm:$0xff]   ;;  %v10137_v61 = vld [vmem:[#allocation5 + $0x11e0] ss:$16 sps:$4 sm:$0xff]  }
 0x2f3   :  { %4764 = vmatpush2.bf16.msra.mxu1 %v10098_v45  ;;  %v3348_v20 = vpop.f32.mrf.mxu1  ;;  %4802 = vmatprep.subr.bf16.mxu0 %v10103_v30  ;;  %v10134_v45 = vld [vmem:[#allocation5 + $0xd08] ss:$16 sps:$4 sm:$0xff]   ;;  %v10139_v30 = vld [vmem:[#allocation5 + $0x11e4] ss:$16 sps:$4 sm:$0xff]  }
 0x2f4   :  { %v11168_v37 = vadd.f32 %v3348_v20, %v11139_v44  ;;  %4765 = vmatprep.subr.bf16.mxu1 %v10106_v57  ;;  %v10142_v57 = vld [vmem:[#allocation5 + $0xfe4] ss:$16 sps:$4 sm:$0xff]  }
 0x2f5   :  { %4735 = vmatmul.mubr.bf16.gmra.mxu0 %v11111_v0  ;;  %v3352_v40 = vpop.f32.mrf.mxu1 }
 0x2f6   :  { %v11172_v62 = vadd.f32 %v3352_v40, %v11146_v9  ;;  %4803 = vmatpush1.bf16.msra.mxu0 %v10101_v34  ;;  %4830 = vmatprep.mubr.bf16.mxu0 %v11634_v13  ;;  %v10113_v9 = vld [vmem:[#allocation5 + $0xe68] ss:$16 sps:$4 sm:$0xff]   ;;  %v10140_v34 = vld [vmem:[#allocation5 + $0xfe0] ss:$16 sps:$4 sm:$0xff]  }
 0x2f7   :  { %4766 = vmatpush2.bf16.msra.mxu1 %v10104_v42  ;;  %v3354_v41 = vpop.f32.mrf.mxu1  ;;  %4804 = vmatprep.subr.bf16.mxu0 %v10109_v46  ;;  %v10145_v42 = vld [vmem:[#allocation5 + $0x11c4] ss:$16 sps:$4 sm:$0xff]  }
 0x2f8   :  { %v11176_v44 = vadd.f32 %v3354_v41, %v11150_v12  ;;  %4767 = vmatprep.subr.bf16.mxu1 %v10112_v22  ;;  %v10119_v12 = vld [vmem:[#allocation5 + $0xe48] ss:$16 sps:$4 sm:$0xff]   ;;  %v10148_v46 = vld [vmem:[#allocation5 + $0xfc4] ss:$16 sps:$4 sm:$0xff]   ;;  %v2337_v22 = vadd.f32 %v11062_v28, %v11041_v5  ;;  %v10143_v41 = vld [vmem:[#allocation5 + $0x11c0] ss:$16 sps:$4 sm:$0xff]  }
 0x2f9   :  { %v3356_v33 = vpop.f32.mrf.mxu1  ;;  %v10154_v5 = vld [vmem:[#allocation5 + $0xfa4] ss:$16 sps:$4 sm:$0xff]  }
 0x2fa   :  { %v11179_v0 = vadd.f32 %v3356_v33, %v11152_v27  ;;  %4805 = vmatpush1.bf16.msra.mxu0 %v10107_v7  ;;  %v10130_v27 = vld [vmem:[#allocation5 + $0xd2c] ss:$16 sps:$4 sm:$0xff]   ;;  %v2390_v28 = vadd.f32 %v11058_v49, %v2337_v22  ;;  %v10185_v22 = vld [vmem:[#allocation5 + $0x12e0] ss:$16 sps:$4 sm:$0xff]  }
 0x2fb   :  { %4768 = vmatpush2.bf16.msra.mxu1 %v10110_v14  ;;  %v3358_v23 = vpop.f32.mrf.mxu1  ;;  %4806 = vmatprep.subr.bf16.mxu0 %v10115_v3  ;;  %v10146_v3 = vld [vmem:[#allocation5 + $0xfc0] ss:$16 sps:$4 sm:$0xff]  }
 0x2fc   :  { %v11182_v54 = vadd.f32 %v3358_v23, %v11154_v15  ;;  %4769 = vmatprep.subr.bf16.mxu1 %v10118_v51  ;;  %v10131_v15 = vld [vmem:[#allocation5 + $0xe08] ss:$16 sps:$4 sm:$0xff]   ;;  %v10151_v51 = vld [vmem:[#allocation5 + $0x11a4] ss:$16 sps:$4 sm:$0xff]  }
 0x2fd   :  { %v10157_v23 = vld [vmem:[#allocation5 + $0x1184] ss:$16 sps:$4 sm:$0xff]  }
 0x2fe   :  { %4807 = vmatpush1.bf16.msra.mxu0 %v10113_v9 }
 0x2ff   :  { %4770 = vmatpush2.bf16.msra.mxu1 %v10116_v55  ;;  %4808 = vmatprep.subr.bf16.mxu0 %v10121_v50  ;;  %v10155_v50 = vld [vmem:[#allocation5 + $0x1180] ss:$16 sps:$4 sm:$0xff]  }
 0x300   :  { %4771 = vmatprep.subr.bf16.mxu1 %v10124_v17 }
 0x302   :  { %4809 = vmatpush1.bf16.msra.mxu0 %v10119_v12  ;;  %v10158_v12 = vld [vmem:[#allocation5 + $0xf80] ss:$16 sps:$4 sm:$0xff]  }
 0x303   :  { %4772 = vmatpush2.bf16.msra.mxu1 %v10122_v1  ;;  %4810 = vmatprep.subr.bf16.mxu0 %v10127_v21  ;;  %v10163_v1 = vld [vmem:[#allocation5 + $0x1164] ss:$16 sps:$4 sm:$0xff]  }
 0x304   :  { %4773 = vmatprep.subr.bf16.mxu1 %v10130_v27  ;;  %v10166_v21 = vld [vmem:[#allocation5 + $0xf64] ss:$16 sps:$4 sm:$0xff]   ;;  %v10161_v27 = vld [vmem:[#allocation5 + $0x1160] ss:$16 sps:$4 sm:$0xff]  }
 0x306   :  { %4811 = vmatpush1.bf16.msra.mxu0 %v10125_v35 }
 0x307   :  { %4774 = vmatpush2.bf16.msra.mxu1 %v10128_v53  ;;  %4812 = vmatprep.subr.bf16.mxu0 %v10133_v56  ;;  %v10169_v53 = vld [vmem:[#allocation5 + $0x1144] ss:$16 sps:$4 sm:$0xff]  }
 0x308   :  { %4775 = vmatprep.subr.bf16.mxu1 %v10136_v19  ;;  %v10172_v56 = vld [vmem:[#allocation5 + $0xf44] ss:$16 sps:$4 sm:$0xff]   ;;  %v10167_v19 = vld [vmem:[#allocation5 + $0x1140] ss:$16 sps:$4 sm:$0xff]  }
 0x30a   :  { %4813 = vmatpush1.bf16.msra.mxu0 %v10131_v15  ;;  %v10170_v15 = vld [vmem:[#allocation5 + $0xf40] ss:$16 sps:$4 sm:$0xff]  }
 0x30b   :  { %4776 = vmatpush2.bf16.msra.mxu1 %v10134_v45  ;;  %5938 = vmatprep.subr.bf16.mxu0 %v10139_v30  ;;  %v10178_v45 = vld [vmem:[#allocation5 + $0xf24] ss:$16 sps:$4 sm:$0xff]   ;;  %v10173_v30 = vld [vmem:[#allocation5 + $0x1120] ss:$16 sps:$4 sm:$0xff]  }
 0x30c   :  { %v3395_v20 = vpop.f32.mrf.mxu0  ;;  %5885 = vmatprep.subr.bf16.mxu1 %v10142_v57  ;;  %v10181_v57 = vld [vmem:[#allocation5 + $0x1104] ss:$16 sps:$4 sm:$0xff]  }
 0x30d   :  { %v11187_v40 = vadd.f32 %v3395_v20, %v11055_v16  ;;  %4831 = vmatmul.mubr.bf16.vlgmr.msra.gmra.mxu0 %v11120_v59  ;;  %v10182_v20 = vld [vmem:[#allocation5 + $0xf00] ss:$16 sps:$4 sm:$0xff]  }
 0x30e   :  { %4778 = vmatmul.mubr.bf16.vlgmr.msra.gmra.mxu1 %v11083_v26  ;;  %5939 = vmatpush1.bf16.msra.mxu0 %v10137_v61  ;;  %v3397_v7 = vpop.f32.mrf.mxu0  ;;  %v10184_v61 = vld [vmem:[#allocation5 + $0xf04] ss:$16 sps:$4 sm:$0xff]  }
 0x30f   :  { %v11192_v14 = vadd.f32 %v3397_v7, %v11060_v39  ;;  %4787 = vmatprep.mubr.bf16.mxu1 %v11094_v8  ;;  %5886 = vmatpush1.bf16.msra.mxu1 %v10140_v34  ;;  %v10149_v39 = vld [vmem:[#allocation5 + $0x11a0] ss:$16 sps:$4 sm:$0xff]  }
 0x310   :  { %v3399_v33 = vpop.f32.mrf.mxu0  ;;  %5940 = vmatprep.subr.bf16.mxu0 %v10145_v42  ;;  %5887 = vmatprep.subr.bf16.mxu1 %v10148_v46  ;;  %v10152_v8 = vld [vmem:[#allocation5 + $0xfa0] ss:$16 sps:$4 sm:$0xff]   ;;  %v10187_v42 = vld [vmem:[#allocation5 + $0x12e4] ss:$16 sps:$4 sm:$0xff]  }
 0x311   :  { %v11196_v16 = vadd.f32 %v3399_v33, %v11064_v4  ;;  %4840 = vmatprep.mubr.bf16.mxu0 %v11634_v13  ;;  %v10160_v4 = vld [vmem:[#allocation5 + $0xf84] ss:$16 sps:$4 sm:$0xff]   ;;  %v10179_v34 = vld [vmem:[#allocation5 + $0x1100] ss:$16 sps:$4 sm:$0xff]  }
 0x312   :  { %5941 = vmatpush1.bf16.msra.mxu0 %v10143_v41  ;;  %v3401_v26 = vpop.f32.mrf.mxu0  ;;  %v10190_v46 = vld [vmem:[#allocation5 + $0x10e4] ss:$16 sps:$4 sm:$0xff]   ;;  %v10188_v7 = vld [vmem:[#allocation5 + $0x10e0] ss:$16 sps:$4 sm:$0xff]  }
 0x313   :  { %v11200_v59 = vadd.f32 %v3401_v26, %v2390_v28  ;;  %5888 = vmatpush1.bf16.msra.mxu1 %v10146_v3  ;;  %5942 = vmatprep.subr.bf16.mxu0 %v10151_v51  ;;  %v10193_v41 = vld [vmem:[#allocation5 + $0x12c4] ss:$16 sps:$4 sm:$0xff]   ;;  %v10191_v26 = vld [vmem:[#allocation5 + $0x12c0] ss:$16 sps:$4 sm:$0xff]  }
 0x314   :  { %v3405_v9 = vpop.f32.mrf.mxu0  ;;  %5889 = vmatprep.subr.bf16.mxu1 %v10154_v5  ;;  %v10196_v51 = vld [vmem:[#allocation5 + $0x10c4] ss:$16 sps:$4 sm:$0xff]  }
 0x315   :  { %v11203_v55 = vadd.f32 %v3405_v9, %v11068_v25  ;;  %4841 = vmatmul.mubr.bf16.gmra.mxu0 %v11137_v58  ;;  %v10199_v9 = vld [vmem:[#allocation5 + $0x12a4] ss:$16 sps:$4 sm:$0xff]  }
 0x316   :  { %4788 = vmatmul.mubr.bf16.gmra.mxu1 %v11107_v48  ;;  %5943 = vmatpush1.bf16.msra.mxu0 %v10149_v39  ;;  %v3407_v49 = vpop.f32.mrf.mxu0 }
 0x317   :  { %5970 = vmatprep.mubr.bf16.mxu0 %v10881_v47  ;;  %v11209_v17 = vadd.f32 %v3407_v49, %v11071_v32  ;;  %5890 = vmatpush1.bf16.msra.mxu1 %v10152_v8  ;;  %v10164_v32 = vld [vmem:[#allocation5 + $0xf60] ss:$16 sps:$4 sm:$0xff]  }
 0x318   :  { %5917 = vmatprep.mubr.bf16.mxu1 %v10888_v60  ;;  %v3409_v25 = vpop.f32.mrf.mxu0  ;;  %5944 = vmatprep.subr.bf16.mxu0 %v10157_v23  ;;  %v10194_v8 = vld [vmem:[#allocation5 + $0x10c0] ss:$16 sps:$4 sm:$0xff]  }
 0x319   :  { %v11213_v58 = vadd.f32 %v3409_v25, %v11074_v38  ;;  %5891 = vmatprep.subr.bf16.mxu1 %v10160_v4  ;;  %v10175_v38 = vld [vmem:[#allocation5 + $0x1124] ss:$16 sps:$4 sm:$0xff]  }
 0x31a   :  { %5945 = vmatpush1.bf16.msra.mxu0 %v10155_v50  ;;  %v3411_v48 = vpop.f32.mrf.mxu0  ;;  %v10202_v50 = vld [vmem:[#allocation5 + $0x10a4] ss:$16 sps:$4 sm:$0xff]  }
 0x31b   :  { %v11216_v35 = vadd.f32 %v3411_v48, %v11076_v10  ;;  %5892 = vmatpush1.bf16.msra.mxu1 %v10158_v12  ;;  %5946 = vmatprep.subr.bf16.mxu0 %v10163_v1  ;;  %v10176_v10 = vld [vmem:[#allocation5 + $0xf20] ss:$16 sps:$4 sm:$0xff]  }
 0x31c   :  { %5893 = vmatprep.subr.bf16.mxu1 %v10166_v21  ;;  %v10197_v21 = vld [vmem:[#allocation5 + $0x12a0] ss:$16 sps:$4 sm:$0xff]  }
 0x31e   :  { %5947 = vmatpush1.bf16.msra.mxu0 %v10161_v27  ;;  %v10200_v27 = vld [vmem:[#allocation5 + $0x10a0] ss:$16 sps:$4 sm:$0xff]  }
 0x31f   :  { %5894 = vmatpush1.bf16.msra.mxu1 %v10164_v32  ;;  %5948 = vmatprep.subr.bf16.mxu0 %v10169_v53  ;;  %v10205_v32 = vld [vmem:[#allocation5 + $0x1284] ss:$16 sps:$4 sm:$0xff]  }
 0x320   :  { %5895 = vmatprep.subr.bf16.mxu1 %v10172_v56 }
 0x322   :  { %5949 = vmatpush1.bf16.msra.mxu0 %v10167_v19  ;;  %v10208_v19 = vld [vmem:[#allocation5 + $0x1084] ss:$16 sps:$4 sm:$0xff]  }
 0x323   :  { %5896 = vmatpush1.bf16.msra.mxu1 %v10170_v15  ;;  %5950 = vmatprep.subr.bf16.mxu0 %v10175_v38 }
 0x324   :  { %5897 = vmatprep.subr.bf16.mxu1 %v10178_v45 }
 0x326   :  { %5951 = vmatpush1.bf16.msra.mxu0 %v10173_v30  ;;  %v10203_v30 = vld [vmem:[#allocation5 + $0x1280] ss:$16 sps:$4 sm:$0xff]  }
 0x327   :  { %5898 = vmatpush1.bf16.msra.mxu1 %v10176_v10  ;;  %5952 = vmatprep.subr.bf16.mxu0 %v10181_v57  ;;  %v10206_v57 = vld [vmem:[#allocation5 + $0x1080] ss:$16 sps:$4 sm:$0xff]  }
 0x328   :  { %5899 = vmatprep.subr.bf16.mxu1 %v10184_v61  ;;  %v10211_v61 = vld [vmem:[#allocation5 + $0x1264] ss:$16 sps:$4 sm:$0xff]  }
 0x32a   :  { %5953 = vmatpush1.bf16.msra.mxu0 %v10179_v34 }
 0x32b   :  { %5900 = vmatpush1.bf16.msra.mxu1 %v10182_v20  ;;  %5954 = vmatprep.subr.bf16.mxu0 %v10187_v42  ;;  %v10214_v20 = vld [vmem:[#allocation5 + $0x1064] ss:$16 sps:$4 sm:$0xff]  }
 0x32c   :  { %v3501_v3 = vpop.f32.mrf.mxu0  ;;  %5901 = vmatprep.subr.bf16.mxu1 %v10190_v46 }
 0x32d   :  { %v3448_v33 = vpop.f32.mrf.mxu1 }
 0x32e   :  { %v3449_v5 = vadd.f32 %v3448_v33, %v11187_v40  ;;  %5955 = vmatpush2.bf16.msra.mxu0 %v10185_v22  ;;  %v3503_v28 = vpop.f32.mrf.mxu0 }
 0x32f   :  { %5902 = vmatpush2.bf16.msra.mxu1 %v10188_v7  ;;  %v3450_v39 = vpop.f32.mrf.mxu1  ;;  %5956 = vmatprep.subr.bf16.mxu0 %v10193_v41  ;;  %v10209_v7 = vld [vmem:[#allocation5 + $0x1260] ss:$16 sps:$4 sm:$0xff]  }
 0x330   :  { %v11219_v23 = vadd.f32 %v3501_v3, %v3449_v5  ;;  %v3451_v4 = vadd.f32 %v3450_v39, %v11192_v14  ;;  %v3505_v49 = vpop.f32.mrf.mxu0  ;;  %5903 = vmatprep.subr.bf16.mxu1 %v10196_v51  ;;  %v10212_v3 = vld [vmem:[#allocation5 + $0x1060] ss:$16 sps:$4 sm:$0xff]   ;;  %v10217_v51 = vld [vmem:[#allocation5 + $0x1244] ss:$16 sps:$4 sm:$0xff]  }
 0x331   :  { %v3452_v12 = vpop.f32.mrf.mxu1  ;;  %v10215_v39 = vld [vmem:[#allocation5 + $0x1240] ss:$16 sps:$4 sm:$0xff]  }
 0x332   :  { %v11222_v1 = vadd.f32 %v3503_v28, %v3451_v4  ;;  %v3453_v40 = vadd.f32 %v3452_v12, %v11196_v16  ;;  %5957 = vmatpush2.bf16.msra.mxu0 %v10191_v26  ;;  %v3507_v25 = vpop.f32.mrf.mxu0  ;;  %v10221_v4 = vld [vmem:[#allocation5 + $0x1220] ss:$16 sps:$4 sm:$0xff]  }
 0x333   :  { %5904 = vmatpush2.bf16.msra.mxu1 %v10194_v8  ;;  %v3454_v48 = vpop.f32.mrf.mxu1  ;;  %5958 = vmatprep.subr.bf16.mxu0 %v10199_v9  ;;  %v10223_v8 = vld [vmem:[#allocation5 + $0x1224] ss:$16 sps:$4 sm:$0xff]   ;;  %v10227_v12 = vld [vmem:[#allocation5 + $0x1200] ss:$16 sps:$4 sm:$0xff]  }
 0x334   :  { %v11225_v53 = vadd.f32 %v3505_v49, %v3453_v40  ;;  %v3455_v14 = vadd.f32 %v3454_v48, %v11200_v59  ;;  %v3511_v56 = vpop.f32.mrf.mxu0  ;;  %5905 = vmatprep.subr.bf16.mxu1 %v10202_v50  ;;  %v10226_v9 = vld [vmem:[#allocation5 + $0x1024] ss:$16 sps:$4 sm:$0xff]   ;;  %v10224_v49 = vld [vmem:[#allocation5 + $0x1020] ss:$16 sps:$4 sm:$0xff]   ;;  %v10233_v48 = vld [vmem:[#allocation5 + $0xfe8] ss:$16 sps:$4 sm:$0xff]  }
 0x335   :  { %v3458_v15 = vpop.f32.mrf.mxu1  ;;  %v10229_v50 = vld [vmem:[#allocation5 + $0x1204] ss:$16 sps:$4 sm:$0xff]   ;;  %v10230_v40 = vld [vmem:[#allocation5 + $0x1000] ss:$16 sps:$4 sm:$0xff]  }
 0x336   :  { %v11228_v38 = vadd.f32 %v3507_v25, %v3455_v14  ;;  %v3459_v16 = vadd.f32 %v3458_v15, %v11203_v55  ;;  %5959 = vmatpush2.bf16.msra.mxu0 %v10197_v21  ;;  %v3513_v45 = vpop.f32.mrf.mxu0  ;;  %v10235_v25 = vld [vmem:[#allocation5 + $0xfec] ss:$16 sps:$4 sm:$0xff]   ;;  %v10238_v21 = vld [vmem:[#allocation5 + $0x13e4] ss:$16 sps:$4 sm:$0xff]  }
 0x337   :  { %5906 = vmatpush2.bf16.msra.mxu1 %v10200_v27  ;;  %v3460_v10 = vpop.f32.mrf.mxu1  ;;  %5960 = vmatprep.subr.bf16.mxu0 %v10205_v32  ;;  %v10236_v27 = vld [vmem:[#allocation5 + $0x13e0] ss:$16 sps:$4 sm:$0xff]   ;;  %v10241_v32 = vld [vmem:[#allocation5 + $0xfcc] ss:$16 sps:$4 sm:$0xff]   ;;  %v10244_v14 = vld [vmem:[#allocation5 + $0x13c4] ss:$16 sps:$4 sm:$0xff]  }
 0x338   :  { %v11231_v34 = vadd.f32 %v3511_v56, %v3459_v16  ;;  %v3461_v59 = vadd.f32 %v3460_v10, %v11209_v17  ;;  %5907 = vmatprep.subr.bf16.mxu1 %v10208_v19  ;;  %v3515_v42 = vpop.f32.mrf.mxu0  ;;  %v10220_v17 = vld [vmem:[#allocation5 + $0x1044] ss:$16 sps:$4 sm:$0xff]   ;;  %v10239_v56 = vld [vmem:[#allocation5 + $0xfc8] ss:$16 sps:$4 sm:$0xff]   ;;  %v10242_v19 = vld [vmem:[#allocation5 + $0x13c0] ss:$16 sps:$4 sm:$0xff]  }
 0x339   :  { %v3462_v46 = vpop.f32.mrf.mxu1  ;;  %v10247_v15 = vld [vmem:[#allocation5 + $0xfac] ss:$16 sps:$4 sm:$0xff]   ;;  %v10250_v16 = vld [vmem:[#allocation5 + $0x13a4] ss:$16 sps:$4 sm:$0xff]  }
 0x33a   :  { %v11234_v22 = vadd.f32 %v3513_v45, %v3461_v59  ;;  %v3463_v55 = vadd.f32 %v3462_v46, %v11213_v58  ;;  %5961 = vmatpush2.bf16.msra.mxu0 %v10203_v30  ;;  %v3517_v28 = vpop.f32.mrf.mxu0  ;;  %v10218_v58 = vld [vmem:[#allocation5 + $0x1040] ss:$16 sps:$4 sm:$0xff]   ;;  %v10245_v45 = vld [vmem:[#allocation5 + $0xfa8] ss:$16 sps:$4 sm:$0xff]   ;;  %v10253_v10 = vld [vmem:[#allocation5 + $0xf8c] ss:$16 sps:$4 sm:$0xff]  }
 0x33b   :  { %5908 = vmatpush2.bf16.msra.mxu1 %v10206_v57  ;;  %v3464_v41 = vpop.f32.mrf.mxu1  ;;  %5962 = vmatprep.subr.bf16.mxu0 %v10211_v61  ;;  %v10248_v30 = vld [vmem:[#allocation5 + $0x13a0] ss:$16 sps:$4 sm:$0xff]   ;;  %v10256_v57 = vld [vmem:[#allocation5 + $0x1384] ss:$16 sps:$4 sm:$0xff]   ;;  %v10251_v61 = vld [vmem:[#allocation5 + $0xf88] ss:$16 sps:$4 sm:$0xff]  }
 0x33c   :  { %v11237_v33 = vadd.f32 %v3515_v42, %v3463_v55  ;;  %v3465_v5 = vadd.f32 %v3464_v41, %v11216_v35  ;;  %5909 = vmatprep.subr.bf16.mxu1 %v10214_v20  ;;  %v10232_v35 = vld [vmem:[#allocation5 + $0x1004] ss:$16 sps:$4 sm:$0xff]   ;;  %v10254_v59 = vld [vmem:[#allocation5 + $0x1380] ss:$16 sps:$4 sm:$0xff]   ;;  %v10259_v20 = vld [vmem:[#allocation5 + $0xf6c] ss:$16 sps:$4 sm:$0xff]  }
 0x33d   :  { %v10262_v42 = vld [vmem:[#allocation5 + $0x1364] ss:$16 sps:$4 sm:$0xff]   ;;  %v10257_v46 = vld [vmem:[#allocation5 + $0xf68] ss:$16 sps:$4 sm:$0xff]   ;;  %v10260_v55 = vld [vmem:[#allocation5 + $0x1360] ss:$16 sps:$4 sm:$0xff]  }
 0x33e   :  { %v11240_v26 = vadd.f32 %v3517_v28, %v3465_v5  ;;  %5963 = vmatpush2.bf16.msra.mxu0 %v10209_v7  ;;  %v10265_v7 = vld [vmem:[#allocation5 + $0xf4c] ss:$16 sps:$4 sm:$0xff]   ;;  %v10268_v41 = vld [vmem:[#allocation5 + $0x1344] ss:$16 sps:$4 sm:$0xff]   ;;  %v10272_v28 = vld [vmem:[#allocation5 + $0x1320] ss:$16 sps:$4 sm:$0xff]  }
 0x33f   :  { %5910 = vmatpush2.bf16.msra.mxu1 %v10212_v3  ;;  %5964 = vmatprep.subr.bf16.mxu0 %v10217_v51  ;;  %v10266_v3 = vld [vmem:[#allocation5 + $0x1340] ss:$16 sps:$4 sm:$0xff]   ;;  %v10271_v51 = vld [vmem:[#allocation5 + $0xf2c] ss:$16 sps:$4 sm:$0xff]   ;;  %v10274_v5 = vld [vmem:[#allocation5 + $0x1324] ss:$16 sps:$4 sm:$0xff]  }
 0x340   :  { %5911 = vmatprep.subr.bf16.mxu1 %v10220_v17  ;;  %v10269_v17 = vld [vmem:[#allocation5 + $0xf28] ss:$16 sps:$4 sm:$0xff]  }
 0x342   :  { %5965 = vmatpush2.bf16.msra.mxu0 %v10215_v39  ;;  %v10277_v39 = vld [vmem:[#allocation5 + $0xf0c] ss:$16 sps:$4 sm:$0xff]  }
 0x343   :  { %5912 = vmatpush2.bf16.msra.mxu1 %v10218_v58  ;;  %5966 = vmatprep.subr.bf16.mxu0 %v10223_v8  ;;  %v10280_v58 = vld [vmem:[#allocation5 + $0x1304] ss:$16 sps:$4 sm:$0xff]   ;;  %v10275_v8 = vld [vmem:[#allocation5 + $0xf08] ss:$16 sps:$4 sm:$0xff]  }
 0x344   :  { %5913 = vmatprep.subr.bf16.mxu1 %v10226_v9  ;;  %v10278_v9 = vld [vmem:[#allocation5 + $0x1300] ss:$16 sps:$4 sm:$0xff]  }
 0x346   :  { %5967 = vmatpush2.bf16.msra.mxu0 %v10221_v4  ;;  %v10283_v4 = vld [vmem:[#allocation5 + $0x10ec] ss:$16 sps:$4 sm:$0xff]  }
 0x347   :  { %5914 = vmatpush2.bf16.msra.mxu1 %v10224_v49  ;;  %5968 = vmatprep.subr.bf16.mxu0 %v10229_v50  ;;  %v10286_v49 = vld [vmem:[#allocation5 + $0x11ec] ss:$16 sps:$4 sm:$0xff]   ;;  %v10281_v50 = vld [vmem:[#allocation5 + $0x10e8] ss:$16 sps:$4 sm:$0xff]  }
 0x348   :  { %5915 = vmatprep.subr.bf16.mxu1 %v10232_v35 }
 0x34a   :  { %5969 = vmatpush2.bf16.msra.mxu0 %v10227_v12  ;;  %v10284_v12 = vld [vmem:[#allocation5 + $0x11e8] ss:$16 sps:$4 sm:$0xff]  }
 0x34b   :  { %5916 = vmatpush2.bf16.msra.mxu1 %v10230_v40  ;;  %6044 = vmatprep.subr.bf16.mxu0 %v10235_v25  ;;  %v10289_v40 = vld [vmem:[#allocation5 + $0x10cc] ss:$16 sps:$4 sm:$0xff]  }
 0x34c   :  { %5991 = vmatprep.subr.bf16.mxu1 %v10238_v21  ;;  %v10292_v21 = vld [vmem:[#allocation5 + $0x11cc] ss:$16 sps:$4 sm:$0xff]  }
 0x34d   :  { %5971 = vmatmul.mubr.bf16.vlgmr.msra.gmra.mxu0 %v10893_v63 }
 0x34e   :  { %5918 = vmatmul.mubr.bf16.vlgmr.msra.gmra.mxu1 %v10911_v29  ;;  %5980 = vmatprep.mubr.bf16.mxu0 %v10885_v52 }
 0x34f   :  { %6045 = vmatpush1.bf16.msra.mxu0 %v10233_v48  ;;  %5927 = vmatprep.mubr.bf16.mxu1 %v10901_v2 }
 0x350   :  { %5992 = vmatpush1.bf16.msra.mxu1 %v10236_v27  ;;  %6046 = vmatprep.subr.bf16.mxu0 %v10241_v32 }
 0x351   :  { %5993 = vmatprep.subr.bf16.mxu1 %v10244_v14  ;;  %v10287_v14 = vld [vmem:[#allocation5 + $0x10c8] ss:$16 sps:$4 sm:$0xff]  }
 0x353   :  { %6047 = vmatpush1.bf16.msra.mxu0 %v10239_v56 }
 0x354   :  { %5994 = vmatpush1.bf16.msra.mxu1 %v10242_v19  ;;  %6048 = vmatprep.subr.bf16.mxu0 %v10247_v15  ;;  %v10290_v15 = vld [vmem:[#allocation5 + $0x11c8] ss:$16 sps:$4 sm:$0xff]  }
 0x355   :  { %5981 = vmatmul.mubr.bf16.gmra.mxu0 %v10905_v6  ;;  %5995 = vmatprep.subr.bf16.mxu1 %v10250_v16  ;;  %v10295_v16 = vld [vmem:[#allocation5 + $0x10ac] ss:$16 sps:$4 sm:$0xff]  }
 0x356   :  { %5928 = vmatmul.mubr.bf16.gmra.mxu1 %v10915_v24  ;;  %6076 = vmatprep.mubr.bf16.mxu0 %v10888_v60  ;;  %v10263_v60 = vld [vmem:[#allocation5 + $0xf48] ss:$16 sps:$4 sm:$0xff]  }
 0x357   :  { %6049 = vmatpush1.bf16.msra.mxu0 %v10245_v45  ;;  %6023 = vmatprep.mubr.bf16.mxu1 %v11634_v13 }
 0x358   :  { %5996 = vmatpush1.bf16.msra.mxu1 %v10248_v30  ;;  %6050 = vmatprep.subr.bf16.mxu0 %v10253_v10  ;;  %v10298_v30 = vld [vmem:[#allocation5 + $0x11ac] ss:$16 sps:$4 sm:$0xff]  }
 0x359   :  { %5997 = vmatprep.subr.bf16.mxu1 %v10256_v57 }
 0x35b   :  { %6051 = vmatpush1.bf16.msra.mxu0 %v10251_v61 }
 0x35c   :  { %5998 = vmatpush1.bf16.msra.mxu1 %v10254_v59  ;;  %6052 = vmatprep.subr.bf16.mxu0 %v10259_v20  ;;  %v10293_v59 = vld [vmem:[#allocation5 + $0x10a8] ss:$16 sps:$4 sm:$0xff]  }
 0x35d   :  { %5999 = vmatprep.subr.bf16.mxu1 %v10262_v42 }
 0x35f   :  { %6053 = vmatpush1.bf16.msra.mxu0 %v10257_v46  ;;  %v10296_v46 = vld [vmem:[#allocation5 + $0x11a8] ss:$16 sps:$4 sm:$0xff]  }
 0x360   :  { %6000 = vmatpush1.bf16.msra.mxu1 %v10260_v55  ;;  %6054 = vmatprep.subr.bf16.mxu0 %v10265_v7  ;;  %v10301_v7 = vld [vmem:[#allocation5 + $0x108c] ss:$16 sps:$4 sm:$0xff]  }
 0x361   :  { %6001 = vmatprep.subr.bf16.mxu1 %v10268_v41  ;;  %v10304_v41 = vld [vmem:[#allocation5 + $0x118c] ss:$16 sps:$4 sm:$0xff]  }
 0x363   :  { %6055 = vmatpush1.bf16.msra.mxu0 %v10263_v60 }
 0x364   :  { %6002 = vmatpush1.bf16.msra.mxu1 %v10266_v3  ;;  %6056 = vmatprep.subr.bf16.mxu0 %v10271_v51 }
 0x365   :  { %6003 = vmatprep.subr.bf16.mxu1 %v10274_v5  ;;  %v10299_v5 = vld [vmem:[#allocation5 + $0x1088] ss:$16 sps:$4 sm:$0xff]  }
 0x367   :  { %6057 = vmatpush1.bf16.msra.mxu0 %v10269_v17 }
 0x368   :  { %6004 = vmatpush1.bf16.msra.mxu1 %v10272_v28  ;;  %6058 = vmatprep.subr.bf16.mxu0 %v10277_v39  ;;  %v10302_v39 = vld [vmem:[#allocation5 + $0x1188] ss:$16 sps:$4 sm:$0xff]  }
 0x369   :  { %6005 = vmatprep.subr.bf16.mxu1 %v10280_v58  ;;  %v10307_v58 = vld [vmem:[#allocation5 + $0x106c] ss:$16 sps:$4 sm:$0xff]  }
 0x36b   :  { %6059 = vmatpush1.bf16.msra.mxu0 %v10275_v8 }
 0x36c   :  { %6006 = vmatpush1.bf16.msra.mxu1 %v10278_v9  ;;  %v4620_v35 = vpop.f32.mrf.mxu0  ;;  %6060 = vmatprep.subr.bf16.mxu0 %v10283_v4  ;;  %v10310_v9 = vld [vmem:[#allocation5 + $0x116c] ss:$16 sps:$4 sm:$0xff]  }
 0x36d   :  { %v4567_v25 = vpop.f32.mrf.mxu1  ;;  %6097 = vmatprep.subr.bf16.mxu1 %v10286_v49 }
 0x36e   :  { %v11250_v48 = vadd.f32 %v4620_v35, %v4567_v25  ;;  %v4622_v27 = vpop.f32.mrf.mxu0  ;;  %v10305_v35 = vld [vmem:[#allocation5 + $0x1068] ss:$16 sps:$4 sm:$0xff]   ;;  %v10316_v25 = vld [vmem:[#allocation5 + $0x114c] ss:$16 sps:$4 sm:$0xff]  }
 0x36f   :  { %6024 = vmatmul.mubr.bf16.vlgmr.msra.gmra.mxu1 %v10928_v36  ;;  %6061 = vmatpush2.bf16.msra.mxu0 %v10281_v50  ;;  %v4569_v32 = vpop.f32.mrf.mxu1 }
 0x370   :  { %6098 = vmatpush1.bf16.msra.mxu1 %v10284_v12  ;;  %v11253_v56 = vadd.f32 %v4622_v27, %v4569_v32  ;;  %v4624_v19 = vpop.f32.mrf.mxu0  ;;  %6062 = vmatprep.subr.bf16.mxu0 %v10289_v40  ;;  %v10313_v40 = vld [vmem:[#allocation5 + $0x104c] ss:$16 sps:$4 sm:$0xff]   ;;  %v10314_v27 = vld [vmem:[#allocation5 + $0x1148] ss:$16 sps:$4 sm:$0xff]  }
 0x371   :  { %v4571_v45 = vpop.f32.mrf.mxu1  ;;  %6099 = vmatprep.subr.bf16.mxu1 %v10292_v21  ;;  %6033 = vmatprep.mubr.bf16.mxu1 %v11634_v13  ;;  %v10311_v21 = vld [vmem:[#allocation5 + $0x1048] ss:$16 sps:$4 sm:$0xff]   ;;  %v10319_v32 = vld [vmem:[#allocation5 + $0x102c] ss:$16 sps:$4 sm:$0xff]  }
 0x372   :  { %v11256_v10 = vadd.f32 %v4624_v19, %v4571_v45  ;;  %v4626_v57 = vpop.f32.mrf.mxu0  ;;  %v10317_v19 = vld [vmem:[#allocation5 + $0x1028] ss:$16 sps:$4 sm:$0xff]   ;;  %v10328_v45 = vld [vmem:[#allocation5 + $0x110c] ss:$16 sps:$4 sm:$0xff]  }
 0x373   :  { %6063 = vmatpush2.bf16.msra.mxu0 %v10287_v14  ;;  %v4573_v61 = vpop.f32.mrf.mxu1  ;;  %v10322_v14 = vld [vmem:[#allocation5 + $0x112c] ss:$16 sps:$4 sm:$0xff]  }
 0x374   :  { %6100 = vmatpush1.bf16.msra.mxu1 %v10290_v15  ;;  %v11258_v20 = vadd.f32 %v4626_v57, %v4573_v61  ;;  %v4630_v42 = vpop.f32.mrf.mxu0  ;;  %6064 = vmatprep.subr.bf16.mxu0 %v10295_v16  ;;  %v10320_v15 = vld [vmem:[#allocation5 + $0x1128] ss:$16 sps:$4 sm:$0xff]   ;;  %v10325_v16 = vld [vmem:[#allocation5 + $0x100c] ss:$16 sps:$4 sm:$0xff]  }
 0x375   :  { %v4577_v55 = vpop.f32.mrf.mxu1  ;;  %6101 = vmatprep.subr.bf16.mxu1 %v10298_v30  ;;  %v10323_v30 = vld [vmem:[#allocation5 + $0x1008] ss:$16 sps:$4 sm:$0xff]   ;;  %v10331_v61 = vld [vmem:[#allocation5 + $0x13ec] ss:$16 sps:$4 sm:$0xff]  }
 0x376   :  { %v11260_v60 = vadd.f32 %v4630_v42, %v4577_v55  ;;  %v4632_v3 = vpop.f32.mrf.mxu0  ;;  %v10326_v57 = vld [vmem:[#allocation5 + $0x1108] ss:$16 sps:$4 sm:$0xff]   ;;  %v10337_v55 = vld [vmem:[#allocation5 + $0x13cc] ss:$16 sps:$4 sm:$0xff]  }
 0x377   :  { %6034 = vmatmul.mubr.bf16.gmra.mxu1 %v10932_v31  ;;  %6065 = vmatpush2.bf16.msra.mxu0 %v10293_v59  ;;  %v4579_v51 = vpop.f32.mrf.mxu1  ;;  %v10334_v59 = vld [vmem:[#allocation5 + $0x12ec] ss:$16 sps:$4 sm:$0xff]   ;;  %v10329_v42 = vld [vmem:[#allocation5 + $0x13e8] ss:$16 sps:$4 sm:$0xff]  }
 0x378   :  { %6102 = vmatpush1.bf16.msra.mxu1 %v10296_v46  ;;  %6129 = vmatprep.mubr.bf16.mxu1 %v10881_v47  ;;  %v11264_v17 = vadd.f32 %v4632_v3, %v4579_v51  ;;  %v4634_v28 = vpop.f32.mrf.mxu0  ;;  %v10308_v47 = vld [vmem:[#allocation5 + $0x1168] ss:$16 sps:$4 sm:$0xff]  }
 0x379   :  { %6066 = vmatprep.subr.bf16.mxu0 %v10301_v7  ;;  %v4581_v8 = vpop.f32.mrf.mxu1  ;;  %6103 = vmatprep.subr.bf16.mxu1 %v10304_v41  ;;  %v10332_v46 = vld [vmem:[#allocation5 + $0x12e8] ss:$16 sps:$4 sm:$0xff]   ;;  %v10340_v7 = vld [vmem:[#allocation5 + $0x12cc] ss:$16 sps:$4 sm:$0xff]  }
 0x37a   :  { %v11266_v4 = vadd.f32 %v4634_v28, %v4581_v8  ;;  %v4636_v49 = vpop.f32.mrf.mxu0  ;;  %v10335_v51 = vld [vmem:[#allocation5 + $0x13c8] ss:$16 sps:$4 sm:$0xff]  }
 0x37b   :  { %6067 = vmatpush2.bf16.msra.mxu0 %v10299_v5  ;;  %v4583_v50 = vpop.f32.mrf.mxu1  ;;  %v10338_v28 = vld [vmem:[#allocation5 + $0x12c8] ss:$16 sps:$4 sm:$0xff]  }
 0x37c   :  { %6104 = vmatpush1.bf16.msra.mxu1 %v10302_v39  ;;  %v11268_v12 = vadd.f32 %v4636_v49, %v4583_v50  ;;  %6068 = vmatprep.subr.bf16.mxu0 %v10307_v58  ;;  %v10343_v39 = vld [vmem:[#allocation5 + $0x13ac] ss:$16 sps:$4 sm:$0xff]  }
 0x37d   :  { %6105 = vmatprep.subr.bf16.mxu1 %v10310_v9  ;;  %v10346_v9 = vld [vmem:[#allocation5 + $0x12ac] ss:$16 sps:$4 sm:$0xff]  }
 0x37f   :  { %6069 = vmatpush2.bf16.msra.mxu0 %v10305_v35  ;;  %v10344_v35 = vld [vmem:[#allocation5 + $0x12a8] ss:$16 sps:$4 sm:$0xff]  }
 0x380   :  { %6106 = vmatpush1.bf16.msra.mxu1 %v10308_v47  ;;  %6070 = vmatprep.subr.bf16.mxu0 %v10313_v40  ;;  %v10349_v47 = vld [vmem:[#allocation5 + $0x138c] ss:$16 sps:$4 sm:$0xff]  }
 0x381   :  { %6107 = vmatprep.subr.bf16.mxu1 %v10316_v25  ;;  %v10352_v40 = vld [vmem:[#allocation5 + $0x128c] ss:$16 sps:$4 sm:$0xff]  }
 0x383   :  { %6071 = vmatpush2.bf16.msra.mxu0 %v10311_v21  ;;  %v10347_v21 = vld [vmem:[#allocation5 + $0x1388] ss:$16 sps:$4 sm:$0xff]  }
 0x384   :  { %6108 = vmatpush1.bf16.msra.mxu1 %v10314_v27  ;;  %6072 = vmatprep.subr.bf16.mxu0 %v10319_v32  ;;  %v10355_v32 = vld [vmem:[#allocation5 + $0x136c] ss:$16 sps:$4 sm:$0xff]  }
 0x385   :  { %6109 = vmatprep.subr.bf16.mxu1 %v10322_v14  ;;  %v10358_v14 = vld [vmem:[#allocation5 + $0x126c] ss:$16 sps:$4 sm:$0xff]  }
 0x387   :  { %6073 = vmatpush2.bf16.msra.mxu0 %v10317_v19 }
 0x388   :  { %6110 = vmatpush1.bf16.msra.mxu1 %v10320_v15  ;;  %6074 = vmatprep.subr.bf16.mxu0 %v10325_v16  ;;  %v10353_v15 = vld [vmem:[#allocation5 + $0x1368] ss:$16 sps:$4 sm:$0xff]  }
 0x389   :  { %6111 = vmatprep.subr.bf16.mxu1 %v10328_v45  ;;  %v10356_v45 = vld [vmem:[#allocation5 + $0x1268] ss:$16 sps:$4 sm:$0xff]  }
 0x38b   :  { %6075 = vmatpush2.bf16.msra.mxu0 %v10323_v30  ;;  %v10361_v30 = vld [vmem:[#allocation5 + $0x134c] ss:$16 sps:$4 sm:$0xff]  }
 0x38c   :  { %6112 = vmatpush1.bf16.msra.mxu1 %v10326_v57  ;;  %6150 = vmatprep.subr.bf16.mxu0 %v10331_v61  ;;  %v10364_v57 = vld [vmem:[#allocation5 + $0x124c] ss:$16 sps:$4 sm:$0xff]  }
 0x38d   :  { %6113 = vmatprep.subr.bf16.mxu1 %v10334_v59  ;;  %v10367_v59 = vld [vmem:[#allocation5 + $0x132c] ss:$16 sps:$4 sm:$0xff]  }
 0x38e   :  { %6077 = vmatmul.mubr.bf16.vlgmr.msra.gmra.mxu0 %v10911_v29  ;;  %v4673_v41 = vpop.f32.mrf.mxu1 }
 0x38f   :  { %v4674_v3 = vadd.f32 %v4673_v41, %v11250_v48  ;;  %6086 = vmatprep.mubr.bf16.mxu0 %v10901_v2  ;;  %6151 = vmatpush1.bf16.msra.mxu0 %v10329_v42  ;;  %v10341_v48 = vld [vmem:[#allocation5 + $0x13a8] ss:$16 sps:$4 sm:$0xff]   ;;  %v10370_v42 = vld [vmem:[#allocation5 + $0x122c] ss:$16 sps:$4 sm:$0xff]  }
 0x390   :  { %6114 = vmatpush2.bf16.msra.mxu1 %v10332_v46  ;;  %v4675_v5 = vpop.f32.mrf.mxu1  ;;  %6152 = vmatprep.subr.bf16.mxu0 %v10337_v55  ;;  %v10365_v46 = vld [vmem:[#allocation5 + $0x1328] ss:$16 sps:$4 sm:$0xff]   ;;  %v10373_v55 = vld [vmem:[#allocation5 + $0x130c] ss:$16 sps:$4 sm:$0xff]  }
 0x391   :  { %v11274_v58 = vadd.f32 %v4674_v3, %v11158_v43  ;;  %v4676_v8 = vadd.f32 %v4675_v5, %v11253_v56  ;;  %6115 = vmatprep.subr.bf16.mxu1 %v10340_v7  ;;  %v10371_v7 = vld [vmem:[#allocation5 + $0x1308] ss:$16 sps:$4 sm:$0xff]  }
 0x392   :  { %v4677_v29 = vpop.f32.mrf.mxu1 }
 0x393   :  { %v11278_v49 = vadd.f32 %v4676_v8, %v11162_v18  ;;  %v4678_v2 = vadd.f32 %v4677_v29, %v11256_v10  ;;  %6153 = vmatpush1.bf16.msra.mxu0 %v10335_v51 }
 0x394   :  { %6116 = vmatpush2.bf16.msra.mxu1 %v10338_v28  ;;  %v4679_v50 = vpop.f32.mrf.mxu1  ;;  %6154 = vmatprep.subr.bf16.mxu0 %v10343_v39 }
 0x395   :  { %v11282_v43 = vadd.f32 %v4678_v2, %v11165_v11  ;;  %v4680_v56 = vadd.f32 %v4679_v50, %v11258_v20  ;;  %6117 = vmatprep.subr.bf16.mxu1 %v10346_v9  ;;  %v10350_v11 = vld [vmem:[#allocation5 + $0x1288] ss:$16 sps:$4 sm:$0xff]  }
 0x396   :  { %6087 = vmatmul.mubr.bf16.gmra.mxu0 %v10915_v24  ;;  %v4683_v18 = vpop.f32.mrf.mxu1 }
 0x397   :  { %v11287_v25 = vadd.f32 %v4680_v56, %v11168_v37  ;;  %v4684_v10 = vadd.f32 %v4683_v18, %v11260_v60  ;;  %6155 = vmatpush1.bf16.msra.mxu0 %v10341_v48  ;;  %6182 = vmatprep.mubr.bf16.mxu0 %v11634_v13 }
 0x398   :  { %6118 = vmatpush2.bf16.msra.mxu1 %v10344_v35  ;;  %v4685_v27 = vpop.f32.mrf.mxu1  ;;  %6156 = vmatprep.subr.bf16.mxu0 %v10349_v47 }
 0x399   :  { %v11292_v20 = vadd.f32 %v4684_v10, %v11172_v62  ;;  %v4686_v24 = vadd.f32 %v4685_v27, %v11264_v17  ;;  %6119 = vmatprep.subr.bf16.mxu1 %v10352_v40 }
 0x39a   :  { %v4687_v37 = vpop.f32.mrf.mxu1 }
 0x39b   :  { %v11296_v19 = vadd.f32 %v4686_v24, %v11176_v44  ;;  %v4688_v60 = vadd.f32 %v4687_v37, %v11266_v4  ;;  %6157 = vmatpush1.bf16.msra.mxu0 %v10347_v21  ;;  %v10359_v44 = vld [vmem:[#allocation5 + $0x1348] ss:$16 sps:$4 sm:$0xff]  }
 0x39c   :  { %6120 = vmatpush2.bf16.msra.mxu1 %v10350_v11  ;;  %v4689_v16 = vpop.f32.mrf.mxu1  ;;  %6158 = vmatprep.subr.bf16.mxu0 %v10355_v32  ;;  %v10362_v4 = vld [vmem:[#allocation5 + $0x1248] ss:$16 sps:$4 sm:$0xff]  }
 0x39d   :  { %v11300_v62 = vadd.f32 %v4688_v60, %v11179_v0  ;;  %v4690_v17 = vadd.f32 %v4689_v16, %v11268_v12  ;;  %6121 = vmatprep.subr.bf16.mxu1 %v10358_v14  ;;  %v10368_v0 = vld [vmem:[#allocation5 + $0x1228] ss:$16 sps:$4 sm:$0xff]   ;;  %v10376_v12 = vld [vmem:[#allocation5 + $0x120c] ss:$16 sps:$4 sm:$0xff]  }
 0x39f   :  { %v11304_v61 = vadd.f32 %v4690_v17, %v11182_v54  ;;  %6159 = vmatpush1.bf16.msra.mxu0 %v10353_v15  ;;  %v10374_v54 = vld [vmem:[#allocation5 + $0x1208] ss:$16 sps:$4 sm:$0xff]  }
 0x3a0   :  { %6122 = vmatpush2.bf16.msra.mxu1 %v10356_v45  ;;  %6160 = vmatprep.subr.bf16.mxu0 %v10361_v30 }
 0x3a1   :  { %6123 = vmatprep.subr.bf16.mxu1 %v10364_v57 }
 0x3a3   :  { %6161 = vmatpush1.bf16.msra.mxu0 %v10359_v44 }
 0x3a4   :  { %6124 = vmatpush2.bf16.msra.mxu1 %v10362_v4  ;;  %6162 = vmatprep.subr.bf16.mxu0 %v10367_v59  ;;  %v6219_v59 = vlaneseq }
 0x3a5   :  { %6125 = vmatprep.subr.bf16.mxu1 %v10370_v42 }
 0x3a7   :  { %6163 = vmatpush1.bf16.msra.mxu0 %v10365_v46 }
 0x3a8   :  { %6126 = vmatpush2.bf16.msra.mxu1 %v10368_v0  ;;  %6164 = vmatprep.subr.bf16.mxu0 %v10373_v55  ;;  %v11350_v0 = vshrl.u32 %v6219_v59, 7 }
 0x3a9   :  { %6127 = vmatprep.subr.bf16.mxu1 %v10376_v12 }
 0x3ab   :  { %6165 = vmatpush1.bf16.msra.mxu0 %v10371_v7  ;;  %v6224_v7 = vand.u32 15, %v11350_v0 }
 0x3ac   :  { %6128 = vmatpush2.bf16.msra.mxu1 %v10374_v54 }
 0x3ad   :  { %v4726_v41 = vpop.f32.mrf.mxu0  ;;  %vm6228_vm10 = vcmp.lt.s32.totalorder %v6224_v7, 4 }
 0x3ae   :  { %6183 = vmatmul.mubr.bf16.vlgmr.msra.gmra.mxu0 %v10928_v36 }
 0x3af   :  { %6130 = vmatmul.mubr.bf16.vlgmr.msra.gmra.mxu1 %v10893_v63  ;;  %6192 = vmatprep.mubr.bf16.mxu0 %v11634_v13  ;;  %v4728_v3 = vpop.f32.mrf.mxu0 }
 0x3b0   :  { %6139 = vmatprep.mubr.bf16.mxu1 %v10885_v52 }
 0x3b1   :  { %v4730_v51 = vpop.f32.mrf.mxu0 }
 0x3b3   :  { %v4732_v5 = vpop.f32.mrf.mxu0 }
 0x3b5   :  { %v11313_v28 = vpop.f32.mrf.mxu0 }
 0x3b6   :  { %6193 = vmatmul.mubr.bf16.gmra.mxu0 %v10932_v31 }
 0x3b7   :  { %6140 = vmatmul.mubr.bf16.gmra.mxu1 %v10905_v6  ;;  %v11315_v39 = vpop.f32.mrf.mxu0 }
 0x3b8   :  { %6501 = vmatprep.mubr.bf16.mxu1 %v11634_v13 }
 0x3b9   :  { %v11317_v36 = vpop.f32.mrf.mxu0 }
 0x3bb   :  { %v11319_v63 = vpop.f32.mrf.mxu0 }
 0x3cd   :  { %v4832_v8 = vpop.f32.mrf.mxu0 }
 0x3ce   :  { %v4779_v9 = vpop.f32.mrf.mxu1 }
 0x3cf   :  { %v4780_v52 = vadd.f32 %v4779_v9, %v4726_v41  ;;  %v4834_v29 = vpop.f32.mrf.mxu0 }
 0x3d0   :  { %v4781_v2 = vpop.f32.mrf.mxu1 }
 0x3d1   :  { %v4833_v31 = vadd.f32 %v4832_v8, %v4780_v52  ;;  %v4782_v48 = vadd.f32 %v4781_v2, %v4728_v3  ;;  %v4836_v50 = vpop.f32.mrf.mxu0 }
 0x3d2   :  { %v4783_v6 = vpop.f32.mrf.mxu1 }
 0x3d3   :  { %v11322_v35 = vadd.f32 %v4833_v31, %v11219_v23  ;;  %v4835_v47 = vadd.f32 %v4834_v29, %v4782_v48  ;;  %v4784_v56 = vadd.f32 %v4783_v6, %v4730_v51  ;;  %v4838_v27 = vpop.f32.mrf.mxu0  ;;  %v6222_v51 = vadd.s32 16, %v11350_v0 }
 0x3d4   :  { %v4785_v40 = vpop.f32.mrf.mxu1  ;;  %v10670_v29 = vmov 0.0  }
 0x3d5   :  { %v11325_v18 = vadd.f32 %v4835_v47, %v11222_v1  ;;  %v4837_v10 = vadd.f32 %v4836_v50, %v4784_v56  ;;  %v4786_v21 = vadd.f32 %v4785_v40, %v4732_v5  ;;  %v11339_v60 = vpop.f32.mrf.mxu0  ;;  %v11355_v2 = vsel %vm6228_vm10, 1.0, %v10670_v29 }
 0x3d6   :  { %v11333_v14 = vpop.f32.mrf.mxu1  ;;  %v6226_v47 = vand.u32 15, %v6222_v51 }
 0x3d7   :  { %v11328_v11 = vadd.f32 %v4837_v10, %v11225_v53  ;;  %v4839_v32 = vadd.f32 %v4838_v27, %v4786_v21  ;;  %v11343_v16 = vpop.f32.mrf.mxu0 }
 0x3d8   :  { %v11335_v23 = vpop.f32.mrf.mxu1  ;;  %vm6230_vm11 = vcmp.lt.s32.totalorder %v6226_v47, 4 }
 0x3d9   :  { %v11331_v24 = vadd.f32 %v4839_v32, %v11228_v38  ;;  %v11345_v53 = vpop.f32.mrf.mxu0 }
 0x3da   :  { %v11337_v37 = vpop.f32.mrf.mxu1 }
 0x3db   :  { %v11347_v17 = vpop.f32.mrf.mxu0 }
 0x3dc   :  { %v11341_v1 = vpop.f32.mrf.mxu1 }
 0x40d   :  { %v5972_v38 = vpop.f32.mrf.mxu0 }
 0x40e   :  { %v5919_v15 = vpop.f32.mrf.mxu1 }
 0x40f   :  { %v5974_v44 = vpop.f32.mrf.mxu0  ;;  %v5973_v3 = vadd.f32 %v5972_v38, %v5919_v15 }
 0x410   :  { %v5921_v45 = vpop.f32.mrf.mxu1 }
 0x411   :  { %v5976_v42 = vpop.f32.mrf.mxu0  ;;  %v5975_v8 = vadd.f32 %v5974_v44, %v5921_v45 }
 0x412   :  { %v5923_v30 = vpop.f32.mrf.mxu1 }
 0x413   :  { %v5978_v55 = vpop.f32.mrf.mxu0  ;;  %v5977_v48 = vadd.f32 %v5976_v42, %v5923_v30 }
 0x414   :  { %v5925_v57 = vpop.f32.mrf.mxu1 }
 0x415   :  { %v5982_v54 = vpop.f32.mrf.mxu0  ;;  %v5979_v40 = vadd.f32 %v5978_v55, %v5925_v57 }
 0x416   :  { %v5929_v4 = vpop.f32.mrf.mxu1 }
 0x417   :  { %v5984_v9 = vpop.f32.mrf.mxu0  ;;  %v5983_v45 = vadd.f32 %v5982_v54, %v5929_v4  ;;  %v11376_v4 = vsel %vm6230_vm11, 1.0, %v10670_v29 }
 0x418   :  { %v5931_v46 = vpop.f32.mrf.mxu1 }
 0x419   :  { %v5986_v10 = vpop.f32.mrf.mxu0  ;;  %v5985_v7 = vadd.f32 %v5984_v9, %v5931_v46 }
 0x41a   :  { %v5933_v12 = vpop.f32.mrf.mxu1 }
 0x41b   :  { %v5988_v57 = vpop.f32.mrf.mxu0 }
 0x41c   :  { %v5935_v41 = vpop.f32.mrf.mxu1 }
 0x42f   :  { %v6025_v5 = vpop.f32.mrf.mxu1 }
 0x430   :  { %v6026_v52 = vadd.f32 %v6025_v5, %v5973_v3 }
 0x431   :  { %v6027_v31 = vpop.f32.mrf.mxu1 }
 0x432   :  { %v11358_v50 = vadd.f32 %v6026_v52, %v11274_v58  ;;  %v6028_v6 = vadd.f32 %v6027_v31, %v5975_v8  ;;  %v5987_v52 = vadd.f32 %v5986_v10, %v5933_v12  ;;  %v5989_v31 = vadd.f32 %v5988_v57, %v5935_v41 }
 0x433   :  { %v6029_v56 = vpop.f32.mrf.mxu1 }
 0x434   :  { %v11361_v21 = vadd.f32 %v6028_v6, %v11278_v49  ;;  %v6030_v27 = vadd.f32 %v6029_v56, %v5977_v48  ;;  %v6240_v32 = vmul.f32 %v11355_v2, %v11358_v50 }
 0x435   :  { %v6031_v15 = vpop.f32.mrf.mxu1 }
 0x436   :  { %v11366_v38 = vadd.f32 %v6030_v27, %v11282_v43  ;;  %v6032_v30 = vadd.f32 %v6031_v15, %v5979_v40  ;;  %v6241_v58 = vmul.f32 %v11355_v2, %v11361_v21  ;;  %v6292_v3 = vmul.f32 %v6240_v32, %v11358_v50 }
 0x437   :  { %v6035_v44 = vpop.f32.mrf.mxu1 }
 0x438   :  { %v6244_v42 = vmul.f32 0.0, %v11366_v38  ;;  %v11372_v49 = vadd.f32 %v6032_v30, %v11287_v25  ;;  %v6036_v55 = vadd.f32 %v6035_v44, %v5983_v45  ;;  %v6293_v25 = vmul.f32 %v6241_v58, %v11361_v21 }
 0x439   :  { %v6037_v43 = vpop.f32.mrf.mxu1 }
 0x43a   :  { %v6256_v54 = vadd.f32 %v6244_v42, %v6240_v32  ;;  %v6296_v51 = vmul.f32 %v6244_v42, %v11366_v38  ;;  %v6245_v5 = vmul.f32 0.0, %v11372_v49  ;;  %v11381_v8 = vadd.f32 %v6036_v55, %v11292_v20 }
 0x43b   :  { %v6038_v48 = vadd.f32 %v6037_v43, %v5985_v7  ;;  %v6039_v46 = vpop.f32.mrf.mxu1 }
 0x43c   :  { %v6308_v9 = vadd.f32 %v6296_v51, %v6292_v3  ;;  %v6265_v6 = vadd.f32 %v6245_v5, %v6241_v58  ;;  %v6297_v47 = vmul.f32 %v6245_v5, %v11372_v49  ;;  %v6248_v56 = vmul.f32 %v11376_v4, %v11381_v8 }
 0x43d   :  { %v11388_v40 = vadd.f32 %v6038_v48, %v11296_v19  ;;  %v6040_v27 = vadd.f32 %v6039_v46, %v5987_v52  ;;  %v6041_v32 = vpop.f32.mrf.mxu1 }
 0x43e   :  { %v6317_v20 = vadd.f32 %v6297_v47, %v6293_v25  ;;  %v6257_v15 = vadd.f32 %v6256_v54, %v6248_v56  ;;  %v6300_v12 = vmul.f32 %v6248_v56, %v11381_v8  ;;  %v6042_v41 = vadd.f32 %v6041_v32, %v5989_v31 }
 0x43f   :  { %v6249_v10 = vmul.f32 %v11376_v4, %v11388_v40  ;;  %v11394_v45 = vadd.f32 %v6040_v27, %v11300_v62 }
 0x440   :  { %v6309_v30 = vadd.f32 %v6308_v9, %v6300_v12  ;;  %v11397_v58 = vadd.f32 %v6042_v41, %v11304_v61 }
 0x441   :  { %v6266_v44 = vadd.f32 %v6265_v6, %v6249_v10  ;;  %v6301_v19 = vmul.f32 %v6249_v10, %v11388_v40  ;;  %v6252_v57 = vmul.f32 0.0, %v11394_v45 }
 0x442   :  { %v6253_v42 = vmul.f32 0.0, %v11397_v58 }
 0x443   :  { %v6318_v55 = vadd.f32 %v6317_v20, %v6301_v19  ;;  %v6258_v7 = vadd.f32 %v6257_v15, %v6252_v57  ;;  %v6304_v3 = vmul.f32 %v6252_v57, %v11394_v45 }
 0x444   :  { %v6267_v43 = vadd.f32 %v6266_v44, %v6253_v42  ;;  %v6305_v54 = vmul.f32 %v6253_v42, %v11397_v58 }
 0x445   :  { %v6259_v62 = vrot.slane %v6258_v7, 4  ;;  %v6310_v51 = vadd.f32 %v6309_v30, %v6304_v3 }
 0x446   :  { %v6268_v5 = vrot.slane %v6267_v43, 4  ;;  %v6319_v52 = vadd.f32 %v6318_v55, %v6305_v54 }
 0x447   :  { %v6260_v61 = vadd.f32 %v6259_v62, %v6258_v7  ;;  %v6311_v31 = vrot.slane %v6310_v51, 4 }
 0x448   :  { %v6269_v25 = vadd.f32 %v6268_v5, %v6267_v43  ;;  %v6320_v48 = vrot.slane %v6319_v52, 4  ;;  %v10377_v5 = vld [vmem:[#allocation10 + $0x178] sm:$0xff]  }
 0x449   :  { %v6261_v46 = vrot.slane %v6260_v61, 2  ;;  %v6312_v9 = vadd.f32 %v6311_v31, %v6310_v51  ;;  %9108 = vmatprep.subr.bf16.mxu0 %v10377_v5  ;;  %v4794_v5 = vadd.f32 %v11337_v37, %v11317_v36 }
 0x44a   :  { %v6270_v6 = vrot.slane %v6269_v25, 2  ;;  %v6321_v47 = vadd.f32 %v6320_v48, %v6319_v52  ;;  %v10378_v52 = vld [vmem:[#allocation10 + $0x138] sm:$0xff]   ;;  %v10381_v48 = vld [vmem:[#allocation10 + $0x168] sm:$0xff]  }
 0x44b   :  { %v6262_v56 = vadd.f32 %v6261_v46, %v6260_v61  ;;  %v6313_v27 = vrot.slane %v6312_v9, 2  ;;  %v10379_v61 = vld [vmem:[#allocation10 + $0x170] sm:$0xff]   ;;  %9109 = vmatpush3.bf16.msra.mxu0 %v10378_v52 }
 0x44c   :  { %v6271_v32 = vadd.f32 %v6270_v6, %v6269_v25  ;;  %v6322_v20 = vrot.slane %v6321_v47, 2  ;;  %v10380_v25 = vld [vmem:[#allocation10 + $0x130] sm:$0xff]   ;;  %9110 = vmatprep.subr.bf16.mxu0 %v10379_v61 }
 0x44d   :  { %v6263_v15 = vrot.slane %v6262_v56, 1  ;;  %v6314_v12 = vadd.f32 %v6313_v27, %v6312_v9  ;;  %v10383_v9 = vld [vmem:[#allocation10 + $0x128] sm:$0xff]  }
 0x44e   :  { %v6272_v41 = vrot.slane %v6271_v32, 1  ;;  %v6323_v10 = vadd.f32 %v6322_v20, %v6321_v47  ;;  %v6078_v42 = vpop.f32.mrf.mxu0 }
 0x44f   :  { %v6315_v44 = vrot.slane %v6314_v12, 1  ;;  %v6264_v30 = vadd.f32 %v6263_v15, %v6262_v56  ;;  %9111 = vmatpush3.bf16.msra.mxu0 %v10380_v25 }
 0x450   :  { %v6273_v19 = vadd.f32 %v6272_v41, %v6271_v32  ;;  %v6324_v57 = vrot.slane %v6323_v10, 1  ;;  %v6080_v54 = vpop.f32.mrf.mxu0  ;;  %9112 = vmatprep.subr.bf16.mxu0 %v10381_v48  ;;  %v4847_v48 = vadd.f32 %v11345_v53, %v4794_v5 }
 0x451   :  { %v6316_v55 = vadd.f32 %v6315_v44, %v6314_v12  ;;  %v4792_v44 = vadd.f32 %v11335_v23, %v11315_v39  ;;  %v4796_v23 = vadd.f32 %v11341_v1, %v11319_v63 }
 0x452   :  { %v6325_v7 = vadd.f32 %v6324_v57, %v6323_v10  ;;  %v11404_v3 = vadd.f32 %v6273_v19, %v6264_v30  ;;  %v6082_v62 = vpop.f32.mrf.mxu0  ;;  %v4790_v10 = vadd.f32 %v11333_v14, %v11313_v28 }
 0x453   :  { %9113 = vmatpush3.bf16.msra.mxu0 %v10383_v9  ;;  %v4845_v14 = vadd.f32 %v11343_v16, %v4792_v44 }
 0x454   :  { %v11406_v43 = vadd.f32 %v6325_v7, %v6316_v55  ;;  %v6084_v51 = vpop.f32.mrf.mxu0  ;;  %v4843_v28 = vadd.f32 %v11339_v60, %v4790_v10 }
 0x456   :  { %v6088_v31 = vpop.f32.mrf.mxu0  ;;  %v4861_v63 = vadd.f32 %v4843_v28, %v11231_v34 }
 0x458   :  { %v6090_v46 = vpop.f32.mrf.mxu0 }
 0x45a   :  { %v6092_v6 = vpop.f32.mrf.mxu0 }
 0x45c   :  { %v6094_v47 = vpop.f32.mrf.mxu0 }
 0x46e   :  { %v6184_v56 = vpop.f32.mrf.mxu0 }
 0x46f   :  { %v6131_v27 = vpop.f32.mrf.mxu1 }
 0x470   :  { %v6132_v32 = vadd.f32 %v6131_v27, %v6078_v42  ;;  %v6186_v20 = vpop.f32.mrf.mxu0 }
 0x471   :  { %v6133_v15 = vpop.f32.mrf.mxu1 }
 0x472   :  { %v6134_v12 = vadd.f32 %v6133_v15, %v6080_v54  ;;  %v6188_v41 = vpop.f32.mrf.mxu0  ;;  %v6185_v19 = vadd.f32 %v6184_v56, %v6132_v32  ;;  %v4849_v32 = vadd.f32 %v11347_v17, %v4796_v23 }
 0x473   :  { %v6135_v30 = vpop.f32.mrf.mxu1 }
 0x474   :  { %v6187_v57 = vadd.f32 %v6186_v20, %v6134_v12  ;;  %v6136_v55 = vadd.f32 %v6135_v30, %v6082_v62  ;;  %v6190_v7 = vpop.f32.mrf.mxu0  ;;  %v11422_v62 = vadd.f32 %v6185_v19, %v11322_v35  ;;  %v4862_v35 = vadd.f32 %v4845_v14, %v11234_v22 }
 0x475   :  { %v6137_v52 = vpop.f32.mrf.mxu1 }
 0x476   :  { %v11415_v42 = vadd.f32 %v6187_v57, %v11325_v18  ;;  %v6189_v54 = vadd.f32 %v6188_v41, %v6136_v55  ;;  %v6138_v61 = vadd.f32 %v6137_v52, %v6084_v51  ;;  %v6194_v25 = vpop.f32.mrf.mxu0  ;;  %v6242_v53 = vmul.f32 %v11355_v2, %v11422_v62 }
 0x477   :  { %v6141_v39 = vpop.f32.mrf.mxu1 }
 0x478   :  { %v11425_v36 = vadd.f32 %v6189_v54, %v11328_v11  ;;  %v6191_v37 = vadd.f32 %v6190_v7, %v6138_v61  ;;  %v6196_v18 = vpop.f32.mrf.mxu0  ;;  %v6142_v51 = vadd.f32 %v6141_v39, %v6088_v31  ;;  %v6243_v60 = vmul.f32 %v11355_v2, %v11415_v42 }
 0x479   :  { %v6143_v9 = vpop.f32.mrf.mxu1  ;;  %v6294_v57 = vmul.f32 %v6242_v53, %v11422_v62 }
 0x47a   :  { %v11431_v16 = vadd.f32 %v6191_v37, %v11331_v24  ;;  %v6144_v56 = vadd.f32 %v6143_v9, %v6090_v46  ;;  %v6246_v11 = vmul.f32 0.0, %v11425_v36  ;;  %v6195_v1 = vadd.f32 %v6194_v25, %v6142_v51  ;;  %v6198_v15 = vpop.f32.mrf.mxu0 }
 0x47b   :  { %v6145_v27 = vpop.f32.mrf.mxu1  ;;  %v4865_v24 = vadd.f32 %v4847_v48, %v11237_v33  ;;  %v6295_v22 = vmul.f32 %v6243_v60, %v11415_v42  ;;  %v4866_v33 = vadd.f32 %v4849_v32, %v11240_v26 }
 0x47c   :  { %v6247_v31 = vmul.f32 0.0, %v11431_v16  ;;  %v6197_v20 = vadd.f32 %v6196_v18, %v6144_v56  ;;  %v11441_v46 = vadd.f32 %v6195_v1, %v4861_v63  ;;  %v6146_v34 = vadd.f32 %v6145_v27, %v6092_v6  ;;  %v6200_v7 = vpop.f32.mrf.mxu0 }
 0x47d   :  { %v6147_v12 = vpop.f32.mrf.mxu1  ;;  %v6298_v17 = vmul.f32 %v6246_v11, %v11425_v36  ;;  %v6274_v5 = vadd.f32 %v6246_v11, %v6242_v53 }
 0x47e   :  { %v6283_v41 = vadd.f32 %v6247_v31, %v6243_v60  ;;  %v6299_v10 = vmul.f32 %v6247_v31, %v11431_v16  ;;  %v11445_v44 = vadd.f32 %v6197_v20, %v4862_v35  ;;  %v6250_v2 = vmul.f32 %v11376_v4, %v11441_v46 }
 0x47f   :  { %v6199_v30 = vadd.f32 %v6198_v15, %v6146_v34  ;;  %v6148_v19 = vadd.f32 %v6147_v12, %v6094_v47  ;;  %v6326_v14 = vadd.f32 %v6298_v17, %v6294_v57 }
 0x480   :  { %v6335_v6 = vadd.f32 %v6299_v10, %v6295_v22  ;;  %v6251_v55 = vmul.f32 %v11376_v4, %v11445_v44  ;;  %v6302_v52 = vmul.f32 %v6250_v2, %v11441_v46  ;;  %v6275_v47 = vadd.f32 %v6274_v5, %v6250_v2 }
 0x481   :  { %v11455_v54 = vadd.f32 %v6199_v30, %v4865_v24  ;;  %v6201_v61 = vadd.f32 %v6200_v7, %v6148_v19 }
 0x482   :  { %v6284_v25 = vadd.f32 %v6283_v41, %v6251_v55  ;;  %v6303_v28 = vmul.f32 %v6251_v55, %v11445_v44  ;;  %v6327_v37 = vadd.f32 %v6326_v14, %v6302_v52 }
 0x483   :  { %v6254_v26 = vmul.f32 0.0, %v11455_v54  ;;  %v6218_v39 = vadd.f32 %v6201_v61, %v4866_v33 }
 0x484   :  { %v6336_v23 = vadd.f32 %v6335_v6, %v6303_v28 }
 0x485   :  { %v6276_v18 = vadd.f32 %v6275_v47, %v6254_v26  ;;  %v6306_v4 = vmul.f32 %v6254_v26, %v11455_v54  ;;  %v6255_v48 = vmul.f32 0.0, %v6218_v39 }
 0x487   :  { %v6277_v51 = vrot.slane %v6276_v18, 4  ;;  %v6328_v9 = vadd.f32 %v6327_v37, %v6306_v4  ;;  %v6285_v60 = vadd.f32 %v6284_v25, %v6255_v48  ;;  %v6307_v56 = vmul.f32 %v6255_v48, %v6218_v39 }
 0x488   :  { %v11466_v37 = vmul.u32 16, %v11350_v0 }
 0x489   :  { %v6278_v63 = vadd.f32 %v6277_v51, %v6276_v18  ;;  %v6329_v35 = vrot.slane %v6328_v9, 4  ;;  %v6286_v11 = vrot.slane %v6285_v60, 4  ;;  %v6337_v1 = vadd.f32 %v6336_v23, %v6307_v56  ;;  %v6359_v51 = vld [vmem:[#allocation8] sm:$0x1] }
 0x48a   :  { %v11463_v23 = vand.u32 127, %v6219_v59 }
 0x48b   :  { %v6279_v27 = vrot.slane %v6278_v63, 2  ;;  %v6330_v32 = vadd.f32 %v6329_v35, %v6328_v9  ;;  %v6287_v53 = vadd.f32 %v6286_v11, %v6285_v60  ;;  %v6338_v31 = vrot.slane %v6337_v1, 4 }
 0x48c   :  { %vm6461_vm12 = vcmp.eq.s32.totalorder %v11463_v23, %v11466_v37 }
 0x48d   :  { %v6280_v20 = vadd.f32 %v6279_v27, %v6278_v63  ;;  %v6331_v15 = vrot.slane %v6330_v32, 2  ;;  %v6288_v24 = vrot.slane %v6287_v53, 2  ;;  %v6339_v34 = vadd.f32 %v6338_v31, %v6337_v1 }
 0x48e   :  { %v8939_v48 = vsel %vm6461_vm12, 1.0, %v10670_v29 }
 0x48f   :  { %v6281_v12 = vrot.slane %v6280_v20, 1  ;;  %v6332_v22 = vadd.f32 %v6331_v15, %v6330_v32  ;;  %v6289_v41 = vadd.f32 %v6288_v24, %v6287_v53  ;;  %v6340_v10 = vrot.slane %v6339_v34, 2 }
 0x490   :  { %v11474_v56 = vpack.c.bf16 %v8939_v48, %v8939_v48 }
 0x491   :  { %v6282_v17 = vadd.f32 %v6281_v12, %v6280_v20  ;;  %v6333_v2 = vrot.slane %v6332_v22, 1  ;;  %v6290_v30 = vrot.slane %v6289_v41, 1  ;;  %v6341_v19 = vadd.f32 %v6340_v10, %v6339_v34 }
 0x493   :  { %v6334_v33 = vadd.f32 %v6333_v2, %v6332_v22  ;;  %v6345_v57 = vadd.f32 %v11404_v3, %v6282_v17  ;;  %v6291_v6 = vadd.f32 %v6290_v30, %v6289_v41  ;;  %v6342_v55 = vrot.slane %v6341_v19, 1  ;;  %v6357_v3 = vld [vmem:[#allocation7] sm:$0x1] }
 0x495   :  { %v6348_v7 = vadd.f32 %v11406_v43, %v6334_v33  ;;  %v6343_v5 = vadd.f32 %v6342_v55, %v6341_v19  ;;  %v6346_v52 = vadd.f32 %v6345_v57, %v6291_v6  ;;  %v6364_v43 = vsub.s32 0, %v11350_v0 }
 0x497   :  { %v6349_v61 = vadd.f32 %v6348_v7, %v6343_v5  ;;  %v6351_v25 = vmul.f32 0.03125, %v6346_v52 }
 0x499   :  { %v6352_v28 = vmul.f32 0.03125, %v6349_v61  ;;  %v6353_v14 = vmul.f32 %v6351_v25, %v6351_v25 }
 0x49b   :  { %v6354_v47 = vsub.f32 %v6352_v28, %v6353_v14 }
 0x49d   :  { %v6355_v26 = vadd.f32 1e-05, %v6354_v47 }
 0x49f   :  { %10505 = vrsqrt.f32 %v6355_v26 }
 0x4ac   :  { %v10506_v18 = vpop.eup %10505 }
 0x4ad   :  { %v6358_v4 = vmul.f32 %v10506_v18, %v6357_v3 }
 0x4af   :  { %v6360_v9 = vmul.f32 %v6358_v4, %v6351_v25  ;;  %v11472_v60 = vrot.slane %v6358_v4, %v6364_v43 }
 0x4b1   :  { %v6361_v59 = vsub.f32 %v6359_v51, %v6360_v9  ;;  %v6381_v63 = vmul.f32 %v11472_v60, %v6218_v39  ;;  %v6375_v35 = vmul.f32 %v11472_v60, %v11388_v40  ;;  %v6379_v11 = vmul.f32 %v11472_v60, %v11397_v58 }
 0x4b2   :  { %v6374_v0 = vmul.f32 %v11472_v60, %v11381_v8  ;;  %v6378_v1 = vmul.f32 %v11472_v60, %v11394_v45  ;;  %v6367_v27 = vmul.f32 %v11472_v60, %v11361_v21  ;;  %v6371_v32 = vmul.f32 %v11472_v60, %v11372_v49 }
 0x4b3   :  { %v11489_v53 = vrot.slane %v6361_v59, %v6364_v43  ;;  %v6366_v40 = vmul.f32 %v11472_v60, %v11358_v50  ;;  %v6370_v58 = vmul.f32 %v11472_v60, %v11366_v38  ;;  %v6377_v8 = vmul.f32 %v11472_v60, %v11445_v44 }
 0x4b4   :  { %v6376_v45 = vmul.f32 %v11472_v60, %v11441_v46  ;;  %v6380_v21 = vmul.f32 %v11472_v60, %v11455_v54  ;;  %v6369_v49 = vmul.f32 %v11472_v60, %v11415_v42  ;;  %v6373_v39 = vmul.f32 %v11472_v60, %v11431_v16 }
 0x4b5   :  { %v6401_v50 = vadd.f32 %v11489_v53, %v6381_v63  ;;  %v6395_v31 = vadd.f32 %v11489_v53, %v6375_v35  ;;  %v6399_v38 = vadd.f32 %v11489_v53, %v6379_v11  ;;  %v6394_v44 = vadd.f32 %v11489_v53, %v6374_v0 }
 0x4b6   :  { %v6398_v20 = vadd.f32 %v11489_v53, %v6378_v1  ;;  %v6387_v46 = vadd.f32 %v11489_v53, %v6367_v27  ;;  %v6391_v54 = vadd.f32 %v11489_v53, %v6371_v32  ;;  %v6386_v15 = vadd.f32 %v11489_v53, %v6366_v40 }
 0x4b7   :  { %vm6411_vm13 = vcmp.ge.f32.partialorder %v6395_v31, 0.0  ;;  %vm6415_vm14 = vcmp.ge.f32.partialorder %v6399_v38, 0.0  ;;  %v6427_v42 = vmul.f32 0.2, %v6395_v31  ;;  %v6431_v16 = vmul.f32 0.2, %v6399_v38 }
 0x4b8   :  { %vm6410_vm15 = vcmp.ge.f32.partialorder %v6394_v44, 0.0  ;;  %vm6414_vm0 = vcmp.ge.f32.partialorder %v6398_v20, 0.0  ;;  %v6426_v24 = vmul.f32 0.2, %v6394_v44  ;;  %v6430_v34 = vmul.f32 0.2, %v6398_v20 }
 0x4b9   :  { %v6443_v12 = vsel %vm6411_vm13, %v6395_v31, %v6427_v42  ;;  %v6447_v22 = vsel %vm6415_vm14, %v6399_v38, %v6431_v16  ;;  %vm6403_vm1 = vcmp.ge.f32.partialorder %v6387_v46, 0.0  ;;  %vm6407_vm2 = vcmp.ge.f32.partialorder %v6391_v54, 0.0  ;;  %v10384_v38 = vld [vmem:[#allocation10 + $0x1b8] sm:$0xff]   ;;  %v10390_v42 = vld [vmem:[#allocation10 + $0x1e8] sm:$0xff]  }
 0x4ba   :  { %v11513_v41 = vpack.c.bf16 %v6447_v22, %v6443_v12  ;;  %v6442_v10 = vsel %vm6410_vm15, %v6394_v44, %v6426_v24  ;;  %v6446_v17 = vsel %vm6414_vm0, %v6398_v20, %v6430_v34  ;;  %v6419_v2 = vmul.f32 0.2, %v6387_v46  ;;  %v10385_v44 = vld [vmem:[#allocation10 + $0x160] sm:$0xff]   ;;  %v10386_v20 = vld [vmem:[#allocation10 + $0x1f0] sm:$0xff]   ;;  %v10391_v16 = vld [vmem:[#allocation10 + $0x118] sm:$0xff]  }
 0x4bb   :  { %v11515_v30 = vpack.c.bf16 %v6446_v17, %v6442_v10  ;;  %v6423_v19 = vmul.f32 0.2, %v6391_v54  ;;  %v6390_v33 = vadd.f32 %v11489_v53, %v6370_v58  ;;  %vm6402_vm4 = vcmp.ge.f32.partialorder %v6386_v15, 0.0  ;;  %9114 = vmatprep.subr.bf16.mxu0 %v10385_v44  ;;  %v10392_v24 = vld [vmem:[#allocation10 + $0x1a8] sm:$0xff]   ;;  %v10393_v34 = vld [vmem:[#allocation10 + $0x150] sm:$0xff]   ;;  %v10394_v12 = vld [vmem:[#allocation10 + $0x1e0] sm:$0xff]  }
 0x4bc   :  { %6481 = vmatprep.subr.bf16.mxu1 %v11513_v41  ;;  %v6435_v57 = vsel %vm6403_vm1, %v6387_v46, %v6419_v2  ;;  %v6418_v6 = vmul.f32 0.2, %v6386_v15  ;;  %v6397_v55 = vadd.f32 %v11489_v53, %v6377_v8  ;;  %vm6417_vm5 = vcmp.ge.f32.partialorder %v6401_v50, 0.0  ;;  %v10387_v46 = vld [vmem:[#allocation10 + $0x120] sm:$0xff]   ;;  %v10395_v22 = vld [vmem:[#allocation10 + $0x110] sm:$0xff]   ;;  %v10397_v17 = vld [vmem:[#allocation10 + $0x148] sm:$0xff]  }
 0x4bd   :  { %6482 = vmatpush1.bf16.msra.mxu1 %v11515_v30  ;;  %v6439_v7 = vsel %vm6407_vm2, %v6391_v54, %v6423_v19  ;;  %vm6406_vm6 = vcmp.ge.f32.partialorder %v6390_v33, 0.0  ;;  %v6422_v5 = vmul.f32 0.2, %v6390_v33  ;;  %v6433_v52 = vmul.f32 0.2, %v6401_v50  ;;  %v10388_v54 = vld [vmem:[#allocation10 + $0x1b0] sm:$0xff]   ;;  %9115 = vmatpush3.bf16.msra.mxu0 %v10387_v46 }
 0x4be   :  { %v11522_v61 = vpack.c.bf16 %v6439_v7, %v6435_v57  ;;  %v6434_v25 = vsel %vm6402_vm4, %v6386_v15, %v6418_v6  ;;  %vm6413_vm7 = vcmp.ge.f32.partialorder %v6397_v55, 0.0  ;;  %v6429_v28 = vmul.f32 0.2, %v6397_v55  ;;  %v10389_v15 = vld [vmem:[#allocation10 + $0x158] sm:$0xff]   ;;  %v10396_v10 = vld [vmem:[#allocation10 + $0x1a0] sm:$0xff]   ;;  %v10399_v19 = vld [vmem:[#allocation10 + $0x108] sm:$0xff]  }
 0x4bf   :  { %v6438_v14 = vsel %vm6406_vm6, %v6390_v33, %v6422_v5  ;;  %v6449_v47 = vsel %vm6417_vm5, %v6401_v50, %v6433_v52  ;;  %v6396_v26 = vadd.f32 %v11489_v53, %v6376_v45  ;;  %v6400_v3 = vadd.f32 %v11489_v53, %v6380_v21  ;;  %9116 = vmatprep.subr.bf16.mxu0 %v10389_v15  ;;  %v10398_v2 = vld [vmem:[#allocation10 + $0x1d8] sm:$0xff]   ;;  %v10401_v57 = vld [vmem:[#allocation10 + $0x140] sm:$0xff]   ;;  %v10402_v6 = vld [vmem:[#allocation10 + $0x1d0] sm:$0xff]  }
 0x4c0   :  { %6483 = vmatprep.subr.bf16.mxu1 %v11522_v61  ;;  %v11527_v43 = vpack.c.bf16 %v6438_v14, %v6434_v25  ;;  %v6445_v18 = vsel %vm6413_vm7, %v6397_v55, %v6429_v28  ;;  %v6389_v4 = vadd.f32 %v11489_v53, %v6369_v49  ;;  %v6393_v48 = vadd.f32 %v11489_v53, %v6373_v39  ;;  %v10400_v33 = vld [vmem:[#allocation10 + $0x198] sm:$0xff]   ;;  %v10403_v55 = vld [vmem:[#allocation10 + $0x100] sm:$0xff]   ;;  %v10404_v7 = vld [vmem:[#allocation10 + $0x190] sm:$0xff]  }
 0x4c1   :  { %v11531_v51 = vpack.c.bf16 %v6449_v47, %v6445_v18  ;;  %vm6412_vm8 = vcmp.ge.f32.partialorder %v6396_v26, 0.0  ;;  %vm6416_vm9 = vcmp.ge.f32.partialorder %v6400_v3, 0.0  ;;  %v6428_v9 = vmul.f32 0.2, %v6396_v26  ;;  %9117 = vmatpush3.bf16.msra.mxu0 %v10391_v16  ;;  %v10405_v5 = vld [vmem:[#allocation10 + $0x1c8] sm:$0xff]   ;;  %v10406_v52 = vld [vmem:[#allocation10 + $0x78] sm:$0xff]  }
 0x4c2   :  { %6484 = vmatpush1.bf16.msra.mxu1 %v11527_v43  ;;  %v6432_v59 = vmul.f32 0.2, %v6400_v3  ;;  %vm6405_vm10 = vcmp.ge.f32.partialorder %v6389_v4, 0.0  ;;  %vm6409_vm11 = vcmp.ge.f32.partialorder %v6393_v48, 0.0  ;;  %v6421_v63 = vmul.f32 0.2, %v6389_v4  ;;  %9118 = vmatprep.subr.bf16.mxu0 %v10393_v34 }
 0x4c3   :  { %6522 = vmatprep.subr.bf16.mxu1 %v11531_v51  ;;  %v6444_v35 = vsel %vm6412_vm8, %v6396_v26, %v6428_v9  ;;  %v6425_v11 = vmul.f32 0.2, %v6393_v48  ;;  %v6368_v0 = vmul.f32 %v11472_v60, %v11422_v62  ;;  %v6372_v1 = vmul.f32 %v11472_v60, %v11425_v36  ;;  %v10407_v25 = vld [vmem:[#allocation10 + $0x188] sm:$0xff]   ;;  %v10409_v28 = vld [vmem:[#allocation10 + $0x1c0] sm:$0xff]   ;;  %v10414_v47 = vld [vmem:[#allocation10 + $0xf8] sm:$0xff]  }
 0x4c4   :  { %v6448_v27 = vsel %vm6416_vm9, %v6400_v3, %v6432_v59  ;;  %v6437_v32 = vsel %vm6405_vm10, %v6389_v4, %v6421_v63  ;;  %v6619_v39 = vadd.s32 1, %v11466_v37  ;;  %v10411_v14 = vld [vmem:[#allocation10 + $0x180] sm:$0xff]   ;;  %v10421_v16 = vld [vmem:[#allocation10 + $0x58] sm:$0xff]  }
 0x4c5   :  { %8940 = vmatmul.mubr.msk.bf16.vlgmr.msra.gmra.mxu1 %vm6465_vm3, %v11474_v56  ;;  %v11541_v40 = vpack.c.bf16 %v6448_v27, %v6444_v35  ;;  %v6441_v58 = vsel %vm6409_vm11, %v6393_v48, %v6425_v11  ;;  %v6388_v8 = vadd.f32 %v11489_v53, %v6368_v0  ;;  %v6392_v45 = vadd.f32 %v11489_v53, %v6372_v1  ;;  %v10408_v1 = vld [vmem:[#allocation10 + $0x38] sm:$0xff]   ;;  %v10419_v15 = vld [vmem:[#allocation10 + $0x20] sm:$0xff]  }
 0x4c6   :  { %v11545_v21 = vpack.c.bf16 %v6441_v58, %v6437_v32  ;;  %6542 = vmatprep.mubr.bf16.mxu1 %v11634_v13  ;;  %vm6620_vm14 = vcmp.eq.s32.totalorder %v11463_v23, %v6619_v39  ;;  %9119 = vmatpush3.bf16.msra.mxu0 %v10395_v22  ;;  %v10410_v58 = vld [vmem:[#allocation10 + $0x70] sm:$0xff]   ;;  %v10423_v34 = vld [vmem:[#allocation10 + $0x18] sm:$0xff]  }
 0x4c7   :  { %6523 = vmatpush1.bf16.msra.mxu1 %v11541_v40  ;;  %vm6404_vm12 = vcmp.ge.f32.partialorder %v6388_v8, 0.0  ;;  %vm6408_vm13 = vcmp.ge.f32.partialorder %v6392_v45, 0.0  ;;  %v6420_v62 = vmul.f32 0.2, %v6388_v8  ;;  %v6424_v36 = vmul.f32 0.2, %v6392_v45  ;;  %9120 = vmatprep.subr.bf16.mxu0 %v10397_v17 }
 0x4c8   :  { %6524 = vmatprep.subr.bf16.mxu1 %v11545_v21  ;;  %v8942_v53 = vsel %vm6620_vm14, 1.0, %v10670_v29  ;;  %v10425_v22 = vld [vmem:[#allocation10 + $0x50] sm:$0xff]  }
 0x4c9   :  { %v6436_v60 = vsel %vm6404_vm12, %v6388_v8, %v6420_v62  ;;  %v6440_v49 = vsel %vm6408_vm13, %v6392_v45, %v6424_v36  ;;  %v6623_v31 = vpack.c.bf16 %v8942_v53, %v8942_v53  ;;  %v10412_v62 = vld [vmem:[#allocation10 + $0x30] sm:$0xff]  }
 0x4ca   :  { %v11551_v50 = vpack.c.bf16 %v6440_v49, %v6436_v60  ;;  %9121 = vmatpush3.bf16.msra.mxu0 %v10399_v19  ;;  %v10413_v60 = vld [vmem:[#allocation10 + $0x68] sm:$0xff]   ;;  %v10427_v17 = vld [vmem:[#allocation10 + $0x10] sm:$0xff]  }
 0x4cb   :  { %9122 = vmatprep.subr.bf16.mxu0 %v10401_v57  ;;  %v10429_v19 = vld [vmem:[#allocation10 + $0x48] sm:$0xff]  }
 0x4cc   :  { %6525 = vmatpush1.bf16.msra.mxu1 %v11551_v50  ;;  %v10431_v57 = vld [vmem:[#allocation10 + $0x8] sm:$0xff]  }
 0x4cd   :  { %6639 = vmatprep.subr.bf16.mxu1 %v11513_v41 }
 0x4ce   :  { %9123 = vmatpush3.bf16.msra.mxu0 %v10403_v55  ;;  %v10433_v55 = vld [vmem:[#allocation10 + $0x40] sm:$0xff]  }
 0x4cf   :  { %8941 = vmatmul.mubr.msk.bf16.vlgmr.msra.gmra.mxu1 %vm6465_vm3, %v11474_v56  ;;  %v10382_v56 = vld [vmem:[#allocation10 + $0x1f8] sm:$0xff]   ;;  %9152 = vmatprep.subr.bf16.mxu0 %v10406_v52  ;;  %v10436_v52 = vld [vmem:[#allocation10 + $0x90] sm:$0xff]  }
 0x4d0   :  { %6640 = vmatpush1.bf16.msra.mxu1 %v11515_v30  ;;  %6659 = vmatprep.mubr.bf16.mxu1 %v11634_v13 }
 0x4d1   :  { %6641 = vmatprep.subr.bf16.mxu1 %v11522_v61 }
 0x4d4   :  { %6642 = vmatpush1.bf16.msra.mxu1 %v11527_v43 }
 0x4d5   :  { %6680 = vmatprep.subr.bf16.mxu1 %v11531_v51 }
 0x4d7   :  { %8943 = vmatmul.mubr.msk.bf16.vlgmr.msra.gmra.mxu1 %vm6465_vm3, %v6623_v31 }
 0x4d8   :  { %6681 = vmatpush1.bf16.msra.mxu1 %v11541_v40  ;;  %6700 = vmatprep.mubr.bf16.mxu1 %v11634_v13 }
 0x4d9   :  { %6682 = vmatprep.subr.bf16.mxu1 %v11545_v21 }
 0x4dc   :  { %6683 = vmatpush1.bf16.msra.mxu1 %v11551_v50 }
 0x4dd   :  { %9130 = vmatprep.subr.bf16.mxu1 %v10382_v56  ;;  %v10416_v56 = vld [vmem:[#allocation10 + $0xb8] sm:$0xff]  }
 0x4df   :  { %8944 = vmatmul.mubr.msk.bf16.vlgmr.msra.gmra.mxu1 %vm6465_vm3, %v6623_v31  ;;  %v10415_v31 = vld [vmem:[#allocation10 + $0x28] sm:$0xff]  }
 0x4e0   :  { %9131 = vmatpush3.bf16.msra.mxu1 %v10384_v38  ;;  %v10417_v38 = vld [vmem:[#allocation10 + $0x60] sm:$0xff]  }
 0x4e1   :  { %9132 = vmatprep.subr.bf16.mxu1 %v10386_v20  ;;  %v10418_v20 = vld [vmem:[#allocation10 + $0xf0] sm:$0xff]  }
 0x4e4   :  { %9133 = vmatpush3.bf16.msra.mxu1 %v10388_v54 }
 0x4e5   :  { %9134 = vmatprep.subr.bf16.mxu1 %v10390_v42  ;;  %v10420_v42 = vld [vmem:[#allocation10 + $0xb0] sm:$0xff]  }
 0x4e8   :  { %9135 = vmatpush3.bf16.msra.mxu1 %v10392_v24  ;;  %v10422_v24 = vld [vmem:[#allocation10 + $0xe8] sm:$0xff]  }
 0x4e9   :  { %9136 = vmatprep.subr.bf16.mxu1 %v10394_v12  ;;  %v10424_v12 = vld [vmem:[#allocation10 + $0xa8] sm:$0xff]  }
 0x4ec   :  { %9137 = vmatpush3.bf16.msra.mxu1 %v10396_v10  ;;  %v10426_v10 = vld [vmem:[#allocation10 + $0xe0] sm:$0xff]  }
 0x4ed   :  { %9138 = vmatprep.subr.bf16.mxu1 %v10398_v2  ;;  %v10428_v2 = vld [vmem:[#allocation10 + $0xa0] sm:$0xff]  }
 0x4f0   :  { %9139 = vmatpush3.bf16.msra.mxu1 %v10400_v33  ;;  %v10430_v33 = vld [vmem:[#allocation10 + $0xd8] sm:$0xff]  }
 0x4f1   :  { %9140 = vmatprep.subr.bf16.mxu1 %v10402_v6  ;;  %v10432_v6 = vld [vmem:[#allocation10 + $0x98] sm:$0xff]  }
 0x4f4   :  { %9141 = vmatpush3.bf16.msra.mxu1 %v10404_v7  ;;  %v10434_v7 = vld [vmem:[#allocation10 + $0xd0] sm:$0xff]  }
 0x4f5   :  { %9142 = vmatprep.subr.bf16.mxu1 %v10405_v5  ;;  %v10435_v5 = vld [vmem:[#allocation10] sm:$0xff]  }
 0x4f8   :  { %9143 = vmatpush3.bf16.msra.mxu1 %v10407_v25  ;;  %v10437_v25 = vld [vmem:[#allocation10 + $0xc8] sm:$0xff]  }
 0x4f9   :  { %9144 = vmatprep.subr.bf16.mxu1 %v10409_v28  ;;  %v7322_v28 = vadd.s32 2, %v11466_v37 }
 0x4fb   :  { %vm7323_vm15 = vcmp.eq.s32.totalorder %v11463_v23, %v7322_v28 }
 0x4fc   :  { %9145 = vmatpush3.bf16.msra.mxu1 %v10411_v14  ;;  %v10438_v14 = vld [vmem:[#allocation10 + $0x88] sm:$0xff]  }
 0x4fd   :  { %9174 = vmatprep.subr.bf16.mxu1 %v10414_v47 }
 0x585   :  { %v11570_v26 = vpop.f32.mrf.mxu1 }
 0x586   :  { %v6551_v47 = vpack.c.bf16 %v11570_v26, %v11570_v26 }
 0x587   :  { %v6505_v3 = vpop.f32.mrf.mxu1 }
 0x588   :  { %v6552_v8 = vpack.c.bf16 %v6505_v3, %v6505_v3  ;;  %v10439_v3 = vld [vmem:[#allocation10 + $0xc0] sm:$0xff]  }
 0x589   :  { %v6507_v18 = vpop.f32.mrf.mxu1 }
 0x58a   :  { %v10440_v18 = vld [vmem:[#allocation10 + $0x80] sm:$0xff]  }
 0x58b   :  { %v6508_v4 = vpop.f32.mrf.mxu1 }
 0x58c   :  { %v9009_v4 = vsel %vm7323_vm15, 1.0, %v10670_v29 }
 0x58d   :  { %v7326_v26 = vpack.c.bf16 %v9009_v4, %v9009_v4 }
 0x58f   :  { %v11572_v48 = vpop.f32.mrf.mxu1 }
 0x591   :  { %v6546_v9 = vpop.f32.mrf.mxu1 }
 0x592   :  { %v6554_v46 = vpack.c.bf16 %v6546_v9, %v6546_v9  ;;  %v10441_v9 = vld [vmem:[#allocation10 + $0x278] sm:$0xff]  }
 0x593   :  { %v6548_v59 = vpop.f32.mrf.mxu1 }
 0x594   :  { %v10442_v59 = vld [vmem:[#allocation10 + $0x238] sm:$0xff]  }
 0x595   :  { %v6549_v63 = vpop.f32.mrf.mxu1 }
 0x596   :  { %v6553_v63 = vpack.c.bf16 %v11572_v48, %v11572_v48  ;;  %v10447_v48 = vld [vmem:[#allocation10 + $0x228] sm:$0xff]  }
 0x597   :  { %v6661_v35 = vpop.f32.mrf.mxu1 }
 0x598   :  { %v6709_v27 = vpack.c.bf16 %v6661_v35, %v6661_v35  ;;  %v10443_v35 = vld [vmem:[#allocation10 + $0x270] sm:$0xff]  }
 0x599   :  { %v6663_v11 = vpop.f32.mrf.mxu1 }
 0x59a   :  { %v6710_v0 = vpack.c.bf16 %v6663_v11, %v6663_v11  ;;  %v10444_v11 = vld [vmem:[#allocation10 + $0x230] sm:$0xff]  }
 0x59b   :  { %v6665_v32 = vpop.f32.mrf.mxu1 }
 0x59c   :  { %7002 = vmatprep.mubr.bf16.mxu0 %v6710_v0  ;;  %v10445_v0 = vld [vmem:[#allocation10 + $0x268] sm:$0xff]   ;;  %v10449_v32 = vld [vmem:[#allocation10 + $0x260] sm:$0xff]  }
 0x59d   :  { %v6666_v45 = vpop.f32.mrf.mxu1  ;;  %7003 = vmatmul.mubr.bf16.vlgmr.msra.gmra.mxu0 %v6709_v27  ;;  %v10448_v27 = vld [vmem:[#allocation10 + $0x2b8] sm:$0xff]  }
 0x59e   :  { %9153 = vmatpush3.bf16.msra.mxu0 %v10408_v1  ;;  %7274 = vmatprep.mubr.bf16.mxu0 %v6552_v8  ;;  %v10446_v1 = vld [vmem:[#allocation10 + $0x2f8] sm:$0xff]   ;;  %v10451_v8 = vld [vmem:[#allocation10 + $0x220] sm:$0xff]   ;;  %v10452_v45 = vld [vmem:[#allocation10 + $0x2b0] sm:$0xff]  }
 0x59f   :  { %v6702_v36 = vpop.f32.mrf.mxu1  ;;  %9154 = vmatprep.subr.bf16.mxu0 %v10410_v58  ;;  %v10450_v58 = vld [vmem:[#allocation10 + $0x2f0] sm:$0xff]  }
 0x5a0   :  { %v6711_v49 = vpack.c.bf16 %v6702_v36, %v6702_v36  ;;  %v10454_v36 = vld [vmem:[#allocation10 + $0x2e8] sm:$0xff]  }
 0x5a1   :  { %v6704_v39 = vpop.f32.mrf.mxu1 }
 0x5a2   :  { %v6712_v53 = vpack.c.bf16 %v6704_v39, %v6704_v39  ;;  %9155 = vmatpush3.bf16.msra.mxu0 %v10412_v62  ;;  %v10453_v62 = vld [vmem:[#allocation10 + $0x258] sm:$0xff]   ;;  %v10457_v39 = vld [vmem:[#allocation10 + $0x250] sm:$0xff]  }
 0x5a3   :  { %9156 = vmatprep.subr.bf16.mxu0 %v10413_v60  ;;  %v6706_v44 = vpop.f32.mrf.mxu1  ;;  %v10455_v60 = vld [vmem:[#allocation10 + $0x218] sm:$0xff]  }
 0x5a4   :  { %7042 = vmatprep.mubr.bf16.mxu1 %v6712_v53  ;;  %v10458_v53 = vld [vmem:[#allocation10 + $0x2e0] sm:$0xff]   ;;  %v10462_v44 = vld [vmem:[#allocation10 + $0x2d8] sm:$0xff]  }
 0x5a5   :  { %7043 = vmatmul.mubr.bf16.vlgmr.msra.gmra.mxu1 %v6711_v49  ;;  %v6707_v54 = vpop.f32.mrf.mxu1  ;;  %v10456_v49 = vld [vmem:[#allocation10 + $0x2a8] sm:$0xff]  }
 0x5a6   :  { %9157 = vmatpush3.bf16.msra.mxu0 %v10415_v31  ;;  %9175 = vmatpush3.bf16.msra.mxu1 %v10416_v56  ;;  %v10459_v31 = vld [vmem:[#allocation10 + $0x210] sm:$0xff]   ;;  %v10460_v56 = vld [vmem:[#allocation10 + $0x2a0] sm:$0xff]  }
 0x5a7   :  { %7314 = vmatprep.mubr.bf16.mxu1 %v6554_v46  ;;  %9158 = vmatprep.subr.bf16.mxu0 %v10417_v38  ;;  %v10461_v38 = vld [vmem:[#allocation10 + $0x248] sm:$0xff]   ;;  %v10464_v46 = vld [vmem:[#allocation10 + $0x298] sm:$0xff]   ;;  %v10465_v54 = vld [vmem:[#allocation10 + $0x240] sm:$0xff]  }
 0x5a8   :  { %9176 = vmatprep.subr.bf16.mxu1 %v10418_v20  ;;  %v10463_v20 = vld [vmem:[#allocation10 + $0x208] sm:$0xff]  }
 0x5aa   :  { %9159 = vmatpush3.bf16.msra.mxu0 %v10419_v15  ;;  %9177 = vmatpush3.bf16.msra.mxu1 %v10420_v42  ;;  %v10466_v15 = vld [vmem:[#allocation10 + $0x2d0] sm:$0xff]   ;;  %v10467_v42 = vld [vmem:[#allocation10 + $0x200] sm:$0xff]  }
 0x5ab   :  { %9160 = vmatprep.subr.bf16.mxu0 %v10421_v16  ;;  %9178 = vmatprep.subr.bf16.mxu1 %v10422_v24  ;;  %v10468_v16 = vld [vmem:[#allocation10 + $0x290] sm:$0xff]   ;;  %v10469_v24 = vld [vmem:[#allocation10 + $0x2c8] sm:$0xff]  }
 0x5ae   :  { %9161 = vmatpush3.bf16.msra.mxu0 %v10423_v34  ;;  %9179 = vmatpush3.bf16.msra.mxu1 %v10424_v12  ;;  %v10470_v34 = vld [vmem:[#allocation10 + $0x288] sm:$0xff]   ;;  %v10471_v12 = vld [vmem:[#allocation10 + $0x2c0] sm:$0xff]  }
 0x5af   :  { %9162 = vmatprep.subr.bf16.mxu0 %v10425_v22  ;;  %9180 = vmatprep.subr.bf16.mxu1 %v10426_v10  ;;  %v10472_v22 = vld [vmem:[#allocation10 + $0x280] sm:$0xff]  }
 0x5b2   :  { %9163 = vmatpush3.bf16.msra.mxu0 %v10427_v17  ;;  %9181 = vmatpush3.bf16.msra.mxu1 %v10428_v2 }
 0x5b3   :  { %9164 = vmatprep.subr.bf16.mxu0 %v10429_v19  ;;  %9182 = vmatprep.subr.bf16.mxu1 %v10430_v33 }
 0x5b6   :  { %9165 = vmatpush3.bf16.msra.mxu0 %v10431_v57  ;;  %9183 = vmatpush3.bf16.msra.mxu1 %v10432_v6 }
 0x5b7   :  { %9166 = vmatprep.subr.bf16.mxu0 %v10433_v55  ;;  %9184 = vmatprep.subr.bf16.mxu1 %v10434_v7 }
 0x5ba   :  { %9167 = vmatpush3.bf16.msra.mxu0 %v10435_v5  ;;  %9185 = vmatpush3.bf16.msra.mxu1 %v10436_v52 }
 0x5bb   :  { %7342 = vmatprep.subr.bf16.mxu0 %v11513_v41  ;;  %9186 = vmatprep.subr.bf16.mxu1 %v10437_v25 }
 0x5bd   :  { %7275 = vmatmul.mubr.bf16.vlgmr.msra.gmra.mxu0 %v6551_v47 }
 0x5be   :  { %9187 = vmatpush3.bf16.msra.mxu1 %v10438_v14  ;;  %7343 = vmatpush1.bf16.msra.mxu0 %v11515_v30 }
 0x5bf   :  { %7344 = vmatprep.subr.bf16.mxu0 %v11522_v61  ;;  %9188 = vmatprep.subr.bf16.mxu1 %v10439_v3 }
 0x5c0   :  { %7362 = vmatprep.mubr.bf16.mxu0 %v11634_v13 }
 0x5c2   :  { %9189 = vmatpush3.bf16.msra.mxu1 %v10440_v18  ;;  %7345 = vmatpush1.bf16.msra.mxu0 %v11527_v43 }
 0x5c3   :  { %7383 = vmatprep.subr.bf16.mxu0 %v11531_v51  ;;  %9196 = vmatprep.subr.bf16.mxu1 %v10441_v9 }
 0x5c5   :  { %7315 = vmatmul.mubr.bf16.vlgmr.msra.gmra.mxu1 %v6553_v63  ;;  %9010 = vmatmul.mubr.msk.bf16.vlgmr.msra.gmra.mxu0 %vm6465_vm3, %v7326_v26 }
 0x5c6   :  { %7384 = vmatpush1.bf16.msra.mxu0 %v11541_v40  ;;  %9197 = vmatpush3.bf16.msra.mxu1 %v10442_v59 }
 0x5c7   :  { %7385 = vmatprep.subr.bf16.mxu0 %v11545_v21  ;;  %9198 = vmatprep.subr.bf16.mxu1 %v10443_v35 }
 0x5c8   :  { %7403 = vmatprep.mubr.bf16.mxu0 %v11634_v13 }
 0x5ca   :  { %7386 = vmatpush1.bf16.msra.mxu0 %v11551_v50  ;;  %9199 = vmatpush3.bf16.msra.mxu1 %v10444_v11 }
 0x5cb   :  { %9200 = vmatprep.subr.bf16.mxu1 %v10445_v0  ;;  %9218 = vmatprep.subr.bf16.mxu0 %v10446_v1 }
 0x5cd   :  { %9011 = vmatmul.mubr.msk.bf16.vlgmr.msra.gmra.mxu0 %vm6465_vm3, %v7326_v26 }
 0x5ce   :  { %9201 = vmatpush3.bf16.msra.mxu1 %v10447_v48  ;;  %9219 = vmatpush3.bf16.msra.mxu0 %v10448_v27 }
 0x5cf   :  { %9202 = vmatprep.subr.bf16.mxu1 %v10449_v32  ;;  %9220 = vmatprep.subr.bf16.mxu0 %v10450_v58  ;;  %v10473_v58 = vld [vmem:[#allocation10 + $0x378] sm:$0xff]  }
 0x5d2   :  { %9203 = vmatpush3.bf16.msra.mxu1 %v10451_v8  ;;  %9221 = vmatpush3.bf16.msra.mxu0 %v10452_v45 }
 0x5d3   :  { %9204 = vmatprep.subr.bf16.mxu1 %v10453_v62  ;;  %9222 = vmatprep.subr.bf16.mxu0 %v10454_v36 }
 0x5d6   :  { %9205 = vmatpush3.bf16.msra.mxu1 %v10455_v60  ;;  %9223 = vmatpush3.bf16.msra.mxu0 %v10456_v49  ;;  %v10475_v60 = vld [vmem:[#allocation10 + $0x338] sm:$0xff]   ;;  %v10477_v49 = vld [vmem:[#allocation10 + $0x370] sm:$0xff]  }
 0x5d7   :  { %9206 = vmatprep.subr.bf16.mxu1 %v10457_v39  ;;  %9224 = vmatprep.subr.bf16.mxu0 %v10458_v53  ;;  %v10476_v39 = vld [vmem:[#allocation10 + $0x3b8] sm:$0xff]   ;;  %v10478_v53 = vld [vmem:[#allocation10 + $0x3f0] sm:$0xff]  }
 0x5da   :  { %9207 = vmatpush3.bf16.msra.mxu1 %v10459_v31  ;;  %9225 = vmatpush3.bf16.msra.mxu0 %v10460_v56  ;;  %v10483_v31 = vld [vmem:[#allocation10 + $0x328] sm:$0xff]   ;;  %v10485_v56 = vld [vmem:[#allocation10 + $0x360] sm:$0xff]  }
 0x5db   :  { %9208 = vmatprep.subr.bf16.mxu1 %v10461_v38  ;;  %9226 = vmatprep.subr.bf16.mxu0 %v10462_v44  ;;  %v10486_v38 = vld [vmem:[#allocation10 + $0x3e0] sm:$0xff]  }
 0x5dc   :  { %v10488_v44 = vld [vmem:[#allocation10 + $0x3a0] sm:$0xff]  }
 0x5de   :  { %9209 = vmatpush3.bf16.msra.mxu1 %v10463_v20  ;;  %9227 = vmatpush3.bf16.msra.mxu0 %v10464_v46  ;;  %v10489_v20 = vld [vmem:[#allocation10 + $0x358] sm:$0xff]  }
 0x5df   :  { %9210 = vmatprep.subr.bf16.mxu1 %v10465_v54  ;;  %9228 = vmatprep.subr.bf16.mxu0 %v10466_v15  ;;  %v10490_v46 = vld [vmem:[#allocation10 + $0x3d8] sm:$0xff]  }
 0x5e0   :  { %v10491_v54 = vld [vmem:[#allocation10 + $0x318] sm:$0xff]  }
 0x5e1   :  { %v10492_v15 = vld [vmem:[#allocation10 + $0x398] sm:$0xff]  }
 0x5e2   :  { %9211 = vmatpush3.bf16.msra.mxu1 %v10467_v42  ;;  %9229 = vmatpush3.bf16.msra.mxu0 %v10468_v16  ;;  %v10493_v42 = vld [vmem:[#allocation10 + $0x350] sm:$0xff]  }
 0x5e3   :  { %7774 = vmatprep.subr.bf16.mxu1 %v11513_v41  ;;  %9230 = vmatprep.subr.bf16.mxu0 %v10469_v24  ;;  %v10494_v16 = vld [vmem:[#allocation10 + $0x3d0] sm:$0xff]  }
 0x5e4   :  { %v10495_v24 = vld [vmem:[#allocation10 + $0x310] sm:$0xff]  }
 0x5e6   :  { %9231 = vmatpush3.bf16.msra.mxu0 %v10470_v34  ;;  %v10496_v34 = vld [vmem:[#allocation10 + $0x390] sm:$0xff]  }
 0x5e7   :  { %9232 = vmatprep.subr.bf16.mxu0 %v10471_v12  ;;  %v10497_v12 = vld [vmem:[#allocation10 + $0x348] sm:$0xff]  }
 0x5ea   :  { %9233 = vmatpush3.bf16.msra.mxu0 %v10472_v22  ;;  %v10498_v22 = vld [vmem:[#allocation10 + $0x3c8] sm:$0xff]  }
 0x5eb   :  { %7815 = vmatprep.subr.bf16.mxu0 %v11531_v51  ;;  %v7754_v51 = vadd.s32 3, %v11466_v37 }
 0x5ed   :  { %vm7755_vm0 = vcmp.eq.s32.totalorder %v11463_v23, %v7754_v51 }
 0x5ee   :  { %v9044_v37 = vsel %vm7755_vm0, 1.0, %v10670_v29  ;;  %v10474_v29 = vld [vmem:[#allocation10 + $0x3f8] sm:$0xff]  }
 0x5ef   :  { %v7758_v45 = vpack.c.bf16 %v9044_v37, %v9044_v37 }
 0x65d   :  { %v9124_v10 = vpop.f32.mrf.mxu0 }
 0x65f   :  { %v9125_v17 = vpop.f32.mrf.mxu0 }
 0x660   :  { %v9126_v2 = vadd.f32 %v9125_v17, %v9124_v10  ;;  %v10499_v10 = vld [vmem:[#allocation10 + $0x308] sm:$0xff]  }
 0x661   :  { %v9127_v19 = vpop.f32.mrf.mxu0  ;;  %v10500_v17 = vld [vmem:[#allocation10 + $0x388] sm:$0xff]  }
 0x662   :  { %v10502_v19 = vld [vmem:[#allocation10 + $0x3c0] sm:$0xff]  }
 0x663   :  { %v9128_v33 = vpop.f32.mrf.mxu0 }
 0x664   :  { %v10503_v33 = vld [vmem:[#allocation10 + $0x300] sm:$0xff]  }
 0x665   :  { %v9146_v57 = vpop.f32.mrf.mxu1 }
 0x667   :  { %v9147_v6 = vpop.f32.mrf.mxu1 }
 0x668   :  { %v9148_v55 = vadd.f32 %v9147_v6, %v9146_v57  ;;  %v10504_v57 = vld [vmem:[#allocation10 + $0x380] sm:$0xff]  }
 0x669   :  { %v9149_v7 = vpop.f32.mrf.mxu1 }
 0x66a   :  { %v7045_v5 = vadd.f32 %v9148_v55, %v9126_v2  ;;  %v10501_v2 = vld [vmem:[#allocation10 + $0x340] sm:$0xff]  }
 0x66b   :  { %v9150_v52 = vpop.f32.mrf.mxu1 }
 0x67d   :  { %v9168_v41 = vpop.f32.mrf.mxu0 }
 0x67f   :  { %v9169_v25 = vpop.f32.mrf.mxu0 }
 0x680   :  { %v9170_v28 = vadd.f32 %v9169_v25, %v9168_v41 }
 0x681   :  { %v9171_v14 = vpop.f32.mrf.mxu0 }
 0x682   :  { %v7277_v47 = vadd.f32 %v9170_v28, %v7045_v5 }
 0x683   :  { %v9172_v3 = vpop.f32.mrf.mxu0 }
 0x685   :  { %v9190_v18 = vpop.f32.mrf.mxu1  ;;  %v7364_v4 = vpop.f32.mrf.mxu0 }
 0x686   :  { %v7412_v35 = vpack.c.bf16 %v7364_v4, %v7364_v4 }
 0x687   :  { %v9191_v9 = vpop.f32.mrf.mxu1  ;;  %v7366_v26 = vpop.f32.mrf.mxu0 }
 0x688   :  { %v9192_v59 = vadd.f32 %v9191_v9, %v9190_v18  ;;  %v7413_v63 = vpack.c.bf16 %v7366_v26, %v7366_v26 }
 0x689   :  { %v9193_v11 = vpop.f32.mrf.mxu1  ;;  %v7368_v0 = vpop.f32.mrf.mxu0 }
 0x68a   :  { %v11597_v1 = vadd.f32 %v9192_v59, %v7277_v47  ;;  %7705 = vmatprep.mubr.bf16.mxu1 %v7413_v63 }
 0x68b   :  { %v9194_v48 = vpop.f32.mrf.mxu1  ;;  %v7369_v27 = vpop.f32.mrf.mxu0  ;;  %7706 = vmatmul.mubr.bf16.vlgmr.msra.gmra.mxu1 %v7412_v35 }
 0x68c   :  { %7775 = vmatpush1.bf16.msra.mxu1 %v11515_v30  ;;  %7794 = vmatprep.mubr.bf16.mxu1 %v11634_v13 }
 0x68d   :  { %7776 = vmatprep.subr.bf16.mxu1 %v11522_v61  ;;  %v7405_v32 = vpop.f32.mrf.mxu0  ;;  %v10479_v61 = vld [vmem:[#allocation10 + $0x330] sm:$0xff]  }
 0x68e   :  { %v7414_v23 = vpack.c.bf16 %v7405_v32, %v7405_v32 }
 0x68f   :  { %v7407_v8 = vpop.f32.mrf.mxu0 }
 0x690   :  { %v7415_v62 = vpack.c.bf16 %v7407_v8, %v7407_v8  ;;  %7777 = vmatpush1.bf16.msra.mxu1 %v11527_v43  ;;  %v10481_v43 = vld [vmem:[#allocation10 + $0x368] sm:$0xff]  }
 0x691   :  { %v7409_v36 = vpop.f32.mrf.mxu0  ;;  %9240 = vmatprep.subr.bf16.mxu1 %v10473_v58 }
 0x692   :  { %7745 = vmatprep.mubr.bf16.mxu0 %v7415_v62 }
 0x693   :  { %7746 = vmatmul.mubr.bf16.vlgmr.msra.gmra.mxu0 %v7414_v23  ;;  %v7410_v30 = vpop.f32.mrf.mxu0  ;;  %9045 = vmatmul.mubr.msk.bf16.vlgmr.msra.gmra.mxu1 %vm6465_vm3, %v7758_v45 }
 0x694   :  { %7816 = vmatpush1.bf16.msra.mxu0 %v11541_v40  ;;  %7835 = vmatprep.mubr.bf16.mxu0 %v11634_v13  ;;  %v10480_v40 = vld [vmem:[#allocation10 + $0x3b0] sm:$0xff]   ;;  %v10482_v13 = vld [vmem:[#allocation10 + $0x3e8] sm:$0xff]  }
 0x695   :  { %7817 = vmatprep.subr.bf16.mxu0 %v11545_v21  ;;  %9241 = vmatpush3.bf16.msra.mxu1 %v10475_v60  ;;  %v10484_v21 = vld [vmem:[#allocation10 + $0x3a8] sm:$0xff]  }
 0x696   :  { %9242 = vmatprep.subr.bf16.mxu1 %v10477_v49 }
 0x698   :  { %7818 = vmatpush1.bf16.msra.mxu0 %v11551_v50  ;;  %v10487_v50 = vld [vmem:[#allocation10 + $0x320] sm:$0xff]  }
 0x699   :  { %9262 = vmatprep.subr.bf16.mxu0 %v10474_v29  ;;  %9243 = vmatpush3.bf16.msra.mxu1 %v10479_v61 }
 0x69a   :  { %9244 = vmatprep.subr.bf16.mxu1 %v10481_v43 }
 0x69b   :  { %9046 = vmatmul.mubr.msk.bf16.vlgmr.msra.gmra.mxu0 %vm6465_vm3, %v7758_v45 }
 0x69c   :  { %9263 = vmatpush3.bf16.msra.mxu0 %v10476_v39 }
 0x69d   :  { %9264 = vmatprep.subr.bf16.mxu0 %v10478_v53  ;;  %9245 = vmatpush3.bf16.msra.mxu1 %v10483_v31 }
 0x69e   :  { %9246 = vmatprep.subr.bf16.mxu1 %v10485_v56 }
 0x6a0   :  { %9265 = vmatpush3.bf16.msra.mxu0 %v10480_v40 }
 0x6a1   :  { %9266 = vmatprep.subr.bf16.mxu0 %v10482_v13  ;;  %9247 = vmatpush3.bf16.msra.mxu1 %v10487_v50 }
 0x6a2   :  { %9248 = vmatprep.subr.bf16.mxu1 %v10489_v20 }
 0x6a4   :  { %9267 = vmatpush3.bf16.msra.mxu0 %v10484_v21 }
 0x6a5   :  { %9268 = vmatprep.subr.bf16.mxu0 %v10486_v38  ;;  %9249 = vmatpush3.bf16.msra.mxu1 %v10491_v54 }
 0x6a6   :  { %9250 = vmatprep.subr.bf16.mxu1 %v10493_v42 }
 0x6a8   :  { %9269 = vmatpush3.bf16.msra.mxu0 %v10488_v44 }
 0x6a9   :  { %9270 = vmatprep.subr.bf16.mxu0 %v10490_v46  ;;  %9251 = vmatpush3.bf16.msra.mxu1 %v10495_v24 }
 0x6aa   :  { %9252 = vmatprep.subr.bf16.mxu1 %v10497_v12 }
 0x6ac   :  { %9271 = vmatpush3.bf16.msra.mxu0 %v10492_v15 }
 0x6ad   :  { %9272 = vmatprep.subr.bf16.mxu0 %v10494_v16  ;;  %9253 = vmatpush3.bf16.msra.mxu1 %v10499_v10 }
 0x6ae   :  { %9254 = vmatprep.subr.bf16.mxu1 %v10501_v2 }
 0x6b0   :  { %9273 = vmatpush3.bf16.msra.mxu0 %v10496_v34 }
 0x6b1   :  { %9274 = vmatprep.subr.bf16.mxu0 %v10498_v22  ;;  %9255 = vmatpush3.bf16.msra.mxu1 %v10503_v33 }
 0x6b4   :  { %9275 = vmatpush3.bf16.msra.mxu0 %v10500_v17 }
 0x6b5   :  { %9276 = vmatprep.subr.bf16.mxu0 %v10502_v19 }
 0x6b8   :  { %9277 = vmatpush3.bf16.msra.mxu0 %v10504_v57 }
 0x74b   :  { %v9212_v6 = vpop.f32.mrf.mxu1 }
 0x74d   :  { %v9213_v55 = vpop.f32.mrf.mxu1 }
 0x74e   :  { %v9214_v7 = vadd.f32 %v9213_v55, %v9212_v6 }
 0x74f   :  { %v9215_v5 = vpop.f32.mrf.mxu1 }
 0x751   :  { %v9216_v52 = vpop.f32.mrf.mxu1 }
 0x753   :  { %v9234_v41 = vpop.f32.mrf.mxu0  ;;  %v7796_v25 = vpop.f32.mrf.mxu1 }
 0x754   :  { %v7844_v14 = vpack.c.bf16 %v7796_v25, %v7796_v25 }
 0x755   :  { %v9235_v28 = vpop.f32.mrf.mxu0  ;;  %v7798_v47 = vpop.f32.mrf.mxu1 }
 0x756   :  { %v9236_v3 = vadd.f32 %v9235_v28, %v9234_v41  ;;  %v7845_v18 = vpack.c.bf16 %v7798_v47, %v7798_v47 }
 0x757   :  { %v9237_v4 = vpop.f32.mrf.mxu0  ;;  %v7800_v51 = vpop.f32.mrf.mxu1 }
 0x758   :  { %v7748_v9 = vadd.f32 %v9236_v3, %v9214_v7  ;;  %8137 = vmatprep.mubr.bf16.mxu1 %v7845_v18 }
 0x759   :  { %v9238_v26 = vpop.f32.mrf.mxu0  ;;  %8138 = vmatmul.mubr.bf16.vlgmr.msra.gmra.mxu1 %v7844_v14  ;;  %v7801_v59 = vpop.f32.mrf.mxu1 }
 0x75a   :  { %v7753_v63 = vadd.f32 %v7748_v9, %v11597_v1  ;;  %v9079_v1 = vld [vmem:[#allocation11] ss:$0 sm:$0xff] }
 0x75b   :  { %v7837_v35 = vpop.f32.mrf.mxu0 }
 0x75c   :  { %v7846_v48 = vpack.c.bf16 %v7837_v35, %v7837_v35 }
 0x75d   :  { %v7839_v11 = vpop.f32.mrf.mxu0 }
 0x75e   :  { %v7847_v0 = vpack.c.bf16 %v7839_v11, %v7839_v11 }
 0x75f   :  { %v7841_v27 = vpop.f32.mrf.mxu0 }
 0x760   :  { %8177 = vmatprep.mubr.bf16.mxu0 %v7847_v0 }
 0x761   :  { %8178 = vmatmul.mubr.bf16.vlgmr.msra.gmra.mxu0 %v7846_v48  ;;  %v7842_v37 = vpop.f32.mrf.mxu0 }
 0x819   :  { %v9256_v32 = vpop.f32.mrf.mxu1 }
 0x81b   :  { %v9257_v58 = vpop.f32.mrf.mxu1 }
 0x81c   :  { %v9258_v36 = vadd.f32 %v9257_v58, %v9256_v32 }
 0x81d   :  { %v9259_v8 = vpop.f32.mrf.mxu1 }
 0x81f   :  { %v9260_v45 = vpop.f32.mrf.mxu1 }
 0x821   :  { %v9278_v62 = vpop.f32.mrf.mxu0 }
 0x823   :  { %v9279_v23 = vpop.f32.mrf.mxu0 }
 0x824   :  { %v9280_v60 = vadd.f32 %v9279_v23, %v9278_v62 }
 0x825   :  { %v9281_v49 = vpop.f32.mrf.mxu0 }
 0x826   :  { %v8180_v30 = vadd.f32 %v9280_v60, %v9258_v36 }
 0x827   :  { %v9282_v29 = vpop.f32.mrf.mxu0 }
 0x828   :  { %v8185_v61 = vadd.f32 %v8180_v30, %v7753_v63 }
 0x82a   :  { %v8193_v43 = vadd.f32 %v9079_v1, %v8185_v61 }
 0x82c   :  { %8194 = vst [vmem:[#allocation13] sm:$0x3] %v8193_v43 }
 0x82d   :  { %10638 = shalt.err (!%p10635_p6)
}
 0x82e   :  { %8204 = dma.vmem_to_hbm [thread:$0]  %s8202_s18, 32, %s11621_s7, [#allocation4]  }
 0x82f   :  { %10655 = dma.done.wait [#allocation4], 32  }
 0x830   :  { %10656 = vsyncadd [#allocation4], 4294967264 }
 0x831   :  { %8208 = vsyncpa [#allocation3], 1 }
 0x832   :  { %8209 = vsyncpa [#allocation6], 1 }
 0x833   :  { %8210 = vsyncpa [#allocation9], 1 }
 0x834   :  { %8211 = vsyncpa [#allocation12], 1 }
 0x835   :  { %8212 = vsyncpa [#allocation4], 1 }

</bundles_post_ra>
